<compile_context>
chip_gen: v6e
topology: v6e:2x2x1
jax: 0.10.0
libtpu: 0.0.40
codegen_flags: <defaults>
</compile_context>

<pallas_src>
import functools

import jax
import jax.numpy as jnp
from jax.experimental import pallas as pl
from jax.experimental.pallas import tpu as pltpu

_EPS = 1e-5  # nn.BatchNorm2d default


def _round_up(x, m):
    return (x + m - 1) // m * m


def _vmem_limit(per_step_bytes):
    """Generation-aware VMEM budget: ~4x the per-step working set, clamped to 3/4 capacity."""
    try:
        cap = int(pltpu.get_tpu_info().vmem_capacity_bytes)
    except Exception:  # pragma: no cover - conservative fallback (v7x per-TC size)
        cap = 64 * 1024 * 1024
    return int(min(max(4 * int(per_step_bytes), 4 << 20), (cap * 3) // 4))


# --------------------------- Pallas kernels ---------------------------------

def _conv_stats_kernel(x_ref, wt_ref, ins_ref, inb_ref, g_ref, bt_ref,     # inputs
                       y_ref, scale_ref, shift_ref,                        # outputs
                       sum_acc, sq_acc,                                    # VMEM scratch
                       *, ksz, th, w_out, h_valid, c_in, c_out, inv_m,
                       apply_prologue, needs_mask, dot_dtype, sublane_stats):
    """Pass 1 for one (image, row-tile):

      * optional fused BN+ReLU of the PREVIOUS layer applied to the halo'd tile (masked so that
        the conv 'SAME' zero padding stays exactly zero),
      * Conv(k x k) as k*k shifted (TH*W, Cin) x (Cin, Cout) matmuls accumulated in f32,
      * cross-tile per-channel sum / sum-of-squares for train-mode BatchNorm,
      * on the LAST grid step: scale = gamma * rsqrt(var+eps), shift = beta - mean*scale.

    x_ref  : (th+2p, w_out+2p, c_in)  halo'd activation tile (compute dtype)
    wt_ref : (ksz*ksz, c_in, c_out)   conv taps (compute dtype)
    ins/inb: (1, c_in) f32            previous layer's folded BN scale/shift (prologue)
    g/bt   : (1, c_out) f32           this layer's BN gamma/beta
    y_ref  : (th*w_out, c_out)        raw conv output tile
    """
    n_i = pl.program_id(0)
    i = pl.program_id(1)
    first = jnp.logical_and(n_i == 0, i == 0)
    last = jnp.logical_and(n_i == pl.num_programs(0) - 1,
                           i == pl.num_programs(1) - 1)

    @pl.when(first)
    def _():
        sum_acc[...] = jnp.zeros_like(sum_acc)
        sq_acc[...] = jnp.zeros_like(sq_acc)

    p = ksz // 2
    thp = th + 2 * p
    wp = w_out + 2 * p
    tm = th * w_out

    xin = x_ref[...]
    if apply_prologue:
        # relu(x*scale + shift) of the previous BN, in f32; spatial pad / fill rows must stay 0.
        xf = xin.astype(jnp.float32)
        xf = jnp.maximum(xf * ins_ref[...].reshape(1, 1, c_in)
                         + inb_ref[...].reshape(1, 1, c_in), 0.0)
        rr = jax.lax.broadcasted_iota(jnp.int32, (thp, wp, 1), 0)
        cc = jax.lax.broadcasted_iota(jnp.int32, (thp, wp, 1), 1)
        row_g = i * th + rr                       # row index in the spatially padded image
        real = ((row_g >= p) & (row_g < h_valid + p)
                & (cc >= p) & (cc < w_out + p))
        xin = jnp.where(real, xf, 0.0).astype(dot_dtype)

    # k*k shifted matmuls, f32 accumulation on the MXU.
    acc = jnp.zeros((tm, c_out), jnp.float32)
    for kh in range(ksz):
        for kw in range(ksz):
            patch = xin[kh:kh + th, kw:kw + w_out, :].reshape(tm, c_in)
            acc = acc + jnp.dot(patch, wt_ref[kh * ksz + kw],
                                preferred_element_type=jnp.float32)
    y_ref[...] = acc.astype(y_ref.dtype)

    # BatchNorm statistics (exclude rows beyond the true image height, if any).
    y_stat = acc
    if needs_mask:
        ridx = jax.lax.broadcasted_iota(jnp.int32, (tm, 1), 0)
        n_valid = jnp.clip(h_valid - i * th, 0, th)
        y_stat = jnp.where(ridx < n_valid * w_out, acc, 0.0)
    if sublane_stats:
        # VPU-only partial sums into (8, C); the 8->1 cross-sublane reduce is deferred to the end.
        part = y_stat.reshape(tm // 8, 8, c_out)
        sum_acc[...] += jnp.sum(part, axis=0)
        sq_acc[...] += jnp.sum(part * part, axis=0)
    else:
        sum_acc[...] += jnp.sum(y_stat, axis=0, keepdims=True)
        sq_acc[...] += jnp.sum(y_stat * y_stat, axis=0, keepdims=True)

    @pl.when(last)
    def _():
        tot = jnp.sum(sum_acc[...], axis=0, keepdims=True)
        tot2 = jnp.sum(sq_acc[...], axis=0, keepdims=True)
        mean = tot * inv_m
        var = jnp.maximum(tot2 * inv_m - mean * mean, 0.0)   # clamp: cancellation-safe
        scale = g_ref[...] * jax.lax.rsqrt(var + _EPS)       # EUP slot
        scale_ref[...] = scale
        shift_ref[...] = bt_ref[...] - mean * scale


def _bn_relu_kernel(y_ref, s_ref, b_ref, o_ref):
    """Final pass: y*scale + shift, ReLU (one fused multiply-add per element)."""
    y = y_ref[...].astype(jnp.float32)
    o_ref[...] = jnp.maximum(y * s_ref[...] + b_ref[...], 0.0).astype(o_ref.dtype)


# --------------------------- Pallas wrappers ---------------------------------

def _prep_tiles(act, th, p):
    """(N, H, W, C) -> halo-replicated row tiles (N, nH, th+2p, W+2p, C)."""
    n, h, w, c = act.shape
    hpad = _round_up(h, th)
    a = jnp.pad(act, ((0, 0), (p, hpad - h + p), (p, p), (0, 0)))
    nh = hpad // th
    tiles = jnp.stack([a[:, i * th:i * th + th + 2 * p] for i in range(nh)], axis=1)
    return tiles, nh, hpad


def conv_bn_stats(act, w_taps, gamma, beta, in_scale, in_shift, *, ksz, th,
                  apply_prologue, compute_dtype):
    """Conv (+ optional fused input BN/ReLU) + train-mode BN statistics.

    act: (N, H, W, Cin) activations already in compute_dtype (raw previous conv output when
    apply_prologue=True).  Returns (y, scale, shift, nH, Hpad) with y shaped (N, nH, th*W, Cout).
    """
    n, h, w, c_in = act.shape
    c_out = w_taps.shape[-1]
    p = ksz // 2
    xt, nh, hpad = _prep_tiles(act, th, p)
    thp, wp = th + 2 * p, w + 2 * p
    tm = th * w
    sublane_stats = (tm % 8 == 0)
    stat_rows = 8 if sublane_stats else 1

    kern = functools.partial(
        _conv_stats_kernel, ksz=ksz, th=th, w_out=w, h_valid=h,
        c_in=c_in, c_out=c_out, inv_m=1.0 / float(n * h * w),
        apply_prologue=apply_prologue, needs_mask=(hpad != h),
        dot_dtype=compute_dtype, sublane_stats=sublane_stats)

    in_bytes = jnp.dtype(compute_dtype).itemsize
    tile_bytes = (thp * wp * c_in + tm * c_out) * in_bytes
    resident = (ksz * ksz * c_in * c_out) * in_bytes + (6 * c_out + 2 * c_in) * 4
    cost = pl.CostEstimate(
        flops=2 * n * hpad * w * ksz * ksz * c_in * c_out,
        transcendentals=0,
        bytes_accessed=int(xt.size * in_bytes + w_taps.size * in_bytes
                           + n * nh * tm * c_out * in_bytes + 8 * c_out * 4),
    )

    y, scale, shift = pl.pallas_call(
        kern,
        out_shape=(
            jax.ShapeDtypeStruct((n, nh, tm, c_out), compute_dtype),
            jax.ShapeDtypeStruct((1, c_out), jnp.float32),
            jax.ShapeDtypeStruct((1, c_out), jnp.float32),
        ),
        grid=(n, nh),
        in_specs=[
            pl.BlockSpec((None, None, thp, wp, c_in), lambda b, i: (b, i, 0, 0, 0)),
            pl.BlockSpec((ksz * ksz, c_in, c_out), lambda b, i: (0, 0, 0)),
            pl.BlockSpec((1, c_in), lambda b, i: (0, 0)),
            pl.BlockSpec((1, c_in), lambda b, i: (0, 0)),
            pl.BlockSpec((1, c_out), lambda b, i: (0, 0)),
            pl.BlockSpec((1, c_out), lambda b, i: (0, 0)),
        ],
        out_specs=(
            pl.BlockSpec((None, None, tm, c_out), lambda b, i: (b, i, 0, 0)),
            pl.BlockSpec((1, c_out), lambda b, i: (0, 0)),
            pl.BlockSpec((1, c_out), lambda b, i: (0, 0)),
        ),
        scratch_shapes=[
            pltpu.VMEM((stat_rows, c_out), jnp.float32),
            pltpu.VMEM((stat_rows, c_out), jnp.float32),
        ],
        # Both axes "arbitrary": the sum/sumsq scratch accumulates sequentially across the
        # whole grid (see TODO above for the v7x per-core-partials variant).
        compiler_params=pltpu.CompilerParams(
            dimension_semantics=("arbitrary", "arbitrary"),
            vmem_limit_bytes=_vmem_limit(2 * tile_bytes + resident),
        ),
        cost_estimate=cost,
    )(xt, w_taps, in_scale, in_shift, gamma, beta)
    return y, scale, shift, nh, hpad


def bn_relu(y, scale, shift, *, out_dtype=jnp.float32):
    """Standalone BN/ReLU for the final conv output (fully parallel over tiles)."""
    n, nh, tm, c = y.shape
    return pl.pallas_call(
        _bn_relu_kernel,
        out_shape=jax.ShapeDtypeStruct((n, nh, tm, c), out_dtype),
        grid=(n, nh),
        in_specs=[
            pl.BlockSpec((None, None, tm, c), lambda b, i: (b, i, 0, 0)),
            pl.BlockSpec((1, c), lambda b, i: (0, 0)),
            pl.BlockSpec((1, c), lambda b, i: (0, 0)),
        ],
        out_specs=pl.BlockSpec((None, None, tm, c), lambda b, i: (b, i, 0, 0)),
        compiler_params=pltpu.CompilerParams(
            dimension_semantics=("parallel", "parallel")),
    )(y, scale, shift)


# --------------------------- top-level forward --------------------------------

def double_conv_forward(x_nchw, params, k=3, th=None, compute_dtype=jnp.bfloat16):
    """DoubleConv forward. x_nchw: (N, Cin, H, W). Returns (N, Cout, H, W) f32."""
    w1, b1, g1, bt1, w2, b2, g2, bt2 = params   # w* in HWIO layout (k, k, Cin, Cout)
    # Conv bias followed by train-mode BatchNorm is exactly cancelled (it shifts the batch mean
    # by the same per-channel amount), so the bias add is skipped entirely.
    del b1, b2

    n, c_in, h, w = x_nchw.shape
    c_mid = w1.shape[-1]
    c_out = w2.shape[-1]
    if th is None:
        th = max(1, min(h, max(8, 1024 // max(w, 1))))   # ~1k rows per tile by default
    th = min(th, h)

    # Cast to the MXU compute dtype BEFORE materializing the tiled layout (halves HBM bytes).
    x = jnp.transpose(x_nchw, (0, 2, 3, 1)).astype(compute_dtype)   # NCHW -> NHWC
    wt1 = w1.reshape(k * k, c_in, c_mid).astype(compute_dtype)
    wt2 = w2.reshape(k * k, c_mid, c_out).astype(compute_dtype)
    g1r = g1.reshape(1, c_mid).astype(jnp.float32)
    bt1r = bt1.reshape(1, c_mid).astype(jnp.float32)
    g2r = g2.reshape(1, c_out).astype(jnp.float32)
    bt2r = bt2.reshape(1, c_out).astype(jnp.float32)
    one_in = jnp.ones((1, c_in), jnp.float32)
    zero_in = jnp.zeros((1, c_in), jnp.float32)

    # conv1: raw conv output + folded BN1 constants (BN1/ReLU is deferred into conv2's prologue).
    y1, s1, sh1, nh1, hp1 = conv_bn_stats(
        x, wt1, g1r, bt1r, one_in, zero_in, ksz=k, th=th,
        apply_prologue=False, compute_dtype=compute_dtype)
    a1 = y1.reshape(n, hp1, w, c_mid)[:, :h]                 # layout glue only

    # conv2: fused relu(y1*scale1 + shift1) prologue + conv + BN2 statistics.
    y2, s2, sh2, nh2, hp2 = conv_bn_stats(
        a1, wt2, g2r, bt2r, s1, sh1, ksz=k, th=th,
        apply_prologue=True, compute_dtype=compute_dtype)

    out = bn_relu(y2, s2, sh2, out_dtype=jnp.float32)
    out = out.reshape(n, hp2, w, c_out)[:, :h]
    return jnp.transpose(out, (0, 3, 1, 2))                  # NHWC -> NCHW


# ---------------- pure-JAX reference (for correctness check) ----------------

def _ref_conv_bn_relu(x_nhwc, w_hwio, b, g, beta):
    y = jax.lax.conv_general_dilated(
        x_nhwc, w_hwio, window_strides=(1, 1), padding="SAME",
        dimension_numbers=("NHWC", "HWIO", "NHWC")) + b
    mean = jnp.mean(y, axis=(0, 1, 2))
    var = jnp.mean((y - mean) ** 2, axis=(0, 1, 2))
    y = (y - mean) * jax.lax.rsqrt(var + _EPS) * g + beta
    return jnp.maximum(y, 0.0)


def _ref_double_conv(x_nchw, params):
    w1, b1, g1, bt1, w2, b2, g2, bt2 = params
    x = jnp.transpose(x_nchw, (0, 2, 3, 1))
    y = _ref_conv_bn_relu(x, w1, b1, g1, bt1)
    y = _ref_conv_bn_relu(y, w2, b2, g2, bt2)
    return jnp.transpose(y, (0, 3, 1, 2))


if __name__ == "__main__":
    N, Cin, Cmid, Cout, H, W, k = 2, 4, 8, 8, 16, 16, 3

    key = jax.random.PRNGKey(0)
    ks = jax.random.split(key, 9)
    x = jax.random.normal(ks[0], (N, Cin, H, W), jnp.float32)

    # Deterministic synthetic parameters (shapes follow the nn.Module __init__).
    w1 = 0.2 * jax.random.normal(ks[1], (k, k, Cin, Cmid), jnp.float32)   # conv1 weight (HWIO)
    b1 = 0.1 * jax.random.normal(ks[2], (Cmid,), jnp.float32)             # conv1 bias
    g1 = 1.0 + 0.1 * jax.random.normal(ks[3], (Cmid,), jnp.float32)       # bn1 gamma
    bt1 = 0.1 * jax.random.normal(ks[4], (Cmid,), jnp.float32)            # bn1 beta
    w2 = 0.2 * jax.random.normal(ks[5], (k, k, Cmid, Cout), jnp.float32)  # conv2 weight (HWIO)
    b2 = 0.1 * jax.random.normal(ks[6], (Cout,), jnp.float32)             # conv2 bias
    g2 = 1.0 + 0.1 * jax.random.normal(ks[7], (Cout,), jnp.float32)       # bn2 gamma
    bt2 = 0.1 * jax.random.normal(ks[8], (Cout,), jnp.float32)            # bn2 beta
    params = (w1, b1, g1, bt1, w2, b2, g2, bt2)

    ref = _ref_double_conv(x, params)

    # f32 path: strict correctness check (th=8 -> 2 row tiles per image, grid (2,2); exercises the
    # cross-tile sum/sumsq accumulation, the pl.when init/finalize paths and the fused prologue).
    fwd_f32 = jax.jit(functools.partial(double_conv_forward, k=k, th=8,
                                        compute_dtype=jnp.float32))
    out_f32 = jax.block_until_ready(fwd_f32(x, params))
    assert out_f32.shape == (N, Cout, H, W), out_f32.shape
    err_f32 = float(jnp.max(jnp.abs(out_f32 - ref)))
    assert err_f32 < 2e-4, f"f32 path max abs err {err_f32}"

    # bf16 path (default perf path): operands AND the y intermediate are bf16, BN stats stay f32.
    fwd_bf16 = jax.jit(functools.partial(double_conv_forward, k=k, th=8,
                                         compute_dtype=jnp.bfloat16))
    out_bf16 = jax.block_until_ready(fwd_bf16(x, params))
    err_max = float(jnp.max(jnp.abs(out_bf16 - ref)))
    err_mean = float(jnp.mean(jnp.abs(out_bf16 - ref)))
    assert err_max < 2.5e-1, f"bf16 path max abs err {err_max}"
    assert err_mean < 5e-2, f"bf16 path mean abs err {err_mean}"

    print("KERNEL_OK")
</pallas_src>

<mosaic_0001>
module attributes {stable_mosaic.version = 11 : i64} {
  func.func @_conv_stats_kernel(%arg0: i32, %arg1: i32, %arg2: memref<1x1x10x18x4xf32, #tpu.memory_space<vmem>>, %arg3: memref<9x4x8xf32, #tpu.memory_space<vmem>>, %arg4: memref<1x4xf32, #tpu.memory_space<vmem>>, %arg5: memref<1x4xf32, #tpu.memory_space<vmem>>, %arg6: memref<1x8xf32, #tpu.memory_space<vmem>>, %arg7: memref<1x8xf32, #tpu.memory_space<vmem>>, %arg8: memref<1x1x128x8xf32, #tpu.memory_space<vmem>>, %arg9: memref<1x8xf32, #tpu.memory_space<vmem>>, %arg10: memref<1x8xf32, #tpu.memory_space<vmem>>, %arg11: memref<8x8xf32, #tpu.memory_space<vmem>>, %arg12: memref<8x8xf32, #tpu.memory_space<vmem>>) attributes {dimension_semantics = [#tpu.dimension_semantics<arbitrary>, #tpu.dimension_semantics<arbitrary>], iteration_bounds = array<i64: 2, 2>, scalar_prefetch = 0 : i64, scratch_operands = 2 : i64, tpu.core_type = #tpu.core_type<tc>, window_params = [{transform_indices = @transform_0, window_bounds = array<i64: 1, 1, 10, 18, 4>}, {pipeline_mode = #tpu.pipeline_mode<synchronous>, transform_indices = @transform_1, window_bounds = array<i64: 9, 4, 8>}, {pipeline_mode = #tpu.pipeline_mode<synchronous>, transform_indices = @transform_2, window_bounds = array<i64: 1, 4>}, {pipeline_mode = #tpu.pipeline_mode<synchronous>, transform_indices = @transform_3, window_bounds = array<i64: 1, 4>}, {pipeline_mode = #tpu.pipeline_mode<synchronous>, transform_indices = @transform_4, window_bounds = array<i64: 1, 8>}, {pipeline_mode = #tpu.pipeline_mode<synchronous>, transform_indices = @transform_5, window_bounds = array<i64: 1, 8>}, {transform_indices = @transform_6, window_bounds = array<i64: 1, 1, 128, 8>}, {pipeline_mode = #tpu.pipeline_mode<synchronous>, transform_indices = @transform_7, window_bounds = array<i64: 1, 8>}, {pipeline_mode = #tpu.pipeline_mode<synchronous>, transform_indices = @transform_8, window_bounds = array<i64: 1, 8>}]} {
    %c0_i32 = arith.constant 0 : i32
    %0 = arith.cmpi eq, %arg0, %c0_i32 : i32
    %c0_i32_0 = arith.constant 0 : i32
    %1 = arith.cmpi eq, %arg1, %c0_i32_0 : i32
    %2 = arith.andi %0, %1 : i1
    %c1_i32 = arith.constant 1 : i32
    %3 = arith.cmpi eq, %arg0, %c1_i32 : i32
    %c1_i32_1 = arith.constant 1 : i32
    %4 = arith.cmpi eq, %arg1, %c1_i32_1 : i32
    %5 = arith.andi %3, %4 : i1
    %6 = arith.extui %2 : i1 to i32
    %c0_i32_2 = arith.constant 0 : i32
    %7 = arith.cmpi ne, %6, %c0_i32_2 : i32
    scf.if %7 {
      %cst_50 = arith.constant 0.000000e+00 : f32
      %80 = vector.broadcast %cst_50 : f32 to vector<8x8xf32>
      %c0_51 = arith.constant 0 : index
      %c0_52 = arith.constant 0 : index
      %81 = vector.load %arg11[%c0_51, %c0_52] : memref<8x8xf32, #tpu.memory_space<vmem>>, vector<8x8xf32>
      tpu.vector_store %arg11[%c0_51, %c0_52], %80 {strides = array<i32>} : memref<8x8xf32, #tpu.memory_space<vmem>>, vector<8x8xf32>,
      %cst_53 = arith.constant 0.000000e+00 : f32
      %82 = vector.broadcast %cst_53 : f32 to vector<8x8xf32>
      %c0_54 = arith.constant 0 : index
      %c0_55 = arith.constant 0 : index
      %83 = vector.load %arg12[%c0_54, %c0_55] : memref<8x8xf32, #tpu.memory_space<vmem>>, vector<8x8xf32>
      tpu.vector_store %arg12[%c0_54, %c0_55], %82 {strides = array<i32>} : memref<8x8xf32, #tpu.memory_space<vmem>>, vector<8x8xf32>,
    } else {
    }
    %c0 = arith.constant 0 : index
    %c0_3 = arith.constant 0 : index
    %c0_4 = arith.constant 0 : index
    %c0_5 = arith.constant 0 : index
    %c0_6 = arith.constant 0 : index
    %8 = vector.load %arg2[%c0, %c0_3, %c0_4, %c0_5, %c0_6] : memref<1x1x10x18x4xf32, #tpu.memory_space<vmem>>, vector<1x1x10x18x4xf32>
    %9 = vector.shape_cast %8 : vector<1x1x10x18x4xf32> to vector<10x18x4xf32>
    %cst = arith.constant 0.000000e+00 : f32
    %10 = vector.broadcast %cst : f32 to vector<128x8xf32>
    %11 = vector.extract_strided_slice %9 {offsets = [0, 0, 0], sizes = [8, 16, 4], strides = [1, 1, 1]} : vector<10x18x4xf32> to vector<8x16x4xf32>
    %12 = vector.shape_cast %11 : vector<8x16x4xf32> to vector<128x4xf32>
    %c0_7 = arith.constant 0 : index
    %c0_8 = arith.constant 0 : index
    %c0_9 = arith.constant 0 : index
    %13 = vector.load %arg3[%c0_7, %c0_8, %c0_9] : memref<9x4x8xf32, #tpu.memory_space<vmem>>, vector<1x4x8xf32>
    %14 = vector.shape_cast %13 : vector<1x4x8xf32> to vector<4x8xf32>
    %cst_10 = arith.constant dense<0.000000e+00> : vector<128x8xf32>
    %15 = tpu.matmul %12, %14, %cst_10 {dimension_numbers = #tpu.dot_dimension_numbers<[1], [0], [0], [1], [0, 0, 1, 1], [], []>} : vector<128x4xf32>, vector<4x8xf32>, vector<128x8xf32> -> vector<128x8xf32>
    %16 = arith.addf %10, %15 : vector<128x8xf32>
    %17 = vector.extract_strided_slice %9 {offsets = [0, 1, 0], sizes = [8, 16, 4], strides = [1, 1, 1]} : vector<10x18x4xf32> to vector<8x16x4xf32>
    %18 = vector.shape_cast %17 : vector<8x16x4xf32> to vector<128x4xf32>
    %c1 = arith.constant 1 : index
    %c0_11 = arith.constant 0 : index
    %c0_12 = arith.constant 0 : index
    %19 = vector.load %arg3[%c1, %c0_11, %c0_12] : memref<9x4x8xf32, #tpu.memory_space<vmem>>, vector<1x4x8xf32>
    %20 = vector.shape_cast %19 : vector<1x4x8xf32> to vector<4x8xf32>
    %cst_13 = arith.constant dense<0.000000e+00> : vector<128x8xf32>
    %21 = tpu.matmul %18, %20, %cst_13 {dimension_numbers = #tpu.dot_dimension_numbers<[1], [0], [0], [1], [0, 0, 1, 1], [], []>} : vector<128x4xf32>, vector<4x8xf32>, vector<128x8xf32> -> vector<128x8xf32>
    %22 = arith.addf %16, %21 : vector<128x8xf32>
    %23 = vector.extract_strided_slice %9 {offsets = [0, 2, 0], sizes = [8, 16, 4], strides = [1, 1, 1]} : vector<10x18x4xf32> to vector<8x16x4xf32>
    %24 = vector.shape_cast %23 : vector<8x16x4xf32> to vector<128x4xf32>
    %c2 = arith.constant 2 : index
    %c0_14 = arith.constant 0 : index
    %c0_15 = arith.constant 0 : index
    %25 = vector.load %arg3[%c2, %c0_14, %c0_15] : memref<9x4x8xf32, #tpu.memory_space<vmem>>, vector<1x4x8xf32>
    %26 = vector.shape_cast %25 : vector<1x4x8xf32> to vector<4x8xf32>
    %cst_16 = arith.constant dense<0.000000e+00> : vector<128x8xf32>
    %27 = tpu.matmul %24, %26, %cst_16 {dimension_numbers = #tpu.dot_dimension_numbers<[1], [0], [0], [1], [0, 0, 1, 1], [], []>} : vector<128x4xf32>, vector<4x8xf32>, vector<128x8xf32> -> vector<128x8xf32>
    %28 = arith.addf %22, %27 : vector<128x8xf32>
    %29 = vector.extract_strided_slice %9 {offsets = [1, 0, 0], sizes = [8, 16, 4], strides = [1, 1, 1]} : vector<10x18x4xf32> to vector<8x16x4xf32>
    %30 = vector.shape_cast %29 : vector<8x16x4xf32> to vector<128x4xf32>
    %c3 = arith.constant 3 : index
    %c0_17 = arith.constant 0 : index
    %c0_18 = arith.constant 0 : index
    %31 = vector.load %arg3[%c3, %c0_17, %c0_18] : memref<9x4x8xf32, #tpu.memory_space<vmem>>, vector<1x4x8xf32>
    %32 = vector.shape_cast %31 : vector<1x4x8xf32> to vector<4x8xf32>
    %cst_19 = arith.constant dense<0.000000e+00> : vector<128x8xf32>
    %33 = tpu.matmul %30, %32, %cst_19 {dimension_numbers = #tpu.dot_dimension_numbers<[1], [0], [0], [1], [0, 0, 1, 1], [], []>} : vector<128x4xf32>, vector<4x8xf32>, vector<128x8xf32> -> vector<128x8xf32>
    %34 = arith.addf %28, %33 : vector<128x8xf32>
    %35 = vector.extract_strided_slice %9 {offsets = [1, 1, 0], sizes = [8, 16, 4], strides = [1, 1, 1]} : vector<10x18x4xf32> to vector<8x16x4xf32>
    %36 = vector.shape_cast %35 : vector<8x16x4xf32> to vector<128x4xf32>
    %c4 = arith.constant 4 : index
    %c0_20 = arith.constant 0 : index
    %c0_21 = arith.constant 0 : index
    %37 = vector.load %arg3[%c4, %c0_20, %c0_21] : memref<9x4x8xf32, #tpu.memory_space<vmem>>, vector<1x4x8xf32>
    %38 = vector.shape_cast %37 : vector<1x4x8xf32> to vector<4x8xf32>
    %cst_22 = arith.constant dense<0.000000e+00> : vector<128x8xf32>
    %39 = tpu.matmul %36, %38, %cst_22 {dimension_numbers = #tpu.dot_dimension_numbers<[1], [0], [0], [1], [0, 0, 1, 1], [], []>} : vector<128x4xf32>, vector<4x8xf32>, vector<128x8xf32> -> vector<128x8xf32>
    %40 = arith.addf %34, %39 : vector<128x8xf32>
    %41 = vector.extract_strided_slice %9 {offsets = [1, 2, 0], sizes = [8, 16, 4], strides = [1, 1, 1]} : vector<10x18x4xf32> to vector<8x16x4xf32>
    %42 = vector.shape_cast %41 : vector<8x16x4xf32> to vector<128x4xf32>
    %c5 = arith.constant 5 : index
    %c0_23 = arith.constant 0 : index
    %c0_24 = arith.constant 0 : index
    %43 = vector.load %arg3[%c5, %c0_23, %c0_24] : memref<9x4x8xf32, #tpu.memory_space<vmem>>, vector<1x4x8xf32>
    %44 = vector.shape_cast %43 : vector<1x4x8xf32> to vector<4x8xf32>
    %cst_25 = arith.constant dense<0.000000e+00> : vector<128x8xf32>
    %45 = tpu.matmul %42, %44, %cst_25 {dimension_numbers = #tpu.dot_dimension_numbers<[1], [0], [0], [1], [0, 0, 1, 1], [], []>} : vector<128x4xf32>, vector<4x8xf32>, vector<128x8xf32> -> vector<128x8xf32>
    %46 = arith.addf %40, %45 : vector<128x8xf32>
    %47 = vector.extract_strided_slice %9 {offsets = [2, 0, 0], sizes = [8, 16, 4], strides = [1, 1, 1]} : vector<10x18x4xf32> to vector<8x16x4xf32>
    %48 = vector.shape_cast %47 : vector<8x16x4xf32> to vector<128x4xf32>
    %c6 = arith.constant 6 : index
    %c0_26 = arith.constant 0 : index
    %c0_27 = arith.constant 0 : index
    %49 = vector.load %arg3[%c6, %c0_26, %c0_27] : memref<9x4x8xf32, #tpu.memory_space<vmem>>, vector<1x4x8xf32>
    %50 = vector.shape_cast %49 : vector<1x4x8xf32> to vector<4x8xf32>
    %cst_28 = arith.constant dense<0.000000e+00> : vector<128x8xf32>
    %51 = tpu.matmul %48, %50, %cst_28 {dimension_numbers = #tpu.dot_dimension_numbers<[1], [0], [0], [1], [0, 0, 1, 1], [], []>} : vector<128x4xf32>, vector<4x8xf32>, vector<128x8xf32> -> vector<128x8xf32>
    %52 = arith.addf %46, %51 : vector<128x8xf32>
    %53 = vector.extract_strided_slice %9 {offsets = [2, 1, 0], sizes = [8, 16, 4], strides = [1, 1, 1]} : vector<10x18x4xf32> to vector<8x16x4xf32>
    %54 = vector.shape_cast %53 : vector<8x16x4xf32> to vector<128x4xf32>
    %c7 = arith.constant 7 : index
    %c0_29 = arith.constant 0 : index
    %c0_30 = arith.constant 0 : index
    %55 = vector.load %arg3[%c7, %c0_29, %c0_30] : memref<9x4x8xf32, #tpu.memory_space<vmem>>, vector<1x4x8xf32>
    %56 = vector.shape_cast %55 : vector<1x4x8xf32> to vector<4x8xf32>
    %cst_31 = arith.constant dense<0.000000e+00> : vector<128x8xf32>
    %57 = tpu.matmul %54, %56, %cst_31 {dimension_numbers = #tpu.dot_dimension_numbers<[1], [0], [0], [1], [0, 0, 1, 1], [], []>} : vector<128x4xf32>, vector<4x8xf32>, vector<128x8xf32> -> vector<128x8xf32>
    %58 = arith.addf %52, %57 : vector<128x8xf32>
    %59 = vector.extract_strided_slice %9 {offsets = [2, 2, 0], sizes = [8, 16, 4], strides = [1, 1, 1]} : vector<10x18x4xf32> to vector<8x16x4xf32>
    %60 = vector.shape_cast %59 : vector<8x16x4xf32> to vector<128x4xf32>
    %c8 = arith.constant 8 : index
    %c0_32 = arith.constant 0 : index
    %c0_33 = arith.constant 0 : index
    %61 = vector.load %arg3[%c8, %c0_32, %c0_33] : memref<9x4x8xf32, #tpu.memory_space<vmem>>, vector<1x4x8xf32>
    %62 = vector.shape_cast %61 : vector<1x4x8xf32> to vector<4x8xf32>
    %cst_34 = arith.constant dense<0.000000e+00> : vector<128x8xf32>
    %63 = tpu.matmul %60, %62, %cst_34 {dimension_numbers = #tpu.dot_dimension_numbers<[1], [0], [0], [1], [0, 0, 1, 1], [], []>} : vector<128x4xf32>, vector<4x8xf32>, vector<128x8xf32> -> vector<128x8xf32>
    %64 = arith.addf %58, %63 : vector<128x8xf32>
    %c0_35 = arith.constant 0 : index
    %c0_36 = arith.constant 0 : index
    %c0_37 = arith.constant 0 : index
    %c0_38 = arith.constant 0 : index
    %65 = vector.load %arg8[%c0_35, %c0_36, %c0_37, %c0_38] : memref<1x1x128x8xf32, #tpu.memory_space<vmem>>, vector<1x1x128x8xf32>
    %66 = vector.shape_cast %65 : vector<1x1x128x8xf32> to vector<128x8xf32>
    %67 = vector.shape_cast %64 : vector<128x8xf32> to vector<1x1x128x8xf32>
    tpu.vector_store %arg8[%c0_35, %c0_36, %c0_37, %c0_38], %67 {strides = array<i32>} : memref<1x1x128x8xf32, #tpu.memory_space<vmem>>, vector<1x1x128x8xf32>,
    %68 = vector.shape_cast %64 : vector<128x8xf32> to vector<16x8x8xf32>
    %c0_39 = arith.constant 0 : index
    %c0_40 = arith.constant 0 : index
    %69 = vector.load %arg11[%c0_39, %c0_40] : memref<8x8xf32, #tpu.memory_space<vmem>>, vector<8x8xf32>
    %cst_41 = arith.constant dense<0.000000e+00> : vector<8x8xf32>
    %70 = vector.multi_reduction <add>, %68, %cst_41 [0] : vector<16x8x8xf32> to vector<8x8xf32>
    %71 = arith.addf %69, %70 : vector<8x8xf32>
    %c0_42 = arith.constant 0 : index
    %c0_43 = arith.constant 0 : index
    %72 = vector.load %arg11[%c0_42, %c0_43] : memref<8x8xf32, #tpu.memory_space<vmem>>, vector<8x8xf32>
    tpu.vector_store %arg11[%c0_42, %c0_43], %71 {strides = array<i32>} : memref<8x8xf32, #tpu.memory_space<vmem>>, vector<8x8xf32>,
    %c0_44 = arith.constant 0 : index
    %c0_45 = arith.constant 0 : index
    %73 = vector.load %arg12[%c0_44, %c0_45] : memref<8x8xf32, #tpu.memory_space<vmem>>, vector<8x8xf32>
    %74 = arith.mulf %68, %68 : vector<16x8x8xf32>
    %cst_46 = arith.constant dense<0.000000e+00> : vector<8x8xf32>
    %75 = vector.multi_reduction <add>, %74, %cst_46 [0] : vector<16x8x8xf32> to vector<8x8xf32>
    %76 = arith.addf %73, %75 : vector<8x8xf32>
    %c0_47 = arith.constant 0 : index
    %c0_48 = arith.constant 0 : index
    %77 = vector.load %arg12[%c0_47, %c0_48] : memref<8x8xf32, #tpu.memory_space<vmem>>, vector<8x8xf32>
    tpu.vector_store %arg12[%c0_47, %c0_48], %76 {strides = array<i32>} : memref<8x8xf32, #tpu.memory_space<vmem>>, vector<8x8xf32>,
    %78 = arith.extui %5 : i1 to i32
    %c0_i32_49 = arith.constant 0 : i32
    %79 = arith.cmpi ne, %78, %c0_i32_49 : i32
    scf.if %79 {
      %c0_50 = arith.constant 0 : index
      %c0_51 = arith.constant 0 : index
      %80 = vector.load %arg11[%c0_50, %c0_51] : memref<8x8xf32, #tpu.memory_space<vmem>>, vector<8x8xf32>
      %cst_52 = arith.constant dense<0.000000e+00> : vector<8xf32>
      %81 = vector.multi_reduction <add>, %80, %cst_52 [0] : vector<8x8xf32> to vector<8xf32>
      %82 = vector.shape_cast %81 : vector<8xf32> to vector<1x8xf32>
      %c0_53 = arith.constant 0 : index
      %c0_54 = arith.constant 0 : index
      %83 = vector.load %arg12[%c0_53, %c0_54] : memref<8x8xf32, #tpu.memory_space<vmem>>, vector<8x8xf32>
      %cst_55 = arith.constant dense<0.000000e+00> : vector<8xf32>
      %84 = vector.multi_reduction <add>, %83, %cst_55 [0] : vector<8x8xf32> to vector<8xf32>
      %85 = vector.shape_cast %84 : vector<8xf32> to vector<1x8xf32>
      %cst_56 = arith.constant 0.001953125 : f32
      %86 = vector.broadcast %cst_56 : f32 to vector<1x8xf32>
      %87 = arith.mulf %82, %86 : vector<1x8xf32>
      %cst_57 = arith.constant 0.001953125 : f32
      %88 = vector.broadcast %cst_57 : f32 to vector<1x8xf32>
      %89 = arith.mulf %85, %88 : vector<1x8xf32>
      %90 = arith.mulf %87, %87 : vector<1x8xf32>
      %91 = arith.subf %89, %90 : vector<1x8xf32>
      %cst_58 = arith.constant 0.000000e+00 : f32
      %92 = vector.broadcast %cst_58 : f32 to vector<1x8xf32>
      %93 = arith.maximumf %91, %92 : vector<1x8xf32>
      %c0_59 = arith.constant 0 : index
      %c0_60 = arith.constant 0 : index
      %94 = vector.load %arg6[%c0_59, %c0_60] : memref<1x8xf32, #tpu.memory_space<vmem>>, vector<1x8xf32>
      %cst_61 = arith.constant 9.99999974E-6 : f32
      %95 = vector.broadcast %cst_61 : f32 to vector<1x8xf32>
      %96 = arith.addf %93, %95 : vector<1x8xf32>
      %97 = math.rsqrt %96 : vector<1x8xf32>
      %98 = arith.mulf %94, %97 : vector<1x8xf32>
      %c0_62 = arith.constant 0 : index
      %c0_63 = arith.constant 0 : index
      %99 = vector.load %arg9[%c0_62, %c0_63] : memref<1x8xf32, #tpu.memory_space<vmem>>, vector<1x8xf32>
      tpu.vector_store %arg9[%c0_62, %c0_63], %98 {strides = array<i32>} : memref<1x8xf32, #tpu.memory_space<vmem>>, vector<1x8xf32>,
      %c0_64 = arith.constant 0 : index
      %c0_65 = arith.constant 0 : index
      %100 = vector.load %arg7[%c0_64, %c0_65] : memref<1x8xf32, #tpu.memory_space<vmem>>, vector<1x8xf32>
      %101 = arith.mulf %87, %98 : vector<1x8xf32>
      %102 = arith.subf %100, %101 : vector<1x8xf32>
      %c0_66 = arith.constant 0 : index
      %c0_67 = arith.constant 0 : index
      %103 = vector.load %arg10[%c0_66, %c0_67] : memref<1x8xf32, #tpu.memory_space<vmem>>, vector<1x8xf32>
      tpu.vector_store %arg10[%c0_66, %c0_67], %102 {strides = array<i32>} : memref<1x8xf32, #tpu.memory_space<vmem>>, vector<1x8xf32>,
    } else {
    }
    return
  }
  func.func @transform_0(%arg0: i32, %arg1: i32) -> (i32, i32, i32, i32, i32) {
    %c0_i32 = arith.constant 0 : i32
    %c0_i32_0 = arith.constant 0 : i32
    %c0_i32_1 = arith.constant 0 : i32
    %c0_i32_2 = arith.constant 0 : i32
    return %arg0, %arg1, %c0_i32, %c0_i32_0, %c0_i32_1 : i32, i32, i32, i32, i32
  }
  func.func @transform_1(%arg0: i32, %arg1: i32) -> (i32, i32, i32) {
    %c0_i32 = arith.constant 0 : i32
    %c0_i32_0 = arith.constant 0 : i32
    %c0_i32_1 = arith.constant 0 : i32
    %c0_i32_2 = arith.constant 0 : i32
    return %c0_i32, %c0_i32_0, %c0_i32_1 : i32, i32, i32
  }
  func.func @transform_2(%arg0: i32, %arg1: i32) -> (i32, i32) {
    %c0_i32 = arith.constant 0 : i32
    %c0_i32_0 = arith.constant 0 : i32
    %c0_i32_1 = arith.constant 0 : i32
    return %c0_i32, %c0_i32_0 : i32, i32
  }
  func.func @transform_3(%arg0: i32, %arg1: i32) -> (i32, i32) {
    %c0_i32 = arith.constant 0 : i32
    %c0_i32_0 = arith.constant 0 : i32
    %c0_i32_1 = arith.constant 0 : i32
    return %c0_i32, %c0_i32_0 : i32, i32
  }
  func.func @transform_4(%arg0: i32, %arg1: i32) -> (i32, i32) {
    %c0_i32 = arith.constant 0 : i32
    %c0_i32_0 = arith.constant 0 : i32
    %c0_i32_1 = arith.constant 0 : i32
    return %c0_i32, %c0_i32_0 : i32, i32
  }
  func.func @transform_5(%arg0: i32, %arg1: i32) -> (i32, i32) {
    %c0_i32 = arith.constant 0 : i32
    %c0_i32_0 = arith.constant 0 : i32
    %c0_i32_1 = arith.constant 0 : i32
    return %c0_i32, %c0_i32_0 : i32, i32
  }
  func.func @transform_6(%arg0: i32, %arg1: i32) -> (i32, i32, i32, i32) {
    %c0_i32 = arith.constant 0 : i32
    %c0_i32_0 = arith.constant 0 : i32
    %c0_i32_1 = arith.constant 0 : i32
    return %arg0, %arg1, %c0_i32, %c0_i32_0 : i32, i32, i32, i32
  }
  func.func @transform_7(%arg0: i32, %arg1: i32) -> (i32, i32) {
    %c0_i32 = arith.constant 0 : i32
    %c0_i32_0 = arith.constant 0 : i32
    %c0_i32_1 = arith.constant 0 : i32
    return %c0_i32, %c0_i32_0 : i32, i32
  }
  func.func @transform_8(%arg0: i32, %arg1: i32) -> (i32, i32) {
    %c0_i32 = arith.constant 0 : i32
    %c0_i32_0 = arith.constant 0 : i32
    %c0_i32_1 = arith.constant 0 : i32
    return %c0_i32, %c0_i32_0 : i32, i32
  }
}

module attributes {stable_mosaic.version = 11 : i64} {
  func.func @_bn_relu_kernel(%arg0: i32, %arg1: i32, %arg2: memref<1x1x128x8xf32, #tpu.memory_space<vmem>>, %arg3: memref<1x8xf32, #tpu.memory_space<vmem>>, %arg4: memref<1x8xf32, #tpu.memory_space<vmem>>, %arg5: memref<1x1x128x8xf32, #tpu.memory_space<vmem>>) attributes {dimension_semantics = [#tpu.dimension_semantics<parallel>, #tpu.dimension_semantics<parallel>], iteration_bounds = array<i64: 2, 2>, scalar_prefetch = 0 : i64, scratch_operands = 0 : i64, tpu.core_type = #tpu.core_type<tc>, window_params = [{transform_indices = @transform_0, window_bounds = array<i64: 1, 1, 128, 8>}, {pipeline_mode = #tpu.pipeline_mode<synchronous>, transform_indices = @transform_1, window_bounds = array<i64: 1, 8>}, {pipeline_mode = #tpu.pipeline_mode<synchronous>, transform_indices = @transform_2, window_bounds = array<i64: 1, 8>}, {transform_indices = @transform_3, window_bounds = array<i64: 1, 1, 128, 8>}]} {
    %c0 = arith.constant 0 : index
    %c0_0 = arith.constant 0 : index
    %c0_1 = arith.constant 0 : index
    %c0_2 = arith.constant 0 : index
    %0 = vector.load %arg2[%c0, %c0_0, %c0_1, %c0_2] : memref<1x1x128x8xf32, #tpu.memory_space<vmem>>, vector<1x1x128x8xf32>
    %1 = vector.shape_cast %0 : vector<1x1x128x8xf32> to vector<128x8xf32>
    %c0_3 = arith.constant 0 : index
    %c0_4 = arith.constant 0 : index
    %2 = vector.load %arg3[%c0_3, %c0_4] : memref<1x8xf32, #tpu.memory_space<vmem>>, vector<1x8xf32>
    %3 = vector.broadcast %2 : vector<1x8xf32> to vector<128x8xf32>
    %4 = arith.mulf %1, %3 : vector<128x8xf32>
    %c0_5 = arith.constant 0 : index
    %c0_6 = arith.constant 0 : index
    %5 = vector.load %arg4[%c0_5, %c0_6] : memref<1x8xf32, #tpu.memory_space<vmem>>, vector<1x8xf32>
    %6 = vector.broadcast %5 : vector<1x8xf32> to vector<128x8xf32>
    %7 = arith.addf %4, %6 : vector<128x8xf32>
    %cst = arith.constant 0.000000e+00 : f32
    %8 = vector.broadcast %cst : f32 to vector<128x8xf32>
    %9 = arith.maximumf %7, %8 : vector<128x8xf32>
    %c0_7 = arith.constant 0 : index
    %c0_8 = arith.constant 0 : index
    %c0_9 = arith.constant 0 : index
    %c0_10 = arith.constant 0 : index
    %10 = vector.load %arg5[%c0_7, %c0_8, %c0_9, %c0_10] : memref<1x1x128x8xf32, #tpu.memory_space<vmem>>, vector<1x1x128x8xf32>
    %11 = vector.shape_cast %10 : vector<1x1x128x8xf32> to vector<128x8xf32>
    %12 = vector.shape_cast %9 : vector<128x8xf32> to vector<1x1x128x8xf32>
    tpu.vector_store %arg5[%c0_7, %c0_8, %c0_9, %c0_10], %12 {strides = array<i32>} : memref<1x1x128x8xf32, #tpu.memory_space<vmem>>, vector<1x1x128x8xf32>,
    return
  }
  func.func @transform_0(%arg0: i32, %arg1: i32) -> (i32, i32, i32, i32) {
    %c0_i32 = arith.constant 0 : i32
    %c0_i32_0 = arith.constant 0 : i32
    %c0_i32_1 = arith.constant 0 : i32
    return %arg0, %arg1, %c0_i32, %c0_i32_0 : i32, i32, i32, i32
  }
  func.func @transform_1(%arg0: i32, %arg1: i32) -> (i32, i32) {
    %c0_i32 = arith.constant 0 : i32
    %c0_i32_0 = arith.constant 0 : i32
    %c0_i32_1 = arith.constant 0 : i32
    return %c0_i32, %c0_i32_0 : i32, i32
  }
  func.func @transform_2(%arg0: i32, %arg1: i32) -> (i32, i32) {
    %c0_i32 = arith.constant 0 : i32
    %c0_i32_0 = arith.constant 0 : i32
    %c0_i32_1 = arith.constant 0 : i32
    return %c0_i32, %c0_i32_0 : i32, i32
  }
  func.func @transform_3(%arg0: i32, %arg1: i32) -> (i32, i32, i32, i32) {
    %c0_i32 = arith.constant 0 : i32
    %c0_i32_0 = arith.constant 0 : i32
    %c0_i32_1 = arith.constant 0 : i32
    return %arg0, %arg1, %c0_i32, %c0_i32_0 : i32, i32, i32, i32
  }
}

module attributes {stable_mosaic.version = 11 : i64} {
  func.func @_conv_stats_kernel(%arg0: i32, %arg1: i32, %arg2: memref<1x1x10x18x8xf32, #tpu.memory_space<vmem>>, %arg3: memref<9x8x8xf32, #tpu.memory_space<vmem>>, %arg4: memref<1x8xf32, #tpu.memory_space<vmem>>, %arg5: memref<1x8xf32, #tpu.memory_space<vmem>>, %arg6: memref<1x8xf32, #tpu.memory_space<vmem>>, %arg7: memref<1x8xf32, #tpu.memory_space<vmem>>, %arg8: memref<1x1x128x8xf32, #tpu.memory_space<vmem>>, %arg9: memref<1x8xf32, #tpu.memory_space<vmem>>, %arg10: memref<1x8xf32, #tpu.memory_space<vmem>>, %arg11: memref<8x8xf32, #tpu.memory_space<vmem>>, %arg12: memref<8x8xf32, #tpu.memory_space<vmem>>) attributes {dimension_semantics = [#tpu.dimension_semantics<arbitrary>, #tpu.dimension_semantics<arbitrary>], iteration_bounds = array<i64: 2, 2>, scalar_prefetch = 0 : i64, scratch_operands = 2 : i64, tpu.core_type = #tpu.core_type<tc>, window_params = [{transform_indices = @transform_0, window_bounds = array<i64: 1, 1, 10, 18, 8>}, {pipeline_mode = #tpu.pipeline_mode<synchronous>, transform_indices = @transform_1, window_bounds = array<i64: 9, 8, 8>}, {pipeline_mode = #tpu.pipeline_mode<synchronous>, transform_indices = @transform_2, window_bounds = array<i64: 1, 8>}, {pipeline_mode = #tpu.pipeline_mode<synchronous>, transform_indices = @transform_3, window_bounds = array<i64: 1, 8>}, {pipeline_mode = #tpu.pipeline_mode<synchronous>, transform_indices = @transform_4, window_bounds = array<i64: 1, 8>}, {pipeline_mode = #tpu.pipeline_mode<synchronous>, transform_indices = @transform_5, window_bounds = array<i64: 1, 8>}, {transform_indices = @transform_6, window_bounds = array<i64: 1, 1, 128, 8>}, {pipeline_mode = #tpu.pipeline_mode<synchronous>, transform_indices = @transform_7, window_bounds = array<i64: 1, 8>}, {pipeline_mode = #tpu.pipeline_mode<synchronous>, transform_indices = @transform_8, window_bounds = array<i64: 1, 8>}]} {
    %c0_i32 = arith.constant 0 : i32
    %0 = arith.cmpi eq, %arg0, %c0_i32 : i32
    %c0_i32_0 = arith.constant 0 : i32
    %1 = arith.cmpi eq, %arg1, %c0_i32_0 : i32
    %2 = arith.andi %0, %1 : i1
    %c1_i32 = arith.constant 1 : i32
    %3 = arith.cmpi eq, %arg0, %c1_i32 : i32
    %c1_i32_1 = arith.constant 1 : i32
    %4 = arith.cmpi eq, %arg1, %c1_i32_1 : i32
    %5 = arith.andi %3, %4 : i1
    %6 = arith.extui %2 : i1 to i32
    %c0_i32_2 = arith.constant 0 : i32
    %7 = arith.cmpi ne, %6, %c0_i32_2 : i32
    scf.if %7 {
      %cst_59 = arith.constant 0.000000e+00 : f32
      %110 = vector.broadcast %cst_59 : f32 to vector<8x8xf32>
      %c0_60 = arith.constant 0 : index
      %c0_61 = arith.constant 0 : index
      %111 = vector.load %arg11[%c0_60, %c0_61] : memref<8x8xf32, #tpu.memory_space<vmem>>, vector<8x8xf32>
      tpu.vector_store %arg11[%c0_60, %c0_61], %110 {strides = array<i32>} : memref<8x8xf32, #tpu.memory_space<vmem>>, vector<8x8xf32>,
      %cst_62 = arith.constant 0.000000e+00 : f32
      %112 = vector.broadcast %cst_62 : f32 to vector<8x8xf32>
      %c0_63 = arith.constant 0 : index
      %c0_64 = arith.constant 0 : index
      %113 = vector.load %arg12[%c0_63, %c0_64] : memref<8x8xf32, #tpu.memory_space<vmem>>, vector<8x8xf32>
      tpu.vector_store %arg12[%c0_63, %c0_64], %112 {strides = array<i32>} : memref<8x8xf32, #tpu.memory_space<vmem>>, vector<8x8xf32>,
    } else {
    }
    %c0 = arith.constant 0 : index
    %c0_3 = arith.constant 0 : index
    %c0_4 = arith.constant 0 : index
    %c0_5 = arith.constant 0 : index
    %c0_6 = arith.constant 0 : index
    %8 = vector.load %arg2[%c0, %c0_3, %c0_4, %c0_5, %c0_6] : memref<1x1x10x18x8xf32, #tpu.memory_space<vmem>>, vector<1x1x10x18x8xf32>
    %9 = vector.shape_cast %8 : vector<1x1x10x18x8xf32> to vector<10x18x8xf32>
    %c0_7 = arith.constant 0 : index
    %c0_8 = arith.constant 0 : index
    %10 = vector.load %arg4[%c0_7, %c0_8] : memref<1x8xf32, #tpu.memory_space<vmem>>, vector<1x8xf32>
    %11 = vector.shape_cast %10 : vector<1x8xf32> to vector<1x1x8xf32>
    %12 = vector.broadcast %11 : vector<1x1x8xf32> to vector<10x18x8xf32>
    %13 = arith.mulf %9, %12 : vector<10x18x8xf32>
    %c0_9 = arith.constant 0 : index
    %c0_10 = arith.constant 0 : index
    %14 = vector.load %arg5[%c0_9, %c0_10] : memref<1x8xf32, #tpu.memory_space<vmem>>, vector<1x8xf32>
    %15 = vector.shape_cast %14 : vector<1x8xf32> to vector<1x1x8xf32>
    %16 = vector.broadcast %15 : vector<1x1x8xf32> to vector<10x18x8xf32>
    %17 = arith.addf %13, %16 : vector<10x18x8xf32>
    %cst = arith.constant 0.000000e+00 : f32
    %18 = vector.broadcast %cst : f32 to vector<10x18x8xf32>
    %19 = arith.maximumf %17, %18 : vector<10x18x8xf32>
    %20 = tpu.iota {dimensions = array<i32: 0>} : vector<10x18x1xi32>
    %21 = tpu.iota {dimensions = array<i32: 1>} : vector<10x18x1xi32>
    %c8_i32 = arith.constant 8 : i32
    %22 = arith.muli %arg1, %c8_i32 : i32
    %23 = vector.broadcast %22 : i32 to vector<10x18x1xi32>
    %24 = arith.addi %23, %20 : vector<10x18x1xi32>
    %c1_i32_11 = arith.constant 1 : i32
    %25 = vector.broadcast %c1_i32_11 : i32 to vector<10x18x1xi32>
    %26 = arith.cmpi sge, %24, %25 : vector<10x18x1xi32>
    %c17_i32 = arith.constant 17 : i32
    %27 = vector.broadcast %c17_i32 : i32 to vector<10x18x1xi32>
    %28 = arith.cmpi slt, %24, %27 : vector<10x18x1xi32>
    %29 = arith.andi %26, %28 : vector<10x18x1xi1>
    %c1_i32_12 = arith.constant 1 : i32
    %30 = vector.broadcast %c1_i32_12 : i32 to vector<10x18x1xi32>
    %31 = arith.cmpi sge, %21, %30 : vector<10x18x1xi32>
    %32 = arith.andi %29, %31 : vector<10x18x1xi1>
    %c17_i32_13 = arith.constant 17 : i32
    %33 = vector.broadcast %c17_i32_13 : i32 to vector<10x18x1xi32>
    %34 = arith.cmpi slt, %21, %33 : vector<10x18x1xi32>
    %35 = arith.andi %32, %34 : vector<10x18x1xi1>
    %cst_14 = arith.constant 0.000000e+00 : f32
    %36 = vector.shape_cast %35 : vector<10x18x1xi1> to vector<10x18x1xi1>
    %37 = vector.broadcast %36 : vector<10x18x1xi1> to vector<10x18x8xi1>
    %38 = vector.broadcast %cst_14 : f32 to vector<10x18x8xf32>
    %39 = arith.select %37, %19, %38 : vector<10x18x8xi1>, vector<10x18x8xf32>
    %cst_15 = arith.constant 0.000000e+00 : f32
    %40 = vector.broadcast %cst_15 : f32 to vector<128x8xf32>
    %41 = vector.extract_strided_slice %39 {offsets = [0, 0, 0], sizes = [8, 16, 8], strides = [1, 1, 1]} : vector<10x18x8xf32> to vector<8x16x8xf32>
    %42 = vector.shape_cast %41 : vector<8x16x8xf32> to vector<128x8xf32>
    %c0_16 = arith.constant 0 : index
    %c0_17 = arith.constant 0 : index
    %c0_18 = arith.constant 0 : index
    %43 = vector.load %arg3[%c0_16, %c0_17, %c0_18] : memref<9x8x8xf32, #tpu.memory_space<vmem>>, vector<1x8x8xf32>
    %44 = vector.shape_cast %43 : vector<1x8x8xf32> to vector<8x8xf32>
    %cst_19 = arith.constant dense<0.000000e+00> : vector<128x8xf32>
    %45 = tpu.matmul %42, %44, %cst_19 {dimension_numbers = #tpu.dot_dimension_numbers<[1], [0], [0], [1], [0, 0, 1, 1], [], []>} : vector<128x8xf32>, vector<8x8xf32>, vector<128x8xf32> -> vector<128x8xf32>
    %46 = arith.addf %40, %45 : vector<128x8xf32>
    %47 = vector.extract_strided_slice %39 {offsets = [0, 1, 0], sizes = [8, 16, 8], strides = [1, 1, 1]} : vector<10x18x8xf32> to vector<8x16x8xf32>
    %48 = vector.shape_cast %47 : vector<8x16x8xf32> to vector<128x8xf32>
    %c1 = arith.constant 1 : index
    %c0_20 = arith.constant 0 : index
    %c0_21 = arith.constant 0 : index
    %49 = vector.load %arg3[%c1, %c0_20, %c0_21] : memref<9x8x8xf32, #tpu.memory_space<vmem>>, vector<1x8x8xf32>
    %50 = vector.shape_cast %49 : vector<1x8x8xf32> to vector<8x8xf32>
    %cst_22 = arith.constant dense<0.000000e+00> : vector<128x8xf32>
    %51 = tpu.matmul %48, %50, %cst_22 {dimension_numbers = #tpu.dot_dimension_numbers<[1], [0], [0], [1], [0, 0, 1, 1], [], []>} : vector<128x8xf32>, vector<8x8xf32>, vector<128x8xf32> -> vector<128x8xf32>
    %52 = arith.addf %46, %51 : vector<128x8xf32>
    %53 = vector.extract_strided_slice %39 {offsets = [0, 2, 0], sizes = [8, 16, 8], strides = [1, 1, 1]} : vector<10x18x8xf32> to vector<8x16x8xf32>
    %54 = vector.shape_cast %53 : vector<8x16x8xf32> to vector<128x8xf32>
    %c2 = arith.constant 2 : index
    %c0_23 = arith.constant 0 : index
    %c0_24 = arith.constant 0 : index
    %55 = vector.load %arg3[%c2, %c0_23, %c0_24] : memref<9x8x8xf32, #tpu.memory_space<vmem>>, vector<1x8x8xf32>
    %56 = vector.shape_cast %55 : vector<1x8x8xf32> to vector<8x8xf32>
    %cst_25 = arith.constant dense<0.000000e+00> : vector<128x8xf32>
    %57 = tpu.matmul %54, %56, %cst_25 {dimension_numbers = #tpu.dot_dimension_numbers<[1], [0], [0], [1], [0, 0, 1, 1], [], []>} : vector<128x8xf32>, vector<8x8xf32>, vector<128x8xf32> -> vector<128x8xf32>
    %58 = arith.addf %52, %57 : vector<128x8xf32>
    %59 = vector.extract_strided_slice %39 {offsets = [1, 0, 0], sizes = [8, 16, 8], strides = [1, 1, 1]} : vector<10x18x8xf32> to vector<8x16x8xf32>
    %60 = vector.shape_cast %59 : vector<8x16x8xf32> to vector<128x8xf32>
    %c3 = arith.constant 3 : index
    %c0_26 = arith.constant 0 : index
    %c0_27 = arith.constant 0 : index
    %61 = vector.load %arg3[%c3, %c0_26, %c0_27] : memref<9x8x8xf32, #tpu.memory_space<vmem>>, vector<1x8x8xf32>
    %62 = vector.shape_cast %61 : vector<1x8x8xf32> to vector<8x8xf32>
    %cst_28 = arith.constant dense<0.000000e+00> : vector<128x8xf32>
    %63 = tpu.matmul %60, %62, %cst_28 {dimension_numbers = #tpu.dot_dimension_numbers<[1], [0], [0], [1], [0, 0, 1, 1], [], []>} : vector<128x8xf32>, vector<8x8xf32>, vector<128x8xf32> -> vector<128x8xf32>
    %64 = arith.addf %58, %63 : vector<128x8xf32>
    %65 = vector.extract_strided_slice %39 {offsets = [1, 1, 0], sizes = [8, 16, 8], strides = [1, 1, 1]} : vector<10x18x8xf32> to vector<8x16x8xf32>
    %66 = vector.shape_cast %65 : vector<8x16x8xf32> to vector<128x8xf32>
    %c4 = arith.constant 4 : index
    %c0_29 = arith.constant 0 : index
    %c0_30 = arith.constant 0 : index
    %67 = vector.load %arg3[%c4, %c0_29, %c0_30] : memref<9x8x8xf32, #tpu.memory_space<vmem>>, vector<1x8x8xf32>
    %68 = vector.shape_cast %67 : vector<1x8x8xf32> to vector<8x8xf32>
    %cst_31 = arith.constant dense<0.000000e+00> : vector<128x8xf32>
    %69 = tpu.matmul %66, %68, %cst_31 {dimension_numbers = #tpu.dot_dimension_numbers<[1], [0], [0], [1], [0, 0, 1, 1], [], []>} : vector<128x8xf32>, vector<8x8xf32>, vector<128x8xf32> -> vector<128x8xf32>
    %70 = arith.addf %64, %69 : vector<128x8xf32>
    %71 = vector.extract_strided_slice %39 {offsets = [1, 2, 0], sizes = [8, 16, 8], strides = [1, 1, 1]} : vector<10x18x8xf32> to vector<8x16x8xf32>
    %72 = vector.shape_cast %71 : vector<8x16x8xf32> to vector<128x8xf32>
    %c5 = arith.constant 5 : index
    %c0_32 = arith.constant 0 : index
    %c0_33 = arith.constant 0 : index
    %73 = vector.load %arg3[%c5, %c0_32, %c0_33] : memref<9x8x8xf32, #tpu.memory_space<vmem>>, vector<1x8x8xf32>
    %74 = vector.shape_cast %73 : vector<1x8x8xf32> to vector<8x8xf32>
    %cst_34 = arith.constant dense<0.000000e+00> : vector<128x8xf32>
    %75 = tpu.matmul %72, %74, %cst_34 {dimension_numbers = #tpu.dot_dimension_numbers<[1], [0], [0], [1], [0, 0, 1, 1], [], []>} : vector<128x8xf32>, vector<8x8xf32>, vector<128x8xf32> -> vector<128x8xf32>
    %76 = arith.addf %70, %75 : vector<128x8xf32>
    %77 = vector.extract_strided_slice %39 {offsets = [2, 0, 0], sizes = [8, 16, 8], strides = [1, 1, 1]} : vector<10x18x8xf32> to vector<8x16x8xf32>
    %78 = vector.shape_cast %77 : vector<8x16x8xf32> to vector<128x8xf32>
    %c6 = arith.constant 6 : index
    %c0_35 = arith.constant 0 : index
    %c0_36 = arith.constant 0 : index
    %79 = vector.load %arg3[%c6, %c0_35, %c0_36] : memref<9x8x8xf32, #tpu.memory_space<vmem>>, vector<1x8x8xf32>
    %80 = vector.shape_cast %79 : vector<1x8x8xf32> to vector<8x8xf32>
    %cst_37 = arith.constant dense<0.000000e+00> : vector<128x8xf32>
    %81 = tpu.matmul %78, %80, %cst_37 {dimension_numbers = #tpu.dot_dimension_numbers<[1], [0], [0], [1], [0, 0, 1, 1], [], []>} : vector<128x8xf32>, vector<8x8xf32>, vector<128x8xf32> -> vector<128x8xf32>
    %82 = arith.addf %76, %81 : vector<128x8xf32>
    %83 = vector.extract_strided_slice %39 {offsets = [2, 1, 0], sizes = [8, 16, 8], strides = [1, 1, 1]} : vector<10x18x8xf32> to vector<8x16x8xf32>
    %84 = vector.shape_cast %83 : vector<8x16x8xf32> to vector<128x8xf32>
    %c7 = arith.constant 7 : index
    %c0_38 = arith.constant 0 : index
    %c0_39 = arith.constant 0 : index
    %85 = vector.load %arg3[%c7, %c0_38, %c0_39] : memref<9x8x8xf32, #tpu.memory_space<vmem>>, vector<1x8x8xf32>
    %86 = vector.shape_cast %85 : vector<1x8x8xf32> to vector<8x8xf32>
    %cst_40 = arith.constant dense<0.000000e+00> : vector<128x8xf32>
    %87 = tpu.matmul %84, %86, %cst_40 {dimension_numbers = #tpu.dot_dimension_numbers<[1], [0], [0], [1], [0, 0, 1, 1], [], []>} : vector<128x8xf32>, vector<8x8xf32>, vector<128x8xf32> -> vector<128x8xf32>
    %88 = arith.addf %82, %87 : vector<128x8xf32>
    %89 = vector.extract_strided_slice %39 {offsets = [2, 2, 0], sizes = [8, 16, 8], strides = [1, 1, 1]} : vector<10x18x8xf32> to vector<8x16x8xf32>
    %90 = vector.shape_cast %89 : vector<8x16x8xf32> to vector<128x8xf32>
    %c8 = arith.constant 8 : index
    %c0_41 = arith.constant 0 : index
    %c0_42 = arith.constant 0 : index
    %91 = vector.load %arg3[%c8, %c0_41, %c0_42] : memref<9x8x8xf32, #tpu.memory_space<vmem>>, vector<1x8x8xf32>
    %92 = vector.shape_cast %91 : vector<1x8x8xf32> to vector<8x8xf32>
    %cst_43 = arith.constant dense<0.000000e+00> : vector<128x8xf32>
    %93 = tpu.matmul %90, %92, %cst_43 {dimension_numbers = #tpu.dot_dimension_numbers<[1], [0], [0], [1], [0, 0, 1, 1], [], []>} : vector<128x8xf32>, vector<8x8xf32>, vector<128x8xf32> -> vector<128x8xf32>
    %94 = arith.addf %88, %93 : vector<128x8xf32>
    %c0_44 = arith.constant 0 : index
    %c0_45 = arith.constant 0 : index
    %c0_46 = arith.constant 0 : index
    %c0_47 = arith.constant 0 : index
    %95 = vector.load %arg8[%c0_44, %c0_45, %c0_46, %c0_47] : memref<1x1x128x8xf32, #tpu.memory_space<vmem>>, vector<1x1x128x8xf32>
    %96 = vector.shape_cast %95 : vector<1x1x128x8xf32> to vector<128x8xf32>
    %97 = vector.shape_cast %94 : vector<128x8xf32> to vector<1x1x128x8xf32>
    tpu.vector_store %arg8[%c0_44, %c0_45, %c0_46, %c0_47], %97 {strides = array<i32>} : memref<1x1x128x8xf32, #tpu.memory_space<vmem>>, vector<1x1x128x8xf32>,
    %98 = vector.shape_cast %94 : vector<128x8xf32> to vector<16x8x8xf32>
    %c0_48 = arith.constant 0 : index
    %c0_49 = arith.constant 0 : index
    %99 = vector.load %arg11[%c0_48, %c0_49] : memref<8x8xf32, #tpu.memory_space<vmem>>, vector<8x8xf32>
    %cst_50 = arith.constant dense<0.000000e+00> : vector<8x8xf32>
    %100 = vector.multi_reduction <add>, %98, %cst_50 [0] : vector<16x8x8xf32> to vector<8x8xf32>
    %101 = arith.addf %99, %100 : vector<8x8xf32>
    %c0_51 = arith.constant 0 : index
    %c0_52 = arith.constant 0 : index
    %102 = vector.load %arg11[%c0_51, %c0_52] : memref<8x8xf32, #tpu.memory_space<vmem>>, vector<8x8xf32>
    tpu.vector_store %arg11[%c0_51, %c0_52], %101 {strides = array<i32>} : memref<8x8xf32, #tpu.memory_space<vmem>>, vector<8x8xf32>,
    %c0_53 = arith.constant 0 : index
    %c0_54 = arith.constant 0 : index
    %103 = vector.load %arg12[%c0_53, %c0_54] : memref<8x8xf32, #tpu.memory_space<vmem>>, vector<8x8xf32>
    %104 = arith.mulf %98, %98 : vector<16x8x8xf32>
    %cst_55 = arith.constant dense<0.000000e+00> : vector<8x8xf32>
    %105 = vector.multi_reduction <add>, %104, %cst_55 [0] : vector<16x8x8xf32> to vector<8x8xf32>
    %106 = arith.addf %103, %105 : vector<8x8xf32>
    %c0_56 = arith.constant 0 : index
    %c0_57 = arith.constant 0 : index
    %107 = vector.load %arg12[%c0_56, %c0_57] : memref<8x8xf32, #tpu.memory_space<vmem>>, vector<8x8xf32>
    tpu.vector_store %arg12[%c0_56, %c0_57], %106 {strides = array<i32>} : memref<8x8xf32, #tpu.memory_space<vmem>>, vector<8x8xf32>,
    %108 = arith.extui %5 : i1 to i32
    %c0_i32_58 = arith.constant 0 : i32
    %109 = arith.cmpi ne, %108, %c0_i32_58 : i32
    scf.if %109 {
      %c0_59 = arith.constant 0 : index
      %c0_60 = arith.constant 0 : index
      %110 = vector.load %arg11[%c0_59, %c0_60] : memref<8x8xf32, #tpu.memory_space<vmem>>, vector<8x8xf32>
      %cst_61 = arith.constant dense<0.000000e+00> : vector<8xf32>
      %111 = vector.multi_reduction <add>, %110, %cst_61 [0] : vector<8x8xf32> to vector<8xf32>
      %112 = vector.shape_cast %111 : vector<8xf32> to vector<1x8xf32>
      %c0_62 = arith.constant 0 : index
      %c0_63 = arith.constant 0 : index
      %113 = vector.load %arg12[%c0_62, %c0_63] : memref<8x8xf32, #tpu.memory_space<vmem>>, vector<8x8xf32>
      %cst_64 = arith.constant dense<0.000000e+00> : vector<8xf32>
      %114 = vector.multi_reduction <add>, %113, %cst_64 [0] : vector<8x8xf32> to vector<8xf32>
      %115 = vector.shape_cast %114 : vector<8xf32> to vector<1x8xf32>
      %cst_65 = arith.constant 0.001953125 : f32
      %116 = vector.broadcast %cst_65 : f32 to vector<1x8xf32>
      %117 = arith.mulf %112, %116 : vector<1x8xf32>
      %cst_66 = arith.constant 0.001953125 : f32
      %118 = vector.broadcast %cst_66 : f32 to vector<1x8xf32>
      %119 = arith.mulf %115, %118 : vector<1x8xf32>
      %120 = arith.mulf %117, %117 : vector<1x8xf32>
      %121 = arith.subf %119, %120 : vector<1x8xf32>
      %cst_67 = arith.constant 0.000000e+00 : f32
      %122 = vector.broadcast %cst_67 : f32 to vector<1x8xf32>
      %123 = arith.maximumf %121, %122 : vector<1x8xf32>
      %c0_68 = arith.constant 0 : index
      %c0_69 = arith.constant 0 : index
      %124 = vector.load %arg6[%c0_68, %c0_69] : memref<1x8xf32, #tpu.memory_space<vmem>>, vector<1x8xf32>
      %cst_70 = arith.constant 9.99999974E-6 : f32
      %125 = vector.broadcast %cst_70 : f32 to vector<1x8xf32>
      %126 = arith.addf %123, %125 : vector<1x8xf32>
      %127 = math.rsqrt %126 : vector<1x8xf32>
      %128 = arith.mulf %124, %127 : vector<1x8xf32>
      %c0_71 = arith.constant 0 : index
      %c0_72 = arith.constant 0 : index
      %129 = vector.load %arg9[%c0_71, %c0_72] : memref<1x8xf32, #tpu.memory_space<vmem>>, vector<1x8xf32>
      tpu.vector_store %arg9[%c0_71, %c0_72], %128 {strides = array<i32>} : memref<1x8xf32, #tpu.memory_space<vmem>>, vector<1x8xf32>,
      %c0_73 = arith.constant 0 : index
      %c0_74 = arith.constant 0 : index
      %130 = vector.load %arg7[%c0_73, %c0_74] : memref<1x8xf32, #tpu.memory_space<vmem>>, vector<1x8xf32>
      %131 = arith.mulf %117, %128 : vector<1x8xf32>
      %132 = arith.subf %130, %131 : vector<1x8xf32>
      %c0_75 = arith.constant 0 : index
      %c0_76 = arith.constant 0 : index
      %133 = vector.load %arg10[%c0_75, %c0_76] : memref<1x8xf32, #tpu.memory_space<vmem>>, vector<1x8xf32>
      tpu.vector_store %arg10[%c0_75, %c0_76], %132 {strides = array<i32>} : memref<1x8xf32, #tpu.memory_space<vmem>>, vector<1x8xf32>,
    } else {
    }
    return
  }
  func.func @transform_0(%arg0: i32, %arg1: i32) -> (i32, i32, i32, i32, i32) {
    %c0_i32 = arith.constant 0 : i32
    %c0_i32_0 = arith.constant 0 : i32
    %c0_i32_1 = arith.constant 0 : i32
    %c0_i32_2 = arith.constant 0 : i32
    return %arg0, %arg1, %c0_i32, %c0_i32_0, %c0_i32_1 : i32, i32, i32, i32, i32
  }
  func.func @transform_1(%arg0: i32, %arg1: i32) -> (i32, i32, i32) {
    %c0_i32 = arith.constant 0 : i32
    %c0_i32_0 = arith.constant 0 : i32
    %c0_i32_1 = arith.constant 0 : i32
    %c0_i32_2 = arith.constant 0 : i32
    return %c0_i32, %c0_i32_0, %c0_i32_1 : i32, i32, i32
  }
  func.func @transform_2(%arg0: i32, %arg1: i32) -> (i32, i32) {
    %c0_i32 = arith.constant 0 : i32
    %c0_i32_0 = arith.constant 0 : i32
    %c0_i32_1 = arith.constant 0 : i32
    return %c0_i32, %c0_i32_0 : i32, i32
  }
  func.func @transform_3(%arg0: i32, %arg1: i32) -> (i32, i32) {
    %c0_i32 = arith.constant 0 : i32
    %c0_i32_0 = arith.constant 0 : i32
    %c0_i32_1 = arith.constant 0 : i32
    return %c0_i32, %c0_i32_0 : i32, i32
  }
  func.func @transform_4(%arg0: i32, %arg1: i32) -> (i32, i32) {
    %c0_i32 = arith.constant 0 : i32
    %c0_i32_0 = arith.constant 0 : i32
    %c0_i32_1 = arith.constant 0 : i32
    return %c0_i32, %c0_i32_0 : i32, i32
  }
  func.func @transform_5(%arg0: i32, %arg1: i32) -> (i32, i32) {
    %c0_i32 = arith.constant 0 : i32
    %c0_i32_0 = arith.constant 0 : i32
    %c0_i32_1 = arith.constant 0 : i32
    return %c0_i32, %c0_i32_0 : i32, i32
  }
  func.func @transform_6(%arg0: i32, %arg1: i32) -> (i32, i32, i32, i32) {
    %c0_i32 = arith.constant 0 : i32
    %c0_i32_0 = arith.constant 0 : i32
    %c0_i32_1 = arith.constant 0 : i32
    return %arg0, %arg1, %c0_i32, %c0_i32_0 : i32, i32, i32, i32
  }
  func.func @transform_7(%arg0: i32, %arg1: i32) -> (i32, i32) {
    %c0_i32 = arith.constant 0 : i32
    %c0_i32_0 = arith.constant 0 : i32
    %c0_i32_1 = arith.constant 0 : i32
    return %c0_i32, %c0_i32_0 : i32, i32
  }
  func.func @transform_8(%arg0: i32, %arg1: i32) -> (i32, i32) {
    %c0_i32 = arith.constant 0 : i32
    %c0_i32_0 = arith.constant 0 : i32
    %c0_i32_1 = arith.constant 0 : i32
    return %c0_i32, %c0_i32_0 : i32, i32
  }
}

</mosaic_0001>

<bundles_post_ra>
// kernel: double_conv_forward.5
= control target key start
LH: loop header
LB: loop body
LE: loop exit
PB: predicated region body
PF: predicated region fallthrough
CT: control target
= control target key end

     0   :  { %s512_s12 = smov 0   ;;  %s514_s13 = smov 0   ;;  %s657_s0 = inlined_call_operand.vmem [shape: f32[2,2,128,8], index: 0, kind: input, shape index: {}]   ;;  %s658_s1 = inlined_call_operand.vmem [shape: f32[1,8], index: 1, kind: input, shape index: {}]   ;;  %s659_s2 = inlined_call_operand.vmem [shape: f32[1,8], index: 2, kind: input, shape index: {}]   ;;  %s660_s3 = inlined_call_operand.vmem [shape: f32[2,2,128,8], index: 3, kind: output, shape index: {}]  }
   0x1   :  { %s516_s14 = smov 0   ;;  %s518_s15 = smov 0  }
   0x2   :  { %s520_s16 = smov 0  }
   0x3 LB: > { %s22_s17 = sadd.s32 1, %s482_s14  ;;  %s25_s18 = sadd.s32 1, %s486_s15  ;;  %s490_s16 = sphi %s520_s16, %s13_s16   ;;  %s486_s15 = sphi %s518_s15, %s664_s15   ;;  %s482_s14 = sphi %s516_s14, %s663_s14   ;;  %s478_s13 = sphi %s514_s13, %s662_s13   ;;  %s474_s12 = sphi %s512_s12, %s661_s12  }
   0x4   : > { %p23_p0 = scmp.ge.s32.totalorder %s22_s17, 2  ;;  %p401_p1 = scmp.ge.s32.totalorder %s490_s16, 1 }
   0x5   : > { %p157_p2 = scmp.lt.s32.totalorder %s490_s16, 5 }
   0x6   : > { %s666_s17 = smov (%p23_p0, %s22_s17), 0  ;;  %s668_s18 = smov (!%p23_p0, %s25_s18), %s486_s15 }
   0x7   : > { %p158_p3 = pnand %p401_p1, %p157_p2  ;;  %p27_p4 = scmp.ge.s32.totalorder %s668_s18, 2 }
   0x8   : > { %p189_p5 = scmp.lt.s32.totalorder (!%p158_p3), %s478_s13, 1  ;;  %p191_p6 = scmp.lt.s32.totalorder (!%p158_p3), %s474_s12, 1 }
   0x9   : > { %s670_s18 = smov (%p27_p4, %s668_s18), 0  ;;  %161 = sbr.rel (%p158_p3) target bundleno = 37 (0x25), region = 32 }
   0xe   : > { %s672_s13 = smov (!%p189_p5, %s478_s13), 1  ;;  %s674_s12 = smov (!%p191_p6, %s474_s12), 1  ;;  %v545_v0 = vld [vmem:[%s658_s1] ss:$0 sm:$0xff]  ;;  %vm285_vm0 = vcmask 64512  }
   0xf   : > { %s403_s19 = sshll.u32 %s672_s13, 5  ;;  %s402_s20 = sshll.u32 %s674_s12, 4  ;;  %v555_v1 = vld [vmem:[%s659_s2] ss:$0 sm:$0xff] }
  0x10   : > { %s195_s21 = sadd.s32 %s403_s19, %s402_s20 }
  0x11   : > { %s404_s22 = sshll.u32 %s195_s21, 3 }
  0x12   : > { %s550_s27 = scalar_lea.vmem %s657_s0, %s404_s22  ;;  %s578_s5 = scalar_lea.vmem %s660_s3, %s404_s22 }
  0x13   : > { %v207_v2 = vld [vmem:[%s550_s27] sm:$0xff]  ;;  %v208_v3 = vld [vmem:[%s550_s27 + $0x8] sm:$0xff]  ;;  %v209_v4 = vld [vmem:[%s550_s27 + $0x10] sm:$0xff] }
  0x14   : > { %v230_v5 = vmul.f32 %v545_v0, %v207_v2  ;;  %v231_v6 = vmul.f32 %v545_v0, %v208_v3  ;;  %v232_v7 = vmul.f32 %v545_v0, %v209_v4  ;;  %v210_v8 = vld [vmem:[%s550_s27 + $0x18] sm:$0xff]  ;;  %v211_v9 = vld [vmem:[%s550_s27 + $0x20] sm:$0xff]  ;;  %v212_v10 = vld [vmem:[%s550_s27 + $0x28] sm:$0xff] }
  0x15   : > { %v233_v11 = vmul.f32 %v545_v0, %v210_v8  ;;  %v234_v12 = vmul.f32 %v545_v0, %v211_v9  ;;  %v235_v13 = vmul.f32 %v545_v0, %v212_v10  ;;  %v213_v14 = vld [vmem:[%s550_s27 + $0x30] sm:$0xff]  ;;  %v214_v15 = vld [vmem:[%s550_s27 + $0x38] sm:$0xff]  ;;  %v215_v24 = vld [vmem:[%s550_s27 + $0x40] sm:$0xff] }
  0x16   : > { %v253_v16 = vadd.f32 %v555_v1, %v230_v5  ;;  %v254_v17 = vadd.f32 %v555_v1, %v231_v6  ;;  %v255_v18 = vadd.f32 %v555_v1, %v232_v7  ;;  %v236_v19 = vmul.f32 %v545_v0, %v213_v14  ;;  %v216_v25 = vld [vmem:[%s550_s27 + $0x48] sm:$0xff]  ;;  %v217_v26 = vld [vmem:[%s550_s27 + $0x50] sm:$0xff]  ;;  %v218_v31 = vld [vmem:[%s550_s27 + $0x58] sm:$0xff] }
  0x17   : > { %v256_v20 = vadd.f32 %v555_v1, %v233_v11  ;;  %v257_v21 = vadd.f32 %v555_v1, %v234_v12  ;;  %v258_v22 = vadd.f32 %v555_v1, %v235_v13  ;;  %v237_v23 = vmul.f32 %v545_v0, %v214_v15  ;;  %v219_v32 = vld [vmem:[%s550_s27 + $0x60] sm:$0xff]  ;;  %v220_v33 = vld [vmem:[%s550_s27 + $0x68] sm:$0xff]  ;;  %v221_v38 = vld [vmem:[%s550_s27 + $0x70] sm:$0xff] }
  0x18   : > { %v269_v27 = vmax.f32 %v253_v16, 0.0  ;;  %v270_v28 = vmax.f32 %v254_v17, 0.0  ;;  %v271_v29 = vmax.f32 %v255_v18, 0.0  ;;  %v259_v30 = vadd.f32 %v555_v1, %v236_v19  ;;  %v222_v43 = vld [vmem:[%s550_s27 + $0x78] sm:$0xff] }
  0x19   : > { %v272_v34 = vmax.f32 %v256_v20, 0.0  ;;  %v273_v35 = vmax.f32 %v257_v21, 0.0  ;;  %v274_v36 = vmax.f32 %v258_v22, 0.0  ;;  %v260_v37 = vadd.f32 %v555_v1, %v237_v23 }
  0x1a   : > { %286 = vst.msk [vmem:[%s578_s5] sm:$0xff] %vm285_vm0, %v269_v27  ;;  %287 = vst.msk [vmem:[%s578_s5 + $0x8] sm:$0xff] %vm285_vm0, %v270_v28  ;;  %v275_v39 = vmax.f32 %v259_v30, 0.0  ;;  %v238_v40 = vmul.f32 %v545_v0, %v215_v24  ;;  %v239_v41 = vmul.f32 %v545_v0, %v216_v25  ;;  %v240_v42 = vmul.f32 %v545_v0, %v217_v26 }
  0x1b   : > { %288 = vst.msk [vmem:[%s578_s5 + $0x10] sm:$0xff] %vm285_vm0, %v271_v29  ;;  %289 = vst.msk [vmem:[%s578_s5 + $0x18] sm:$0xff] %vm285_vm0, %v272_v34  ;;  %v276_v44 = vmax.f32 %v260_v37, 0.0  ;;  %v241_v45 = vmul.f32 %v545_v0, %v218_v31  ;;  %v242_v46 = vmul.f32 %v545_v0, %v219_v32  ;;  %v243_v47 = vmul.f32 %v545_v0, %v220_v33 }
  0x1c   : > { %290 = vst.msk [vmem:[%s578_s5 + $0x20] sm:$0xff] %vm285_vm0, %v273_v35  ;;  %291 = vst.msk [vmem:[%s578_s5 + $0x28] sm:$0xff] %vm285_vm0, %v274_v36  ;;  %v261_v48 = vadd.f32 %v555_v1, %v238_v40  ;;  %v262_v49 = vadd.f32 %v555_v1, %v239_v41  ;;  %v263_v50 = vadd.f32 %v555_v1, %v240_v42 }
  0x1d   : > { %292 = vst.msk [vmem:[%s578_s5 + $0x30] sm:$0xff] %vm285_vm0, %v275_v39  ;;  %v244_v51 = vmul.f32 %v545_v0, %v221_v38  ;;  %293 = vst.msk [vmem:[%s578_s5 + $0x38] sm:$0xff] %vm285_vm0, %v276_v44  ;;  %v264_v52 = vadd.f32 %v555_v1, %v241_v45  ;;  %v265_v53 = vadd.f32 %v555_v1, %v242_v46 }
  0x1e   : > { %v266_v54 = vadd.f32 %v555_v1, %v243_v47  ;;  %v245_v55 = vmul.f32 %v545_v0, %v222_v43  ;;  %v277_v56 = vmax.f32 %v261_v48, 0.0  ;;  %v278_v57 = vmax.f32 %v262_v49, 0.0 }
  0x1f   : > { %v279_v58 = vmax.f32 %v263_v50, 0.0  ;;  %v267_v59 = vadd.f32 %v555_v1, %v244_v51  ;;  %v280_v60 = vmax.f32 %v264_v52, 0.0  ;;  %v281_v61 = vmax.f32 %v265_v53, 0.0 }
  0x20   : > { %v282_v62 = vmax.f32 %v266_v54, 0.0  ;;  %v268_v63 = vadd.f32 %v555_v1, %v245_v55  ;;  %294 = vst.msk [vmem:[%s578_s5 + $0x40] sm:$0xff] %vm285_vm0, %v277_v56  ;;  %295 = vst.msk [vmem:[%s578_s5 + $0x48] sm:$0xff] %vm285_vm0, %v278_v57 }
  0x21   : > { %296 = vst.msk [vmem:[%s578_s5 + $0x50] sm:$0xff] %vm285_vm0, %v279_v58  ;;  %v283_v2 = vmax.f32 %v267_v59, 0.0  ;;  %297 = vst.msk [vmem:[%s578_s5 + $0x58] sm:$0xff] %vm285_vm0, %v280_v60 }
  0x22   : > { %298 = vst.msk [vmem:[%s578_s5 + $0x60] sm:$0xff] %vm285_vm0, %v281_v61  ;;  %299 = vst.msk [vmem:[%s578_s5 + $0x68] sm:$0xff] %vm285_vm0, %v282_v62  ;;  %v284_v0 = vmax.f32 %v268_v63, 0.0 }
  0x23   : > { %300 = vst.msk [vmem:[%s578_s5 + $0x70] sm:$0xff] %vm285_vm0, %v283_v2 }
  0x24   : > { %301 = vst.msk [vmem:[%s578_s5 + $0x78] sm:$0xff] %vm285_vm0, %v284_v0 }
  0x25 PF: > { %s13_s16 = sadd.s32 1, %s490_s16   ;;  %s661_s12 = smov %s482_s14 }
  0x26   : > { %p10_p7 = scmp.ge.s32.totalorder %s13_s16, 6   ;;  %s662_s13 = smov %s486_s15 }
  0x27   : > { %s663_s14 = smov %s666_s17  ;;  %s664_s15 = smov %s670_s18 }
  0x28   :  { %12 = sbr.rel (!%p10_p7) target bundleno = 3 (0x3), region = 62 }

// kernel: double_conv_forward.3
= control target key start
LH: loop header
LB: loop body
LE: loop exit
PB: predicated region body
PF: predicated region fallthrough
CT: control target
= control target key end

     0   :  { %s3028_s27 = smov 0   ;;  %s3030_s2 = smov 0   ;;  %s3921_s0 = inlined_call_operand.vmem [shape: f32[2,2,10,18,4], index: 0, kind: input, shape index: {}]   ;;  %s3922_s1 = inlined_call_operand.vmem [shape: f32[9,4,8], index: 1, kind: input, shape index: {}]   ;;  %s3923_s2 = inlined_call_operand.vmem [shape: f32[1,4], index: 2, kind: input, shape index: {}]   ;;  %s3924_s3 = inlined_call_operand.vmem [shape: f32[1,4], index: 3, kind: input, shape index: {}]   ;;  %s3925_s4 = inlined_call_operand.vmem [shape: f32[1,8], index: 4, kind: input, shape index: {}]   ;;  %s3926_s5 = inlined_call_operand.vmem [shape: f32[1,8], index: 5, kind: input, shape index: {}]   ;;  %s3927_s6 = inlined_call_operand.vmem [shape: f32[2,2,128,8], index: 6, kind: output, shape index: {0}]   ;;  %s3928_s7 = inlined_call_operand.vmem [shape: f32[1,8], index: 7, kind: output, shape index: {1}]   ;;  %s3929_s8 = inlined_call_operand.vmem [shape: f32[1,8], index: 8, kind: output, shape index: {2}]  }
   0x1   :  { %s3032_s3 = smov 0   ;;  %s3034_s28 = smov 0  }
   0x2   :  { %s3036_s29 = smov 0  }
   0x3 LB: > { %s28_s30 = sadd.s32 1, %s2972_s3  ;;  %s31_s9 = sadd.s32 1, %s2976_s28  ;;  %s2980_s29 = sphi %s3036_s29, %s19_s29   ;;  %s2976_s28 = sphi %s3034_s28, %s3970_s28   ;;  %s2972_s3 = sphi %s3032_s3, %s3969_s3   ;;  %s2968_s2 = sphi %s3030_s2, %s3968_s2   ;;  %s2964_s27 = sphi %s3028_s27, %s3967_s27  }
   0x4   : > { %p29_p0 = scmp.ge.s32.totalorder %s28_s30, 2  ;;  %p2340_p1 = scmp.ge.s32.totalorder %s2980_s29, 1 }
   0x5   : > { %p277_p2 = scmp.lt.s32.totalorder %s2980_s29, 5 }
   0x6   : > { %s3972_s30 = smov (%p29_p0, %s28_s30), 0  ;;  %s3974_s9 = smov (!%p29_p0, %s31_s9), %s2976_s28 }
   0x7   : > { %p278_p3 = pnand %p2340_p1, %p277_p2  ;;  %p33_p4 = scmp.ge.s32.totalorder %s3974_s9, 2 }
   0x9   : > { %s3976_s9 = smov (%p33_p4, %s3974_s9), 0  ;;  %281 = sbr.rel (%p278_p3) target bundleno = 436 (0x1b4), region = 44 }
   0xe   : > { %p319_p5 = scmp.lt.s32.totalorder %s2968_s2, 1  ;;  %p321_p6 = scmp.lt.s32.totalorder %s2964_s27, 1 }
   0xf   : > { %p337_p7 = scmp.eq.s32.totalorder %s2968_s2, 0  ;;  %p338_p8 = scmp.eq.s32.totalorder %s2964_s27, 0 }
  0x10   : > { %s320_s10 = scalar_select %p319_p5, %s2968_s2, 1 }
  0x11   : > { %s322_s11 = scalar_select %p321_p6, %s2964_s27, 1 }
  0x12   : > { %s2898_s12 = smul.u32 60, %s320_s10  ;;  %s2343_s13 = sshll.u32 %s320_s10, 5 }
  0x13   : > { %s2897_s14 = smul.u32 30, %s322_s11  ;;  %s2342_s15 = sshll.u32 %s322_s11, 4 }
  0x14   : > { %s334_s16 = sadd.s32 %s2343_s13, %s2342_s15  ;;  %p339_p9 = pnand %p338_p8, %p337_p7 }
  0x15   : > { %s325_s17 = sadd.s32 %s2898_s12, %s2897_s14  ;;  %s2344_s18 = sshll.u32 %s334_s16, 3 }
  0x16   : > { %s2341_s19 = sshll.u32 %s325_s17, 3  ;;  %s3071_s22 = scalar_lea.vmem %s3927_s6, %s2344_s18 }
  0x17   : > { %s3076_s25 = scalar_lea.vmem %s3921_s0, %s2341_s19  ;;  %p341_p10 = scmp.eq.s32.totalorder %s2968_s2, 1 }
  0x18   : > { %p342_p11 = scmp.eq.s32.totalorder %s2964_s27, 1  ;;  %346 = sbr.rel (%p339_p9) target bundleno = 31 (0x1f), region = 48 }
  0x1a   : > { %p3080_p12 = pnand %p342_p11, %p341_p10 }
  0x1d   : > { %vm347_vm0 = vcmask 64512   ;;  %v2982_v0 = vmov 0.0  }
  0x1e   : > { %348 = vst.msk [vmem:[#allocation2] sm:$0xff] %vm347_vm0, %v2982_v0  ;;  %349 = vst.msk [vmem:[#allocation3] sm:$0xff] %vm347_vm0, %v2982_v0 }
  0x1f PF: > { %v2345_v1 = vld [vmem:[%s3922_s1 + $0x4] sm:$0xf]  ;;  %vm481_vm1 = vcmask 1043456   ;;  %v3091_v3 = vld [vmem:[%s3076_s25 + $0x8] sm:$0xff]  ;;  %vm405_vm2 = vcmask 1046528   ;;  %vm448_vm3 = vcmask 31744  }
  0x20   : > { %v3088_v2 = vld [vmem:[%s3076_s25] sm:$0xff]  ;;  %2895 = vmatprep.subr.msk.mxu1 %vm481_vm1, %v2345_v1  ;;  %2661 = vmatprep.subr.msk.mxu0 %vm481_vm1, %v2345_v1  ;;  %v407_v5 = vrot.slane %v3091_v3, 1  ;;  %v3101_v7 = vld [vmem:[%s3076_s25 + $0x68] sm:$0xff]  ;;  %v3104_v8 = vld [vmem:[%s3076_s25 + $0x18] sm:$0xff]  ;;  %vm810_vm4 = vcmask 1045504   ;;  %vm2095_vm5 = vcmask 64512  }
  0x21   : > { %v406_v4 = vrot.slane %v3088_v2, 1  ;;  %v3098_v6 = vld [vmem:[%s3076_s25 + $0x60] sm:$0xff]  ;;  %2896 = vmatpush3.msk.msra.mxu1 %vm481_vm1, %v2345_v1  ;;  %2662 = vmatpush3.msk.msra.mxu0 %vm481_vm1, %v2345_v1  ;;  %v427_v10 = vrot.slane %v3101_v7, 1  ;;  %v3114_v12 = vld [vmem:[%s3076_s25 + $0x10] sm:$0x3]  ;;  %v411_v20 = vrot.slane %v3104_v8, 1 }
  0x22   : > { %v426_v9 = vrot.slane %v3098_v6, 1  ;;  %v380_v11 = vld [vmem:[%s3922_s1] sm:$0xf]  ;;  %v409_v14 = vrot.slane %v3114_v12, 1  ;;  %v3120_v15 = vld [vmem:[%s3076_s25 + $0x70] sm:$0x3] }
  0x23   : > { %v408_v13 = vsel %vm405_vm2, %v406_v4, %v407_v5  ;;  %2687 = vmatprep.subr.msk.mxu1 %vm481_vm1, %v380_v11  ;;  %v2380_v16 = vld [vmem:[%s3922_s1 + $0x8] sm:$0xf]  ;;  %v429_v18 = vrot.slane %v3120_v15, 1  ;;  %v3132_v19 = vld [vmem:[%s3076_s25 + $0x20] sm:$0xff]  ;;  %v3136_v21 = vld [vmem:[%s3076_s25 + $0x78] sm:$0xff] }
  0x24   : > { %2663 = vmatprep.mubr.msk.f32.mxu0 %vm448_vm3, %v408_v13  ;;  %v3127_v17 = vsel %vm405_vm2, %v426_v9, %v427_v10  ;;  %2713 = vmatprep.subr.msk.mxu0 %vm481_vm1, %v2380_v16  ;;  %v3139_v22 = vld [vmem:[%s3076_s25 + $0x80] sm:$0xff]  ;;  %v410_v23 = vsel %vm405_vm2, %v407_v5, %v409_v14  ;;  %v412_v24 = vrot.slane %v3132_v19, 1  ;;  %v431_v25 = vrot.slane %v3136_v21, 1  ;;  %v3148_v27 = vld [vmem:[%s3076_s25 + $0x28] sm:$0x3]  ;;  %v3151_v28 = vld [vmem:[%s3076_s25 + $0x30] sm:$0xff] }
  0x25   : > { %2675 = vmatprep.mubr.msk.f32.mxu1 %vm448_vm3, %v3127_v17  ;;  %v432_v26 = vrot.slane %v3139_v22, 1  ;;  %2664 = vmatmul.mubr.msk.f32.vlgmr.msra.gmra.mxu0 %vm448_vm3, %v410_v23  ;;  %v3155_v29 = vsel %vm405_vm2, %v427_v10, %v429_v18  ;;  %v414_v30 = vrot.slane %v3148_v27, 1  ;;  %v3159_v31 = vld [vmem:[%s3076_s25 + $0x88] sm:$0x3]  ;;  %v3162_v32 = vld [vmem:[%s3076_s25 + $0x38] sm:$0xff]  ;;  %v416_v33 = vrot.slane %v3151_v28, 1 }
  0x26   : > { %v3166_v34 = vld [vmem:[%s3076_s25 + $0x90] sm:$0xff]  ;;  %2676 = vmatmul.mubr.msk.f32.vlgmr.msra.gmra.mxu1 %vm448_vm3, %v3155_v29  ;;  %2714 = vmatpush3.msk.msra.mxu0 %vm481_vm1, %v2380_v16  ;;  %v3172_v35 = vsel %vm405_vm2, %v411_v20, %v412_v24  ;;  %v434_v37 = vrot.slane %v3159_v31, 1  ;;  %v417_v38 = vrot.slane %v3162_v32, 1  ;;  %v3180_v39 = vld [vmem:[%s3076_s25 + $0x98] sm:$0xff]  ;;  %v3183_v40 = vld [vmem:[%s3076_s25 + $0x40] sm:$0x3] }
  0x27   : > { %v3175_v36 = vsel %vm405_vm2, %v431_v25, %v432_v26  ;;  %v3186_v41 = vld [vmem:[%s3076_s25 + $0x48] sm:$0xff]  ;;  %2688 = vmatpush3.msk.msra.mxu1 %vm481_vm1, %v380_v11  ;;  %2666 = vmatprep.mubr.msk.f32.mxu0 %vm448_vm3, %v3172_v35  ;;  %v3192_v42 = vsel %vm405_vm2, %v412_v24, %v414_v30  ;;  %v436_v43 = vrot.slane %v3166_v34, 1  ;;  %v437_v44 = vrot.slane %v3180_v39, 1  ;;  %v3198_v46 = vld [vmem:[%s3076_s25 + $0xa0] sm:$0x3]  ;;  %v3201_v47 = vld [vmem:[%s3076_s25 + $0x50] sm:$0xff] }
  0x28   : > { %v419_v45 = vrot.slane %v3183_v40, 1  ;;  %2678 = vmatprep.mubr.msk.f32.mxu1 %vm448_vm3, %v3175_v36  ;;  %v3206_v48 = vsel %vm405_vm2, %v432_v26, %v434_v37  ;;  %v3209_v49 = vsel %vm405_vm2, %v416_v33, %v417_v38  ;;  %v439_v50 = vrot.slane %v3198_v46, 1  ;;  %v3214_v52 = vld [vmem:[%s3076_s25 + $0xa8] sm:$0xff]  ;;  %v3217_v53 = vld [vmem:[%s3076_s25 + $0xb0] sm:$0xff]  ;;  %v3220_v54 = vld [vmem:[%s3076_s25 + $0x58] sm:$0x3] }
  0x29   : > { %v421_v51 = vrot.slane %v3186_v41, 1  ;;  %2667 = vmatmul.mubr.msk.f32.gmra.mxu0 %vm448_vm3, %v3192_v42  ;;  %v3225_v55 = vsel %vm405_vm2, %v436_v43, %v437_v44  ;;  %v422_v56 = vrot.slane %v3201_v47, 1  ;;  %v441_v57 = vrot.slane %v3214_v52, 1  ;;  %v3230_v58 = vld [vmem:[%s3076_s25 + $0xb8] sm:$0x3] }
  0x2a   : > { %v2398_v59 = vld [vmem:[%s3922_s1 + $0xc] sm:$0xf]  ;;  %2679 = vmatmul.mubr.msk.f32.gmra.mxu1 %vm448_vm3, %v3206_v48  ;;  %2669 = vmatprep.mubr.msk.f32.mxu0 %vm448_vm3, %v3209_v49  ;;  %v3240_v60 = vsel %vm405_vm2, %v417_v38, %v419_v45  ;;  %v3243_v61 = vsel %vm405_vm2, %v437_v44, %v439_v50  ;;  %v442_v62 = vrot.slane %v3217_v53, 1  ;;  %v424_v63 = vrot.slane %v3220_v54, 1  ;;  %v2416_v0 = vld [vmem:[%s3922_s1 + $0x10] sm:$0xf] }
  0x2b   : > { %2681 = vmatprep.mubr.msk.f32.mxu1 %vm448_vm3, %v3225_v55  ;;  %v3253_v1 = vsel %vm405_vm2, %v421_v51, %v422_v56  ;;  %v444_v4 = vrot.slane %v3230_v58, 1  ;;  %v811_v5 = vrot.slane %v3088_v2, 2  ;;  %v812_v9 = vrot.slane %v3091_v3, 2  ;;  %2739 = vmatprep.subr.msk.mxu1 %vm481_vm1, %v2398_v59  ;;  %v3299_v30 = vld [vmem:[%s3922_s1 + $0x14] sm:$0xf] }
  0x2c   : > { %v3260_v10 = vsel %vm405_vm2, %v441_v57, %v442_v62  ;;  %2765 = vmatprep.subr.msk.mxu0 %vm481_vm1, %v2416_v0  ;;  %v814_v11 = vrot.slane %v3114_v12, 2  ;;  %v3271_v13 = vsel %vm405_vm2, %v422_v56, %v424_v63  ;;  %v816_v12 = vrot.slane %v3104_v8, 2  ;;  %v3311_v33 = vld [vmem:[%s3922_s1 + $0x18] sm:$0xf] }
  0x2d   : > { %2670 = vmatmul.mubr.msk.f32.gmra.mxu0 %vm448_vm3, %v3240_v60  ;;  %v3276_v14 = vsel %vm405_vm2, %v442_v62, %v444_v4  ;;  %v813_v16 = vsel %vm810_vm4, %v811_v5, %v812_v9  ;;  %v817_v18 = vrot.slane %v3132_v19, 2  ;;  %v819_v23 = vrot.slane %v3148_v27, 2 }
  0x2e   : > { %2682 = vmatmul.mubr.msk.f32.gmra.mxu1 %vm448_vm3, %v3243_v61  ;;  %2672 = vmatprep.mubr.msk.f32.mxu0 %vm448_vm3, %v3253_v1  ;;  %v815_v20 = vsel %vm810_vm4, %v812_v9, %v814_v11  ;;  %v821_v24 = vrot.slane %v3151_v28, 2  ;;  %v822_v25 = vrot.slane %v3162_v32, 2  ;;  %v824_v27 = vrot.slane %v3183_v40, 2 }
  0x2f   : > { %2684 = vmatprep.mubr.msk.f32.mxu1 %vm448_vm3, %v3260_v10  ;;  %v3294_v26 = vsel %vm810_vm4, %v816_v12, %v817_v18  ;;  %v827_v38 = vrot.slane %v3201_v47, 2  ;;  %v829_v43 = vrot.slane %v3220_v54, 2  ;;  %v831_v45 = vrot.slane %v3098_v6, 2 }
  0x30   : > { %v3317_v37 = vsel %vm810_vm4, %v821_v24, %v822_v25  ;;  %v3334_v40 = vsel %vm810_vm4, %v822_v25, %v824_v27  ;;  %v832_v50 = vrot.slane %v3101_v7, 2  ;;  %v834_v54 = vrot.slane %v3120_v15, 2  ;;  %v376_v24 = vld [vmem:[%s3076_s25 + $0xd0] sm:$0x3] }
  0x31   : > { %2673 = vmatmul.mubr.msk.f32.gmra.mxu0 %vm448_vm3, %v3271_v13  ;;  %v3351_v51 = vsel %vm810_vm4, %v827_v38, %v829_v43  ;;  %v836_v57 = vrot.slane %v3136_v21, 2  ;;  %v839_v62 = vrot.slane %v3159_v31, 2  ;;  %v842_v4 = vrot.slane %v3180_v39, 2 }
  0x32   : > { %2685 = vmatmul.mubr.msk.f32.gmra.mxu1 %vm448_vm3, %v3276_v14  ;;  %2715 = vmatprep.mubr.msk.f32.mxu0 %vm448_vm3, %v813_v16  ;;  %v3357_v56 = vsel %vm810_vm4, %v831_v45, %v832_v50  ;;  %v3368_v15 = vsel %vm810_vm4, %v832_v50, %v834_v54  ;;  %v844_v5 = vrot.slane %v3198_v46, 2  ;;  %v846_v11 = vrot.slane %v3214_v52, 2 }
  0x33   : > { %2689 = vmatprep.mubr.msk.f32.mxu1 %vm448_vm3, %v3088_v2  ;;  %v3305_v2 = vsel %vm810_vm4, %v817_v18, %v819_v23  ;;  %v847_v16 = vrot.slane %v3217_v53, 2  ;;  %v849_v12 = vrot.slane %v3230_v58, 2  ;;  %v2470_v58 = vld [vmem:[%s3922_s1 + $0x1c] sm:$0xf]  ;;  %v1225_v25 = vrot.slane %v376_v24, 1 }
  0x34   : > { %v3402_v46 = vsel %vm810_vm4, %v842_v4, %v844_v5 }
  0x35   : > { %2716 = vmatmul.mubr.msk.f32.vlgmr.msra.gmra.mxu0 %vm448_vm3, %v815_v20  ;;  %v3408_v18 = vsel %vm810_vm4, %v846_v11, %v847_v16  ;;  %v3417_v20 = vsel %vm810_vm4, %v847_v16, %v849_v12 }
  0x36   : > { %2690 = vmatmul.mubr.msk.f32.vlgmr.msra.gmra.mxu1 %vm448_vm3, %v3091_v3  ;;  %2766 = vmatpush3.msk.msra.mxu0 %vm481_vm1, %v2416_v0  ;;  %v826_v3 = vrot.slane %v3186_v41, 2  ;;  %v841_v0 = vrot.slane %v3166_v34, 2 }
  0x37   : > { %2740 = vmatpush3.msk.msra.mxu1 %vm481_vm1, %v2398_v59  ;;  %2692 = vmatprep.mubr.msk.f32.mxu1 %vm448_vm3, %v3104_v8  ;;  %v837_v59 = vrot.slane %v3139_v22, 2 }
  0x38   : > { %2718 = vmatprep.mubr.msk.f32.mxu0 %vm448_vm3, %v3294_v26  ;;  %2791 = vmatprep.subr.msk.mxu1 %vm481_vm1, %v3299_v30  ;;  %v3340_v44 = vsel %vm810_vm4, %v826_v3, %v827_v38  ;;  %v3391_v9 = vsel %vm810_vm4, %v841_v0, %v842_v4 }
  0x39   : > { %2719 = vmatmul.mubr.msk.f32.gmra.mxu0 %vm448_vm3, %v3305_v2  ;;  %2817 = vmatprep.subr.msk.mxu0 %vm481_vm1, %v3311_v33  ;;  %v3374_v63 = vsel %vm810_vm4, %v836_v57, %v837_v59  ;;  %v3385_v31 = vsel %vm810_vm4, %v837_v59, %v839_v62 }
  0x3a   : > { %2693 = vmatmul.mubr.msk.f32.gmra.mxu1 %vm448_vm3, %v3132_v19  ;;  %2721 = vmatprep.mubr.msk.f32.mxu0 %vm448_vm3, %v3317_v37 }
  0x3b   : > { %2695 = vmatprep.mubr.msk.f32.mxu1 %vm448_vm3, %v3151_v28 }
  0x3d   : > { %2722 = vmatmul.mubr.msk.f32.gmra.mxu0 %vm448_vm3, %v3334_v40 }
  0x3e   : > { %2696 = vmatmul.mubr.msk.f32.gmra.mxu1 %vm448_vm3, %v3162_v32  ;;  %2724 = vmatprep.mubr.msk.f32.mxu0 %vm448_vm3, %v3340_v44 }
  0x3f   : > { %2698 = vmatprep.mubr.msk.f32.mxu1 %vm448_vm3, %v3186_v41 }
  0x41   : > { %2725 = vmatmul.mubr.msk.f32.gmra.mxu0 %vm448_vm3, %v3351_v51 }
  0x42   : > { %2699 = vmatmul.mubr.msk.f32.gmra.mxu1 %vm448_vm3, %v3201_v47  ;;  %2727 = vmatprep.mubr.msk.f32.mxu0 %vm448_vm3, %v3357_v56 }
  0x43   : > { %2701 = vmatprep.mubr.msk.f32.mxu1 %vm448_vm3, %v3098_v6 }
  0x45   : > { %2728 = vmatmul.mubr.msk.f32.gmra.mxu0 %vm448_vm3, %v3368_v15 }
  0x46   : > { %2702 = vmatmul.mubr.msk.f32.gmra.mxu1 %vm448_vm3, %v3101_v7  ;;  %2730 = vmatprep.mubr.msk.f32.mxu0 %vm448_vm3, %v3374_v63 }
  0x47   : > { %2704 = vmatprep.mubr.msk.f32.mxu1 %vm448_vm3, %v3136_v21 }
  0x49   : > { %2731 = vmatmul.mubr.msk.f32.gmra.mxu0 %vm448_vm3, %v3385_v31 }
  0x4a   : > { %2705 = vmatmul.mubr.msk.f32.gmra.mxu1 %vm448_vm3, %v3139_v22  ;;  %2733 = vmatprep.mubr.msk.f32.mxu0 %vm448_vm3, %v3391_v9 }
  0x4b   : > { %2707 = vmatprep.mubr.msk.f32.mxu1 %vm448_vm3, %v3166_v34 }
  0x4d   : > { %2734 = vmatmul.mubr.msk.f32.gmra.mxu0 %vm448_vm3, %v3402_v46 }
  0x4e   : > { %2708 = vmatmul.mubr.msk.f32.gmra.mxu1 %vm448_vm3, %v3180_v39  ;;  %2736 = vmatprep.mubr.msk.f32.mxu0 %vm448_vm3, %v3408_v18 }
  0x4f   : > { %2710 = vmatprep.mubr.msk.f32.mxu1 %vm448_vm3, %v3214_v52 }
  0x51   : > { %2737 = vmatmul.mubr.msk.f32.gmra.mxu0 %vm448_vm3, %v3417_v20 }
  0x52   : > { %2711 = vmatmul.mubr.msk.f32.gmra.mxu1 %vm448_vm3, %v3217_v53  ;;  %2767 = vmatprep.mubr.msk.f32.mxu0 %vm448_vm3, %v3172_v35  ;;  %v2488_v35 = vld [vmem:[%s3922_s1 + $0x20] sm:$0xf] }
  0x53   : > { %2741 = vmatprep.mubr.msk.f32.mxu1 %vm448_vm3, %v3104_v8  ;;  %v374_v8 = vld [vmem:[%s3076_s25 + $0xc0] sm:$0xff] }
  0x55   : > { %2768 = vmatmul.mubr.msk.f32.vlgmr.msra.gmra.mxu0 %vm448_vm3, %v3192_v42  ;;  %v1222_v42 = vrot.slane %v374_v8, 1 }
  0x56   : > { %2742 = vmatmul.mubr.msk.f32.vlgmr.msra.gmra.mxu1 %vm448_vm3, %v3132_v19  ;;  %2818 = vmatpush3.msk.msra.mxu0 %vm481_vm1, %v3311_v33  ;;  %v375_v19 = vld [vmem:[%s3076_s25 + $0xc8] sm:$0xff] }
  0x57   : > { %2792 = vmatpush3.msk.msra.mxu1 %vm481_vm1, %v3299_v30  ;;  %2744 = vmatprep.mubr.msk.f32.mxu1 %vm448_vm3, %v3151_v28  ;;  %v1223_v23 = vrot.slane %v375_v19, 1 }
  0x58   : > { %2770 = vmatprep.mubr.msk.f32.mxu0 %vm448_vm3, %v3209_v49  ;;  %2843 = vmatprep.subr.msk.mxu1 %vm481_vm1, %v2470_v58 }
  0x59   : > { %2771 = vmatmul.mubr.msk.f32.gmra.mxu0 %vm448_vm3, %v3240_v60  ;;  %2869 = vmatprep.subr.msk.mxu0 %vm481_vm1, %v2488_v35  ;;  %v3493_v30 = vsel %vm405_vm2, %v1222_v42, %v1223_v23  ;;  %v3502_v27 = vsel %vm405_vm2, %v1223_v23, %v1225_v25 }
  0x5a   : > { %2745 = vmatmul.mubr.msk.f32.gmra.mxu1 %vm448_vm3, %v3162_v32  ;;  %2773 = vmatprep.mubr.msk.f32.mxu0 %vm448_vm3, %v3253_v1 }
  0x5b   : > { %2747 = vmatprep.mubr.msk.f32.mxu1 %vm448_vm3, %v3186_v41 }
  0x5d   : > { %2774 = vmatmul.mubr.msk.f32.gmra.mxu0 %vm448_vm3, %v3271_v13 }
  0x5e   : > { %2748 = vmatmul.mubr.msk.f32.gmra.mxu1 %vm448_vm3, %v3201_v47  ;;  %2776 = vmatprep.mubr.msk.f32.mxu0 %vm448_vm3, %v3127_v17 }
  0x5f   : > { %2750 = vmatprep.mubr.msk.f32.mxu1 %vm448_vm3, %v3098_v6 }
  0x61   : > { %2777 = vmatmul.mubr.msk.f32.gmra.mxu0 %vm448_vm3, %v3155_v29 }
  0x62   : > { %2751 = vmatmul.mubr.msk.f32.gmra.mxu1 %vm448_vm3, %v3101_v7  ;;  %2779 = vmatprep.mubr.msk.f32.mxu0 %vm448_vm3, %v3175_v36 }
  0x63   : > { %2753 = vmatprep.mubr.msk.f32.mxu1 %vm448_vm3, %v3136_v21 }
  0x65   : > { %2780 = vmatmul.mubr.msk.f32.gmra.mxu0 %vm448_vm3, %v3206_v48 }
  0x66   : > { %2754 = vmatmul.mubr.msk.f32.gmra.mxu1 %vm448_vm3, %v3139_v22  ;;  %2782 = vmatprep.mubr.msk.f32.mxu0 %vm448_vm3, %v3225_v55 }
  0x67   : > { %2756 = vmatprep.mubr.msk.f32.mxu1 %vm448_vm3, %v3166_v34 }
  0x69   : > { %2783 = vmatmul.mubr.msk.f32.gmra.mxu0 %vm448_vm3, %v3243_v61 }
  0x6a   : > { %2757 = vmatmul.mubr.msk.f32.gmra.mxu1 %vm448_vm3, %v3180_v39  ;;  %2785 = vmatprep.mubr.msk.f32.mxu0 %vm448_vm3, %v3260_v10 }
  0x6b   : > { %2759 = vmatprep.mubr.msk.f32.mxu1 %vm448_vm3, %v3214_v52 }
  0x6d   : > { %2786 = vmatmul.mubr.msk.f32.gmra.mxu0 %vm448_vm3, %v3276_v14 }
  0x6e   : > { %2760 = vmatmul.mubr.msk.f32.gmra.mxu1 %vm448_vm3, %v3217_v53  ;;  %2788 = vmatprep.mubr.msk.f32.mxu0 %vm448_vm3, %v3493_v30 }
  0x6f   : > { %2762 = vmatprep.mubr.msk.f32.mxu1 %vm448_vm3, %v374_v8 }
  0x71   : > { %2789 = vmatmul.mubr.msk.f32.gmra.mxu0 %vm448_vm3, %v3502_v27 }
  0x72   : > { %2763 = vmatmul.mubr.msk.f32.gmra.mxu1 %vm448_vm3, %v375_v19  ;;  %2819 = vmatprep.mubr.msk.f32.mxu0 %vm448_vm3, %v3151_v28 }
  0x73   : > { %2793 = vmatprep.mubr.msk.f32.mxu1 %vm448_vm3, %v3294_v26 }
  0x75   : > { %2820 = vmatmul.mubr.msk.f32.vlgmr.msra.gmra.mxu0 %vm448_vm3, %v3162_v32  ;;  %v378_v32 = vld [vmem:[%s3076_s25 + $0xe0] sm:$0xff] }
  0x76   : > { %2794 = vmatmul.mubr.msk.f32.vlgmr.msra.gmra.mxu1 %vm448_vm3, %v3305_v2  ;;  %2870 = vmatpush3.msk.msra.mxu0 %vm481_vm1, %v2488_v35 }
  0x77   : > { %2844 = vmatpush3.msk.msra.mxu1 %vm481_vm1, %v2470_v58  ;;  %2796 = vmatprep.mubr.msk.f32.mxu1 %vm448_vm3, %v3317_v37 }
  0x78   : > { %2822 = vmatprep.mubr.msk.f32.mxu0 %vm448_vm3, %v3186_v41  ;;  %v1746_v41 = vrot.slane %v378_v32, 1 }
  0x79   : > { %2823 = vmatmul.mubr.msk.f32.gmra.mxu0 %vm448_vm3, %v3201_v47 }
  0x7a   : > { %2797 = vmatmul.mubr.msk.f32.gmra.mxu1 %vm448_vm3, %v3334_v40  ;;  %2825 = vmatprep.mubr.msk.f32.mxu0 %vm448_vm3, %v3098_v6  ;;  %v1397_v6 = vrot.slane %v374_v8, 2 }
  0x7b   : > { %2799 = vmatprep.mubr.msk.f32.mxu1 %vm448_vm3, %v3340_v44 }
  0x7d   : > { %2826 = vmatmul.mubr.msk.f32.gmra.mxu0 %vm448_vm3, %v3101_v7  ;;  %v1398_v7 = vrot.slane %v375_v19, 2 }
  0x7e   : > { %2800 = vmatmul.mubr.msk.f32.gmra.mxu1 %vm448_vm3, %v3351_v51  ;;  %2828 = vmatprep.mubr.msk.f32.mxu0 %vm448_vm3, %v3136_v21  ;;  %v377_v21 = vld [vmem:[%s3076_s25 + $0xd8] sm:$0xff] }
  0x7f   : > { %2802 = vmatprep.mubr.msk.f32.mxu1 %vm448_vm3, %v3357_v56  ;;  %v1399_v28 = vsel %vm810_vm4, %v1397_v6, %v1398_v7 }
  0x81   : > { %2829 = vmatmul.mubr.msk.f32.gmra.mxu0 %vm448_vm3, %v3139_v22  ;;  %v1400_v22 = vrot.slane %v376_v24, 2 }
  0x82   : > { %2803 = vmatmul.mubr.msk.f32.gmra.mxu1 %vm448_vm3, %v3368_v15  ;;  %2831 = vmatprep.mubr.msk.f32.mxu0 %vm448_vm3, %v3166_v34 }
  0x83   : > { %2805 = vmatprep.mubr.msk.f32.mxu1 %vm448_vm3, %v3374_v63  ;;  %v1401_v34 = vsel %vm810_vm4, %v1398_v7, %v1400_v22 }
  0x85   : > { %2832 = vmatmul.mubr.msk.f32.gmra.mxu0 %vm448_vm3, %v3180_v39  ;;  %v1745_v39 = vrot.slane %v377_v21, 1 }
  0x86   : > { %2806 = vmatmul.mubr.msk.f32.gmra.mxu1 %vm448_vm3, %v3385_v31  ;;  %2834 = vmatprep.mubr.msk.f32.mxu0 %vm448_vm3, %v3214_v52 }
  0x87   : > { %2808 = vmatprep.mubr.msk.f32.mxu1 %vm448_vm3, %v3391_v9  ;;  %v1747_v52 = vsel %vm405_vm2, %v1745_v39, %v1746_v41 }
  0x89   : > { %2835 = vmatmul.mubr.msk.f32.gmra.mxu0 %vm448_vm3, %v3217_v53 }
  0x8a   : > { %2809 = vmatmul.mubr.msk.f32.gmra.mxu1 %vm448_vm3, %v3402_v46  ;;  %2837 = vmatprep.mubr.msk.f32.mxu0 %vm448_vm3, %v374_v8 }
  0x8b   : > { %2811 = vmatprep.mubr.msk.f32.mxu1 %vm448_vm3, %v3408_v18 }
  0x8d   : > { %2838 = vmatmul.mubr.msk.f32.gmra.mxu0 %vm448_vm3, %v375_v19 }
  0x8e   : > { %2812 = vmatmul.mubr.msk.f32.gmra.mxu1 %vm448_vm3, %v3417_v20  ;;  %2840 = vmatprep.mubr.msk.f32.mxu0 %vm448_vm3, %v377_v21 }
  0x8f   : > { %2814 = vmatprep.mubr.msk.f32.mxu1 %vm448_vm3, %v1399_v28 }
  0x91   : > { %2841 = vmatmul.mubr.msk.f32.gmra.mxu0 %vm448_vm3, %v378_v32 }
  0x92   : > { %2815 = vmatmul.mubr.msk.f32.gmra.mxu1 %vm448_vm3, %v1401_v34  ;;  %2871 = vmatprep.mubr.msk.f32.mxu0 %vm448_vm3, %v3317_v37 }
  0x93   : > { %2845 = vmatprep.mubr.msk.f32.mxu1 %vm448_vm3, %v3209_v49 }
  0x95   : > { %2872 = vmatmul.mubr.msk.f32.vlgmr.msra.gmra.mxu0 %vm448_vm3, %v3334_v40 }
  0x96   : > { %2846 = vmatmul.mubr.msk.f32.vlgmr.msra.gmra.mxu1 %vm448_vm3, %v3240_v60  ;;  %2874 = vmatprep.mubr.msk.f32.mxu0 %vm448_vm3, %v3340_v44 }
  0x97   : > { %2848 = vmatprep.mubr.msk.f32.mxu1 %vm448_vm3, %v3253_v1 }
  0x99   : > { %2875 = vmatmul.mubr.msk.f32.gmra.mxu0 %vm448_vm3, %v3351_v51 }
  0x9a   : > { %2849 = vmatmul.mubr.msk.f32.gmra.mxu1 %vm448_vm3, %v3271_v13  ;;  %2877 = vmatprep.mubr.msk.f32.mxu0 %vm448_vm3, %v3357_v56 }
  0x9b   : > { %2851 = vmatprep.mubr.msk.f32.mxu1 %vm448_vm3, %v3127_v17  ;;  %v1920_v17 = vrot.slane %v377_v21, 2 }
  0x9d   : > { %2878 = vmatmul.mubr.msk.f32.gmra.mxu0 %vm448_vm3, %v3368_v15 }
  0x9e   : > { %2852 = vmatmul.mubr.msk.f32.gmra.mxu1 %vm448_vm3, %v3155_v29  ;;  %2880 = vmatprep.mubr.msk.f32.mxu0 %vm448_vm3, %v3374_v63  ;;  %v1921_v29 = vrot.slane %v378_v32, 2 }
  0x9f   : > { %2854 = vmatprep.mubr.msk.f32.mxu1 %vm448_vm3, %v3175_v36  ;;  %v379_v36 = vld [vmem:[%s3076_s25 + $0xe8] sm:$0x3] }
  0xa0   : > { %v1923_v47 = vrot.slane %v379_v36, 2  ;;  %v1748_v49 = vrot.slane %v379_v36, 1 }
  0xa1   : > { %2881 = vmatmul.mubr.msk.f32.gmra.mxu0 %vm448_vm3, %v3385_v31 }
  0xa2   : > { %2855 = vmatmul.mubr.msk.f32.gmra.mxu1 %vm448_vm3, %v3206_v48  ;;  %2883 = vmatprep.mubr.msk.f32.mxu0 %vm448_vm3, %v3391_v9  ;;  %v1922_v48 = vsel %vm810_vm4, %v1920_v17, %v1921_v29  ;;  %v1924_v53 = vsel %vm810_vm4, %v1921_v29, %v1923_v47 }
  0xa3   : > { %2857 = vmatprep.mubr.msk.f32.mxu1 %vm448_vm3, %v3225_v55  ;;  %v1749_v55 = vsel %vm405_vm2, %v1746_v41, %v1748_v49 }
  0xa5   : > { %2884 = vmatmul.mubr.msk.f32.gmra.mxu0 %vm448_vm3, %v3402_v46 }
  0xa6   : > { %2858 = vmatmul.mubr.msk.f32.gmra.mxu1 %vm448_vm3, %v3243_v61  ;;  %2886 = vmatprep.mubr.msk.f32.mxu0 %vm448_vm3, %v3408_v18 }
  0xa7   : > { %2860 = vmatprep.mubr.msk.f32.mxu1 %vm448_vm3, %v3260_v10 }
  0xa9   : > { %2887 = vmatmul.mubr.msk.f32.gmra.mxu0 %vm448_vm3, %v3417_v20 }
  0xaa   : > { %2861 = vmatmul.mubr.msk.f32.gmra.mxu1 %vm448_vm3, %v3276_v14  ;;  %2889 = vmatprep.mubr.msk.f32.mxu0 %vm448_vm3, %v1399_v28 }
  0xab   : > { %2863 = vmatprep.mubr.msk.f32.mxu1 %vm448_vm3, %v3493_v30 }
  0xad   : > { %2890 = vmatmul.mubr.msk.f32.gmra.mxu0 %vm448_vm3, %v1401_v34 }
  0xae   : > { %2864 = vmatmul.mubr.msk.f32.gmra.mxu1 %vm448_vm3, %v3502_v27  ;;  %2892 = vmatprep.mubr.msk.f32.mxu0 %vm448_vm3, %v1922_v48 }
  0xaf   : > { %2866 = vmatprep.mubr.msk.f32.mxu1 %vm448_vm3, %v1747_v52 }
  0xb1   : > { %2893 = vmatmul.mubr.msk.f32.gmra.mxu0 %vm448_vm3, %v1924_v53 }
  0xb2   : > { %2867 = vmatmul.mubr.msk.f32.gmra.mxu1 %vm448_vm3, %v1749_v55 }
  0xe5   : > { %v2665_v60 = vpop.f32.mrf.mxu0 }
  0xe6   : > { %v2677_v61 = vpop.f32.mrf.mxu1 }
  0xe7   : > { %v551_v1 = vpop.f32.mrf.mxu0 }
  0xe8   : > { %v591_v10 = vpop.f32.mrf.mxu1 }
  0xe9   : > { %v2668_v13 = vpop.f32.mrf.mxu0 }
  0xea   : > { %v2680_v14 = vpop.f32.mrf.mxu1 }
  0xeb   : > { %v561_v26 = vpop.f32.mrf.mxu0 }
  0xec   : > { %v601_v2 = vpop.f32.mrf.mxu1 }
  0xed   : > { %v2671_v33 = vpop.f32.mrf.mxu0 }
  0xee   : > { %v2683_v37 = vpop.f32.mrf.mxu1 }
  0xef   : > { %v571_v3 = vpop.f32.mrf.mxu0 }
  0xf0   : > { %v611_v38 = vpop.f32.mrf.mxu1 }
  0xf1   : > { %v2674_v40 = vpop.f32.mrf.mxu0 }
  0xf2   : > { %v2686_v43 = vpop.f32.mrf.mxu1 }
  0xf3   : > { %v581_v44 = vpop.f32.mrf.mxu0 }
  0xf4   : > { %v3635_v45 = vpop.f32.mrf.mxu1 }
  0xf5   : > { %v2717_v50 = vpop.f32.mrf.mxu0 }
  0xf6   : > { %v2691_v51 = vpop.f32.mrf.mxu1 }
  0xf7   : > { %v737_v54 = vadd.f32 %v2691_v51, %v2665_v60  ;;  %v954_v56 = vpop.f32.mrf.mxu0 }
  0xf8   : > { %v731_v57 = vpop.f32.mrf.mxu1 }
  0xf9   : > { %v3637_v59 = vadd.f32 %v2717_v50, %v737_v54  ;;  %v732_v15 = vadd.f32 %v731_v57, %v551_v1  ;;  %v2720_v62 = vpop.f32.mrf.mxu0 }
  0xfa   : > { %v2694_v63 = vpop.f32.mrf.mxu1 }
  0xfb   : > { %v3639_v0 = vadd.f32 %v954_v56, %v732_v15  ;;  %v747_v4 = vadd.f32 %v2694_v63, %v2668_v13  ;;  %v964_v31 = vpop.f32.mrf.mxu0 }
  0xfc   : > { %v741_v5 = vpop.f32.mrf.mxu1 }
  0xfd   : > { %v3641_v9 = vadd.f32 %v2720_v62, %v747_v4  ;;  %v742_v11 = vadd.f32 %v741_v5, %v561_v26  ;;  %v2723_v16 = vpop.f32.mrf.mxu0 }
  0xfe   : > { %v2697_v46 = vpop.f32.mrf.mxu1 }
  0xff   : > { %v3643_v12 = vadd.f32 %v964_v31, %v742_v11  ;;  %v757_v18 = vadd.f32 %v2697_v46, %v2671_v33  ;;  %v974_v20 = vpop.f32.mrf.mxu0 }
 0x100   : > { %v751_v58 = vpop.f32.mrf.mxu1 }
 0x101   : > { %v3645_v35 = vadd.f32 %v2723_v16, %v757_v18  ;;  %v752_v8 = vadd.f32 %v751_v58, %v571_v3  ;;  %v2726_v19 = vpop.f32.mrf.mxu0 }
 0x102   : > { %v2700_v42 = vpop.f32.mrf.mxu1 }
 0x103   : > { %v3647_v23 = vadd.f32 %v974_v20, %v752_v8  ;;  %v767_v24 = vadd.f32 %v2700_v42, %v2674_v40  ;;  %v984_v25 = vpop.f32.mrf.mxu0 }
 0x104   : > { %v761_v30 = vpop.f32.mrf.mxu1 }
 0x105   : > { %v3649_v27 = vadd.f32 %v2726_v19, %v767_v24  ;;  %v762_v6 = vadd.f32 %v761_v30, %v581_v44  ;;  %v2729_v7 = vpop.f32.mrf.mxu0 }
 0x106   : > { %v2703_v21 = vpop.f32.mrf.mxu1 }
 0x107   : > { %v3651_v22 = vadd.f32 %v984_v25, %v762_v6  ;;  %v777_v28 = vadd.f32 %v2703_v21, %v2677_v61  ;;  %v994_v32 = vpop.f32.mrf.mxu0 }
 0x108   : > { %v771_v34 = vpop.f32.mrf.mxu1 }
 0x109   : > { %v3653_v17 = vadd.f32 %v2729_v7, %v777_v28  ;;  %v772_v29 = vadd.f32 %v771_v34, %v591_v10  ;;  %v2732_v36 = vpop.f32.mrf.mxu0 }
 0x10a   : > { %v2706_v39 = vpop.f32.mrf.mxu1 }
 0x10b   : > { %v3655_v41 = vadd.f32 %v994_v32, %v772_v29  ;;  %v787_v47 = vadd.f32 %v2706_v39, %v2680_v14  ;;  %v1004_v48 = vpop.f32.mrf.mxu0 }
 0x10c   : > { %v781_v49 = vpop.f32.mrf.mxu1 }
 0x10d   : > { %v3657_v52 = vadd.f32 %v2732_v36, %v787_v47  ;;  %v782_v53 = vadd.f32 %v781_v49, %v601_v2  ;;  %v2735_v55 = vpop.f32.mrf.mxu0 }
 0x10e   : > { %v2709_v60 = vpop.f32.mrf.mxu1 }
 0x10f   : > { %v3659_v1 = vadd.f32 %v1004_v48, %v782_v53  ;;  %v797_v61 = vadd.f32 %v2709_v60, %v2683_v37  ;;  %v1014_v13 = vpop.f32.mrf.mxu0 }
 0x110   : > { %v791_v26 = vpop.f32.mrf.mxu1 }
 0x111   : > { %v3661_v33 = vadd.f32 %v2735_v55, %v797_v61  ;;  %v792_v10 = vadd.f32 %v791_v26, %v611_v38  ;;  %v2738_v3 = vpop.f32.mrf.mxu0 }
 0x112   : > { %v2712_v40 = vpop.f32.mrf.mxu1 }
 0x113   : > { %v3663_v44 = vadd.f32 %v1014_v13, %v792_v10  ;;  %v807_v14 = vadd.f32 %v2712_v40, %v2686_v43  ;;  %v1024_v50 = vpop.f32.mrf.mxu0 }
 0x114   : > { %v801_v51 = vpop.f32.mrf.mxu1 }
 0x115   : > { %v3665_v54 = vadd.f32 %v2738_v3, %v807_v14  ;;  %v802_v2 = vadd.f32 %v801_v51, %v3635_v45  ;;  %v3668_v56 = vpop.f32.mrf.mxu0 }
 0x116   : > { %v2743_v57 = vpop.f32.mrf.mxu1 }
 0x117   : > { %v3670_v37 = vadd.f32 %v1024_v50, %v802_v2  ;;  %v3672_v15 = vpop.f32.mrf.mxu0 }
 0x118   : > { %v1126_v62 = vpop.f32.mrf.mxu1 }
 0x119   : > { %v3674_v38 = vpop.f32.mrf.mxu0 }
 0x11a   : > { %v2746_v63 = vpop.f32.mrf.mxu1 }
 0x11b   : > { %v3676_v4 = vpop.f32.mrf.mxu0 }
 0x11c   : > { %v1136_v43 = vpop.f32.mrf.mxu1 }
 0x11d   : > { %v3678_v31 = vpop.f32.mrf.mxu0 }
 0x11e   : > { %v2749_v5 = vpop.f32.mrf.mxu1 }
 0x11f   : > { %v3680_v11 = vpop.f32.mrf.mxu0 }
 0x120   : > { %v1146_v45 = vpop.f32.mrf.mxu1 }
 0x121   : > { %v3682_v16 = vpop.f32.mrf.mxu0 }
 0x122   : > { %v2752_v46 = vpop.f32.mrf.mxu1 }
 0x123   : > { %v3684_v18 = vpop.f32.mrf.mxu0 }
 0x124   : > { %v1156_v20 = vpop.f32.mrf.mxu1 }
 0x125   : > { %v3686_v58 = vpop.f32.mrf.mxu0 }
 0x126   : > { %v2755_v8 = vpop.f32.mrf.mxu1 }
 0x127   : > { %v3688_v19 = vpop.f32.mrf.mxu0 }
 0x128   : > { %v3690_v42 = vpop.f32.mrf.mxu1 }
 0x129   : > { %v3692_v24 = vpop.f32.mrf.mxu0 }
 0x12a   : > { %v2758_v25 = vpop.f32.mrf.mxu1 }
 0x12b   : > { %v3694_v30 = vpop.f32.mrf.mxu0 }
 0x12c   : > { %v1176_v6 = vpop.f32.mrf.mxu1 }
 0x12d   : > { %v3696_v7 = vpop.f32.mrf.mxu0 }
 0x12e   : > { %v2761_v21 = vpop.f32.mrf.mxu1 }
 0x12f   : > { %v3698_v28 = vpop.f32.mrf.mxu0 }
 0x130   : > { %3931 = vst [vmem:[#allocation4_spill] sm:$0xff] %v3698_v28  ;;  %v3700_v32 = vpop.f32.mrf.mxu1 }
 0x131   : > { %v3702_v34 = vpop.f32.mrf.mxu0 }
 0x132   : > { %3932 = vst [vmem:[#allocation5_spill] sm:$0xff] %v3702_v34  ;;  %v3704_v29 = vpop.f32.mrf.mxu1 }
 0x133   : > { %v3706_v36 = vpop.f32.mrf.mxu0 }
 0x134   : > { %3933 = vst [vmem:[#allocation6_spill] sm:$0xff] %v3706_v36  ;;  %v1196_v39 = vpop.f32.mrf.mxu1 }
 0x135   : > { %v2821_v47 = vpop.f32.mrf.mxu0 }
 0x136   : > { %v2795_v48 = vpop.f32.mrf.mxu1 }
 0x137   : > { %v3708_v49 = vpop.f32.mrf.mxu0 }
 0x138   : > { %v1477_v53 = vpop.f32.mrf.mxu1 }
 0x139   : > { %v3710_v55 = vpop.f32.mrf.mxu0 }
 0x13a   : > { %3934 = vst [vmem:[#allocation7_spill] sm:$0xff] %v3710_v55  ;;  %v2798_v60 = vpop.f32.mrf.mxu1 }
 0x13b   : > { %v3712_v61 = vpop.f32.mrf.mxu0 }
 0x13c   : > { %3935 = vst [vmem:[#allocation8_spill] sm:$0xff] %v3712_v61  ;;  %v1487_v13 = vpop.f32.mrf.mxu1 }
 0x13d   : > { %v3714_v26 = vpop.f32.mrf.mxu0 }
 0x13e   : > { %3936 = vst [vmem:[#allocation9_spill] sm:$0xff] %v3714_v26  ;;  %v2801_v10 = vpop.f32.mrf.mxu1 }
 0x13f   : > { %v3716_v3 = vpop.f32.mrf.mxu0 }
 0x140   : > { %3937 = vst [vmem:[#allocation10_spill] sm:$0xff] %v3716_v3  ;;  %v1497_v40 = vpop.f32.mrf.mxu1 }
 0x141   : > { %v3718_v14 = vpop.f32.mrf.mxu0 }
 0x142   : > { %3938 = vst [vmem:[#allocation11_spill] sm:$0xff] %v3718_v14  ;;  %v3720_v50 = vpop.f32.mrf.mxu1  ;;  %v1206_v14 = vadd.f32 %v2743_v57, %v3637_v59  ;;  %v1209_v59 = vadd.f32 %v1146_v45, %v3647_v23  ;;  %v1213_v45 = vadd.f32 %v3690_v42, %v3655_v41  ;;  %v1219_v41 = vadd.f32 %v1196_v39, %v3670_v37 }
 0x143   : > { %3939 = vst [vmem:[#allocation12_spill] sm:$0xff] %v3720_v50  ;;  %v3722_v51 = vpop.f32.mrf.mxu0 }
 0x144   : > { %3940 = vst [vmem:[#allocation13_spill] sm:$0xff] %v3722_v51  ;;  %v3724_v2 = vpop.f32.mrf.mxu1  ;;  %v1205_v51 = vadd.f32 %v1126_v62, %v3639_v0 }
 0x145   : > { %3941 = vst [vmem:[#allocation14_spill] sm:$0xff] %v3724_v2  ;;  %v3726_v36 = vpop.f32.mrf.mxu0 }
 0x146   : > { %3942 = vst [vmem:[#allocation15_spill] sm:$0xff] %v3726_v36  ;;  %v3728_v34 = vpop.f32.mrf.mxu1  ;;  %v1208_v36 = vadd.f32 %v2746_v63, %v3641_v9  ;;  %v1381_v0 = vadd.f32 %v3672_v15, %v1205_v51  ;;  %v1211_v9 = vadd.f32 %v1156_v20, %v3651_v22 }
 0x147   : > { %3943 = vst [vmem:[#allocation16_spill] sm:$0xff] %v3728_v34  ;;  %v3730_v61 = vpop.f32.mrf.mxu0 }
 0x148   : > { %3944 = vst [vmem:[#allocation17_spill] sm:$0xff] %v3730_v61  ;;  %v3732_v28 = vpop.f32.mrf.mxu1  ;;  %v1207_v61 = vadd.f32 %v1136_v43, %v3643_v12  ;;  %v1384_v63 = vadd.f32 %v3674_v38, %v1208_v36  ;;  %v1214_v43 = vadd.f32 %v2755_v8, %v3653_v17  ;;  %v1216_v38 = vadd.f32 %v2758_v25, %v3657_v52 }
 0x149   : > { %v3734_v26 = vpop.f32.mrf.mxu0  ;;  %v1217_v36 = vadd.f32 %v3700_v32, %v3663_v44 }
 0x14a   : > { %3945 = vst [vmem:[#allocation18_spill] sm:$0xff] %v3734_v26  ;;  %v3736_v3 = vpop.f32.mrf.mxu1  ;;  %v1382_v26 = vadd.f32 %v3668_v56, %v1206_v14  ;;  %v1383_v56 = vadd.f32 %v3676_v4, %v1207_v61  ;;  %v1215_v4 = vadd.f32 %v1176_v6, %v3659_v1  ;;  %v1559_v17 = vadd.f32 %v2798_v60, %v1384_v63  ;;  %v3951_v60 = vld [vmem:[#allocation5_spill] sm:$0xff] }
 0x14b   : > { %3946 = vst [vmem:[#allocation19_spill] sm:$0xff] %v3736_v3  ;;  %v3739_v55 = vpop.f32.mrf.mxu0  ;;  %v1210_v3 = vadd.f32 %v2749_v5, %v3645_v35  ;;  %v1556_v5 = vadd.f32 %v1477_v53, %v1381_v0  ;;  %v1390_v1 = vadd.f32 %v3686_v58, %v1214_v43 }
 0x14c   : > { %3947 = vst [vmem:[#allocation20_spill] sm:$0xff] %v3739_v55  ;;  %v3741_v50 = vpop.f32.mrf.mxu1  ;;  %v1212_v55 = vadd.f32 %v2752_v46, %v3649_v27  ;;  %v1557_v62 = vadd.f32 %v2795_v48, %v1382_v26  ;;  %v1385_v27 = vadd.f32 %v3680_v11, %v1209_v59  ;;  %v1218_v11 = vadd.f32 %v2761_v21, %v3661_v33  ;;  %v3955_v59 = vld [vmem:[#allocation10_spill] sm:$0xff] }
 0x14d   : > { %3948 = vst [vmem:[#allocation21_spill] sm:$0xff] %v3741_v50  ;;  %v3744_v2 = vpop.f32.mrf.mxu0  ;;  %v1386_v23 = vadd.f32 %v3678_v31, %v1210_v3  ;;  %v1387_v31 = vadd.f32 %v3684_v18, %v1211_v9  ;;  %v1558_v52 = vadd.f32 %v1487_v13, %v1383_v56  ;;  %v1728_v25 = vadd.f32 %v3708_v49, %v1556_v5  ;;  %v3950_v49 = vld [vmem:[#allocation4_spill] sm:$0xff]  ;;  %v3957_v63 = vld [vmem:[#allocation14_spill] sm:$0xff] }
 0x14e   : > { %v3748_v34 = vpop.f32.mrf.mxu1  ;;  %v1388_v22 = vadd.f32 %v3682_v16, %v1212_v55  ;;  %v1729_v20 = vadd.f32 %v2821_v47, %v1557_v62  ;;  %v1220_v16 = vadd.f32 %v3704_v29, %v3665_v54  ;;  %v1389_v21 = vadd.f32 %v3688_v19, %v1213_v45  ;;  %v3949_v29 = vld [vmem:[#allocation7_spill] sm:$0xff]  ;;  %v3952_v19 = vld [vmem:[#allocation6_spill] sm:$0xff]  ;;  %v3956_v9 = vld [vmem:[#allocation12_spill] sm:$0xff] }
 0x14f   : > { %v3753_v57 = vpop.f32.mrf.mxu0  ;;  %v1561_v18 = vadd.f32 %v2801_v10, %v1386_v23  ;;  %v1392_v47 = vadd.f32 %v3692_v24, %v1216_v38  ;;  %v1391_v44 = vadd.f32 %v3694_v30, %v1215_v4  ;;  %v1560_v32 = vadd.f32 %v1497_v40, %v1385_v27  ;;  %v3953_v24 = vld [vmem:[#allocation8_spill] sm:$0xff]  ;;  %v3954_v10 = vld [vmem:[#allocation9_spill] sm:$0xff] }
 0x150   : > { %v3756_v50 = vpop.f32.mrf.mxu1  ;;  %v1394_v37 = vadd.f32 %v3696_v7, %v1218_v11  ;;  %v1731_v39 = vadd.f32 %v3949_v29, %v1559_v17  ;;  %v1393_v55 = vadd.f32 %v3950_v49, %v1217_v36  ;;  %v3794_v61 = vadd.f32 %v3951_v60, %v1220_v16  ;;  %v3958_v23 = vld [vmem:[#allocation16_spill] sm:$0xff] }
 0x151   : > { %v3760_v12 = vpop.f32.mrf.mxu0  ;;  %v3797_v13 = vadd.f32 %v3952_v19, %v1219_v41  ;;  %v1730_v30 = vadd.f32 %v3953_v24, %v1558_v52  ;;  %v1733_v3 = vadd.f32 %v3954_v10, %v1561_v18  ;;  %v1732_v0 = vadd.f32 %v3955_v59, %v1560_v32  ;;  %v3961_v18 = vld [vmem:[#allocation11_spill] sm:$0xff]  ;;  %v3965_v60 = vld [vmem:[#allocation18_spill] sm:$0xff] }
 0x152   : > { %v3764_v35 = vpop.f32.mrf.mxu1  ;;  %v1563_v62 = vadd.f32 %v3956_v9, %v1388_v22  ;;  %v1562_v56 = vadd.f32 %v3957_v63, %v1387_v31  ;;  %v1565_v27 = vadd.f32 %v3958_v23, %v1390_v1  ;;  %v3959_v17 = vld [vmem:[#allocation19_spill] sm:$0xff]  ;;  %v1568_v59 = vadd.f32 %v3756_v50, %v1393_v55 }
 0x153   : > { %v3769_v15 = vpop.f32.mrf.mxu0  ;;  %v3966_v10 = vld [vmem:[#allocation20_spill] sm:$0xff] }
 0x154   : > { %v3776_v46 = vpop.f32.mrf.mxu1  ;;  %v3960_v16 = vld [vmem:[#allocation21_spill] sm:$0xff] }
 0x155   : > { %v2873_v8 = vpop.f32.mrf.mxu0  ;;  %v1566_v41 = vadd.f32 %v3960_v16, %v1391_v44 }
 0x156   : > { %v2847_v42 = vpop.f32.mrf.mxu1 }
 0x157   : > { %v1905_v6 = vadd.f32 %v2847_v42, %v1729_v20  ;;  %v2000_v33 = vpop.f32.mrf.mxu0  ;;  %v1564_v20 = vadd.f32 %v3732_v28, %v1389_v21 }
 0x158   : > { %v1825_v54 = vpop.f32.mrf.mxu1 }
 0x159   : > { %v2080_v48 = vadd.f32 %v2873_v8, %v1905_v6  ;;  %v1904_v58 = vadd.f32 %v1825_v54, %v1728_v25  ;;  %v2876_v53 = vpop.f32.mrf.mxu0  ;;  %v1567_v8 = vadd.f32 %v3959_v17, %v1392_v47  ;;  %v1735_v6 = vadd.f32 %v3961_v18, %v1563_v62  ;;  %v3963_v54 = vld [vmem:[#allocation15_spill] sm:$0xff] }
 0x15a   : > { %v2850_v26 = vpop.f32.mrf.mxu1  ;;  %v1737_v29 = vadd.f32 %v3963_v54, %v1565_v27 }
 0x15b   : > { %2097 = vst.msk [vmem:[%s3071_s22 + $0x8] sm:$0xff] %vm2095_vm5, %v2080_v48  ;;  %v2148_v7 = vmul.f32 %v2080_v48, %v2080_v48  ;;  %v2079_v40 = vadd.f32 %v2000_v33, %v1904_v58  ;;  %v1907_v14 = vadd.f32 %v2850_v26, %v1731_v39  ;;  %v2010_v51 = vpop.f32.mrf.mxu0  ;;  %v2114_v5 = vsel %vm2095_vm5, %v2080_v48, 0.0  ;;  %v3962_v33 = vld [vmem:[#allocation13_spill] sm:$0xff] }
 0x15c   : > { %v1835_v43 = vpop.f32.mrf.mxu1  ;;  %v1734_v28 = vadd.f32 %v3962_v33, %v1562_v56  ;;  %v1739_v19 = vadd.f32 %v3965_v60, %v1567_v8 }
 0x15d   : > { %2096 = vst.msk [vmem:[%s3071_s22] sm:$0xff] %vm2095_vm5, %v2079_v40  ;;  %v2113_v45 = vsel %vm2095_vm5, %v2079_v40, 0.0  ;;  %v2147_v38 = vmul.f32 %v2079_v40, %v2079_v40  ;;  %v2082_v4 = vadd.f32 %v2876_v53, %v1907_v14  ;;  %v2879_v11 = vpop.f32.mrf.mxu0  ;;  %v1906_v36 = vadd.f32 %v1835_v43, %v1730_v30  ;;  %v3964_v53 = vld [vmem:[#allocation17_spill] sm:$0xff] }
 0x15e   : > { %v2115_v22 = vadd.f32 %v2114_v5, %v2113_v45  ;;  %v2853_v31 = vpop.f32.mrf.mxu1  ;;  %v2164_v52 = vsel %vm2095_vm5, %v2148_v7, 0.0  ;;  %v1736_v49 = vadd.f32 %v3964_v53, %v1564_v20  ;;  %v1569_v7 = vadd.f32 %v3748_v34, %v1394_v37 }
 0x15f   : > { %v2163_v42 = vsel %vm2095_vm5, %v2147_v38, 0.0  ;;  %2099 = vst.msk [vmem:[%s3071_s22 + $0x18] sm:$0xff] %vm2095_vm5, %v2082_v4  ;;  %v1909_v1 = vadd.f32 %v2853_v31, %v1733_v3  ;;  %v2020_v25 = vpop.f32.mrf.mxu0  ;;  %v2081_v47 = vadd.f32 %v2010_v51, %v1906_v36  ;;  %v2150_v44 = vmul.f32 %v2082_v4, %v2082_v4 }
 0x160   : > { %v2165_v21 = vadd.f32 %v2164_v52, %v2163_v42  ;;  %v1845_v32 = vpop.f32.mrf.mxu1  ;;  %v1738_v3 = vadd.f32 %v3966_v10, %v1566_v41  ;;  %v1741_v38 = vadd.f32 %v3744_v2, %v1569_v7 }
 0x161   : > { %v2084_v39 = vadd.f32 %v2879_v11, %v1909_v1  ;;  %v1908_v48 = vadd.f32 %v1845_v32, %v1732_v0  ;;  %v2882_v58 = vpop.f32.mrf.mxu0  ;;  %2098 = vst.msk [vmem:[%s3071_s22 + $0x10] sm:$0xff] %vm2095_vm5, %v2081_v47  ;;  %v2116_v24 = vsel %vm2095_vm5, %v2081_v47, 0.0  ;;  %v2149_v30 = vmul.f32 %v2081_v47, %v2081_v47 }
 0x162   : > { %v2856_v26 = vpop.f32.mrf.mxu1  ;;  %v2117_v40 = vadd.f32 %v2116_v24, %v2115_v22  ;;  %v2118_v0 = vsel %vm2095_vm5, %v2082_v4, 0.0  ;;  %v2168_v56 = vsel %vm2095_vm5, %v2150_v44, 0.0  ;;  %v1570_v47 = vadd.f32 %v3776_v46, %v3797_v13 }
 0x163   : > { %2101 = vst.msk [vmem:[%s3071_s22 + $0x28] sm:$0xff] %vm2095_vm5, %v2084_v39  ;;  %v2083_v14 = vadd.f32 %v2020_v25, %v1908_v48  ;;  %v2030_v51 = vpop.f32.mrf.mxu0  ;;  %v2166_v9 = vsel %vm2095_vm5, %v2149_v30, 0.0  ;;  %v1911_v62 = vadd.f32 %v2856_v26, %v1735_v6  ;;  %v2152_v43 = vmul.f32 %v2084_v39, %v2084_v39 }
 0x164   : > { %v1855_v63 = vpop.f32.mrf.mxu1  ;;  %v2167_v23 = vadd.f32 %v2166_v9, %v2165_v21  ;;  %v2119_v34 = vadd.f32 %v2118_v0, %v2117_v40  ;;  %v2122_v8 = vsel %vm2095_vm5, %v2084_v39, 0.0  ;;  %v1740_v25 = vadd.f32 %v3753_v57, %v1568_v59 }
 0x165   : > { %2100 = vst.msk [vmem:[%s3071_s22 + $0x20] sm:$0xff] %vm2095_vm5, %v2083_v14  ;;  %v2120_v37 = vsel %vm2095_vm5, %v2083_v14, 0.0  ;;  %v2885_v27 = vpop.f32.mrf.mxu0  ;;  %v2151_v5 = vmul.f32 %v2083_v14, %v2083_v14  ;;  %v2086_v45 = vadd.f32 %v2882_v58, %v1911_v62  ;;  %v1910_v50 = vadd.f32 %v1855_v63, %v1734_v28 }
 0x166   : > { %v2859_v55 = vpop.f32.mrf.mxu1  ;;  %v2121_v4 = vadd.f32 %v2120_v37, %v2119_v34  ;;  %v2169_v11 = vadd.f32 %v2168_v56, %v2167_v23  ;;  %v2172_v18 = vsel %vm2095_vm5, %v2152_v43, 0.0  ;;  %v1571_v21 = vadd.f32 %v3764_v35, %v3794_v61 }
 0x167   : > { %v1913_v20 = vadd.f32 %v2859_v55, %v1737_v29  ;;  %v2040_v17 = vpop.f32.mrf.mxu0  ;;  %v2170_v22 = vsel %vm2095_vm5, %v2151_v5, 0.0  ;;  %2103 = vst.msk [vmem:[%s3071_s22 + $0x38] sm:$0xff] %vm2095_vm5, %v2086_v45  ;;  %v2154_v36 = vmul.f32 %v2086_v45, %v2086_v45  ;;  %v2085_v31 = vadd.f32 %v2030_v51, %v1910_v50 }
 0x168   : > { %v1865_v16 = vpop.f32.mrf.mxu1  ;;  %v2171_v41 = vadd.f32 %v2170_v22, %v2169_v11  ;;  %v2123_v52 = vadd.f32 %v2122_v8, %v2121_v4  ;;  %v2126_v29 = vsel %vm2095_vm5, %v2086_v45, 0.0  ;;  %v1743_v51 = vadd.f32 %v3760_v12, %v1571_v21 }
 0x169   : > { %v2088_v42 = vadd.f32 %v2885_v27, %v1913_v20  ;;  %v1912_v1 = vadd.f32 %v1865_v16, %v1736_v49  ;;  %v2888_v2 = vpop.f32.mrf.mxu0  ;;  %2102 = vst.msk [vmem:[%s3071_s22 + $0x30] sm:$0xff] %vm2095_vm5, %v2085_v31  ;;  %v2124_v6 = vsel %vm2095_vm5, %v2085_v31, 0.0  ;;  %v2153_v33 = vmul.f32 %v2085_v31, %v2085_v31 }
 0x16a   : > { %v2862_v28 = vpop.f32.mrf.mxu1  ;;  %v2125_v32 = vadd.f32 %v2124_v6, %v2123_v52  ;;  %v2173_v54 = vadd.f32 %v2172_v18, %v2171_v41  ;;  %v2176_v53 = vsel %vm2095_vm5, %v2154_v36, 0.0 }
 0x16b   : > { %2105 = vst.msk [vmem:[%s3071_s22 + $0x48] sm:$0xff] %vm2095_vm5, %v2088_v42  ;;  %v2050_v57 = vpop.f32.mrf.mxu0  ;;  %v2174_v44 = vsel %vm2095_vm5, %v2153_v33, 0.0  ;;  %v2087_v39 = vadd.f32 %v2040_v17, %v1912_v1  ;;  %v1915_v48 = vadd.f32 %v2862_v28, %v1739_v19  ;;  %v2156_v46 = vmul.f32 %v2088_v42, %v2088_v42 }
 0x16c   : > { %v1875_v58 = vpop.f32.mrf.mxu1  ;;  %v2175_v49 = vadd.f32 %v2174_v44, %v2173_v54  ;;  %v2127_v35 = vadd.f32 %v2126_v29, %v2125_v32  ;;  %v2130_v59 = vsel %vm2095_vm5, %v2088_v42, 0.0  ;;  %v2112_v44 = vld [vmem:[#allocation2] sm:$0xff] }
 0x16d   : > { %v1914_v61 = vadd.f32 %v1875_v58, %v1738_v3  ;;  %v2891_v60 = vpop.f32.mrf.mxu0  ;;  %2104 = vst.msk [vmem:[%s3071_s22 + $0x40] sm:$0xff] %vm2095_vm5, %v2087_v39  ;;  %v2128_v13 = vsel %vm2095_vm5, %v2087_v39, 0.0  ;;  %v2155_v24 = vmul.f32 %v2087_v39, %v2087_v39  ;;  %v2090_v30 = vadd.f32 %v2888_v2, %v1915_v48 }
 0x16e   : > { %v2865_v26 = vpop.f32.mrf.mxu1  ;;  %v2129_v10 = vadd.f32 %v2128_v13, %v2127_v35  ;;  %v2177_v7 = vadd.f32 %v2176_v53, %v2175_v49  ;;  %v1742_v3 = vadd.f32 %v3769_v15, %v1570_v47  ;;  %v2180_v34 = vsel %vm2095_vm5, %v2156_v46, 0.0  ;;  %v2146_v49 = vld [vmem:[#allocation3] sm:$0xff] }
 0x16f   : > { %v2089_v19 = vadd.f32 %v2050_v57, %v1914_v61  ;;  %v1917_v40 = vadd.f32 %v2865_v26, %v1741_v38  ;;  %v2060_v14 = vpop.f32.mrf.mxu0  ;;  %v2178_v0 = vsel %vm2095_vm5, %v2155_v24, 0.0  ;;  %2107 = vst.msk [vmem:[%s3071_s22 + $0x58] sm:$0xff] %vm2095_vm5, %v2090_v30  ;;  %v2158_v12 = vmul.f32 %v2090_v30, %v2090_v30 }
 0x170   : > { %v1885_v9 = vpop.f32.mrf.mxu1  ;;  %v2179_v62 = vadd.f32 %v2178_v0, %v2177_v7  ;;  %v2131_v63 = vadd.f32 %v2130_v59, %v2129_v10  ;;  %v2134_v38 = vsel %vm2095_vm5, %v2090_v30, 0.0 }
 0x171   : > { %2106 = vst.msk [vmem:[%s3071_s22 + $0x50] sm:$0xff] %vm2095_vm5, %v2089_v19  ;;  %v2132_v56 = vsel %vm2095_vm5, %v2089_v19, 0.0  ;;  %v2157_v23 = vmul.f32 %v2089_v19, %v2089_v19  ;;  %v2092_v37 = vadd.f32 %v2891_v60, %v1917_v40  ;;  %v1916_v15 = vadd.f32 %v1885_v9, %v1740_v25  ;;  %v2894_v55 = vpop.f32.mrf.mxu0 }
 0x172   : > { %v2868_v27 = vpop.f32.mrf.mxu1  ;;  %v2133_v43 = vadd.f32 %v2132_v56, %v2131_v63  ;;  %v2181_v5 = vadd.f32 %v2180_v34, %v2179_v62  ;;  %v2184_v36 = vsel %vm2095_vm5, %v2158_v12, 0.0 }
 0x173   : > { %v2182_v45 = vsel %vm2095_vm5, %v2157_v23, 0.0  ;;  %v1919_v50 = vadd.f32 %v2868_v27, %v1743_v51  ;;  %2109 = vst.msk [vmem:[%s3071_s22 + $0x68] sm:$0xff] %vm2095_vm5, %v2092_v37  ;;  %v2091_v4 = vadd.f32 %v2060_v14, %v1916_v15  ;;  %v2160_v31 = vmul.f32 %v2092_v37, %v2092_v37  ;;  %v2070_v1 = vpop.f32.mrf.mxu0 }
 0x174   : > { %v1895_v11 = vpop.f32.mrf.mxu1  ;;  %v2183_v20 = vadd.f32 %v2182_v45, %v2181_v5  ;;  %v2135_v17 = vadd.f32 %v2134_v38, %v2133_v43  ;;  %v2138_v2 = vsel %vm2095_vm5, %v2092_v37, 0.0 }
 0x175   : > { %v2094_v8 = vadd.f32 %v2894_v55, %v1919_v50  ;;  %v1918_v22 = vadd.f32 %v1895_v11, %v1742_v3  ;;  %2108 = vst.msk [vmem:[%s3071_s22 + $0x60] sm:$0xff] %vm2095_vm5, %v2091_v4  ;;  %v2136_v16 = vsel %vm2095_vm5, %v2091_v4, 0.0  ;;  %v2159_v41 = vmul.f32 %v2091_v4, %v2091_v4 }
 0x176   : > { %v2137_v52 = vadd.f32 %v2136_v16, %v2135_v17  ;;  %v2185_v42 = vadd.f32 %v2184_v36, %v2183_v20  ;;  %v2188_v28 = vsel %vm2095_vm5, %v2160_v31, 0.0 }
 0x177   : > { %2111 = vst.msk [vmem:[%s3071_s22 + $0x78] sm:$0xff] %vm2095_vm5, %v2094_v8  ;;  %v2186_v25 = vsel %vm2095_vm5, %v2159_v41, 0.0  ;;  %v2093_v18 = vadd.f32 %v2070_v1, %v1918_v22  ;;  %v2162_v21 = vmul.f32 %v2094_v8, %v2094_v8  ;;  %v2142_v29 = vsel %vm2095_vm5, %v2094_v8, 0.0 }
 0x178   : > { %v2187_v6 = vadd.f32 %v2186_v25, %v2185_v42  ;;  %v2139_v33 = vadd.f32 %v2138_v2, %v2137_v52 }
 0x179   : > { %2110 = vst.msk [vmem:[%s3071_s22 + $0x70] sm:$0xff] %vm2095_vm5, %v2093_v18  ;;  %v2140_v47 = vsel %vm2095_vm5, %v2093_v18, 0.0  ;;  %v2161_v32 = vmul.f32 %v2093_v18, %v2093_v18  ;;  %v2192_v53 = vsel %vm2095_vm5, %v2162_v21, 0.0 }
 0x17a   : > { %v2141_v54 = vadd.f32 %v2140_v47, %v2139_v33  ;;  %v2189_v57 = vadd.f32 %v2188_v28, %v2187_v6 }
 0x17b   : > { %v2190_v39 = vsel %vm2095_vm5, %v2161_v32, 0.0 }
 0x17c   : > { %v2143_v48 = vadd.f32 %v2142_v29, %v2141_v54  ;;  %v2191_v58 = vadd.f32 %v2190_v39, %v2189_v57 }
 0x17e   : > { %v2144_v35 = vadd.f32 %v2143_v48, %v2112_v44  ;;  %v2193_v61 = vadd.f32 %v2192_v53, %v2191_v58  ;;  %2197 = sbr.rel (%p3080_p12) target bundleno = 436 (0x1b4), region = 52 }
 0x180   : > { %2145 = vst.msk [vmem:[#allocation2] sm:$0xff] %vm2095_vm5, %v2144_v35  ;;  %v2194_v60 = vadd.f32 %v2193_v61, %v2146_v49 }
 0x182   : > { %2195 = vst.msk [vmem:[#allocation3] sm:$0xff] %vm2095_vm5, %v2194_v60 }
 0x183   : > { %v2219_v15 = vld [vmem:[%s3925_s4] sm:$0x1]  ;;  %vm2223_vm6 = vcmask 57344  }
 0x184   : > { %v2225_v5 = vld [vmem:[%s3926_s5] sm:$0x1] }
 0x187   : > { %v2198_v46 = vld [vmem:[#allocation2] sm:$0xff] }
 0x188   : > { %v2199_v24 = vsel %vm2095_vm5, %v2198_v46, 0.0 }
 0x189   : > { %v2206_v13 = vld [vmem:[#allocation3] sm:$0xff]  ;;  %v2200_v26 = vrot.slane %v2199_v24, 4 }
 0x18a   : > { %v2207_v30 = vsel %vm2095_vm5, %v2206_v13, 0.0 }
 0x18b   : > { %v2208_v10 = vrot.slane %v2207_v30, 4  ;;  %v2201_v7 = vadd.f32 %v2200_v26, %v2199_v24 }
 0x18d   : > { %v2209_v19 = vadd.f32 %v2208_v10, %v2207_v30  ;;  %v2202_v40 = vrot.slane %v2201_v7, 2 }
 0x18f   : > { %v2210_v14 = vrot.slane %v2209_v19, 2  ;;  %v2203_v51 = vadd.f32 %v2202_v40, %v2201_v7 }
 0x191   : > { %v2211_v3 = vadd.f32 %v2210_v14, %v2209_v19  ;;  %v2204_v59 = vrot.slane %v2203_v51, 1 }
 0x193   : > { %v2212_v0 = vrot.slane %v2211_v3, 1  ;;  %v2205_v9 = vadd.f32 %v2204_v59, %v2203_v51 }
 0x195   : > { %v2213_v62 = vadd.f32 %v2212_v0, %v2211_v3  ;;  %v2214_v63 = vmul.f32 0.001953125, %v2205_v9 }
 0x197   : > { %v2215_v56 = vmul.f32 0.001953125, %v2213_v62  ;;  %v2216_v23 = vmul.f32 %v2214_v63, %v2214_v63 }
 0x199   : > { %v2217_v34 = vsub.f32 %v2215_v56, %v2216_v23 }
 0x19b   : > { %v2218_v12 = vmax.f32 %v2217_v34, 0.0 }
 0x19d   : > { %v2220_v37 = vadd.f32 1e-05, %v2218_v12 }
 0x19f   : > { %2940 = vrsqrt.f32 %v2220_v37 }
 0x1ac   : > { %v2941_v27 = vpop.eup %2940 }
 0x1ad   : > { %v2222_v43 = vmul.f32 %v2941_v27, %v2219_v15 }
 0x1af   : > { %2224 = vst.msk [vmem:[%s3928_s7] sm:$0x1] %vm2223_vm6, %v2222_v43  ;;  %v2226_v45 = vmul.f32 %v2222_v43, %v2214_v63 }
 0x1b1   : > { %v2227_v50 = vsub.f32 %v2225_v5, %v2226_v45 }
 0x1b3   : > { %2228 = vst.msk [vmem:[%s3929_s8] sm:$0x1] %vm2223_vm6, %v2227_v50 }
 0x1b4 PF: > { %s19_s29 = sadd.s32 1, %s2980_s29   ;;  %s3967_s27 = smov %s2972_s3 }
 0x1b5   : > { %p16_p13 = scmp.ge.s32.totalorder %s19_s29, 6   ;;  %s3968_s2 = smov %s2976_s28 }
 0x1b6   : > { %s3969_s3 = smov %s3972_s30  ;;  %s3970_s28 = smov %s3976_s9 }
 0x1b7   :  { %18 = sbr.rel (!%p16_p13) target bundleno = 3 (0x3), region = 106 }

// kernel: double_conv_forward.4
= control target key start
LH: loop header
LB: loop body
LE: loop exit
PB: predicated region body
PF: predicated region fallthrough
CT: control target
= control target key end

     0   :  { %s3298_s27 = smov 0   ;;  %s3300_s28 = smov 0   ;;  %s4462_s0 = inlined_call_operand.vmem [shape: f32[2,2,10,18,8], index: 0, kind: input, shape index: {}]   ;;  %s4463_s1 = inlined_call_operand.vmem [shape: f32[9,8,8], index: 1, kind: input, shape index: {}]   ;;  %s4464_s2 = inlined_call_operand.vmem [shape: f32[1,8], index: 2, kind: input, shape index: {}]   ;;  %s4465_s3 = inlined_call_operand.vmem [shape: f32[1,8], index: 3, kind: input, shape index: {}]   ;;  %s4466_s4 = inlined_call_operand.vmem [shape: f32[1,8], index: 4, kind: input, shape index: {}]   ;;  %s4467_s5 = inlined_call_operand.vmem [shape: f32[1,8], index: 5, kind: input, shape index: {}]   ;;  %s4468_s6 = inlined_call_operand.vmem [shape: f32[2,2,128,8], index: 6, kind: output, shape index: {0}]   ;;  %s4469_s7 = inlined_call_operand.vmem [shape: f32[1,8], index: 7, kind: output, shape index: {1}]   ;;  %s4470_s8 = inlined_call_operand.vmem [shape: f32[1,8], index: 8, kind: output, shape index: {2}]  }
   0x1   :  { %s3302_s29 = smov 0   ;;  %s3304_s30 = smov 0  }
   0x2   :  { %s3306_s9 = smov 0  }
   0x3 LB: > { %s28_s10 = sadd.s32 1, %s3242_s29  ;;  %s31_s11 = sadd.s32 1, %s3246_s30  ;;  %s3250_s9 = sphi %s3306_s9, %s19_s9   ;;  %s3246_s30 = sphi %s3304_s30, %s4545_s30   ;;  %s3242_s29 = sphi %s3302_s29, %s4544_s29   ;;  %s3238_s28 = sphi %s3300_s28, %s4543_s28   ;;  %s3234_s27 = sphi %s3298_s27, %s4542_s27  }
   0x4   : > { %p29_p0 = scmp.ge.s32.totalorder %s28_s10, 2  ;;  %p2616_p1 = scmp.ge.s32.totalorder %s3250_s9, 1 }
   0x5   : > { %p277_p2 = scmp.lt.s32.totalorder %s3250_s9, 5 }
   0x6   : > { %s4547_s10 = smov (%p29_p0, %s28_s10), 0  ;;  %s4549_s11 = smov (!%p29_p0, %s31_s11), %s3246_s30 }
   0x7   : > { %p278_p3 = pnand %p2616_p1, %p277_p2  ;;  %p33_p4 = scmp.ge.s32.totalorder %s4549_s11, 2 }
   0x9   : > { %s4551_s11 = smov (%p33_p4, %s4549_s11), 0  ;;  %281 = sbr.rel (%p278_p3) target bundleno = 465 (0x1d1), region = 44 }
   0xa   : > { %4472 = sst [smem:[#allocation4_spill]] %s4551_s11 }
   0xe   : > { %p319_p5 = scmp.lt.s32.totalorder %s3238_s28, 1  ;;  %p321_p6 = scmp.lt.s32.totalorder %s3234_s27, 1 }
   0xf   : > { %p337_p7 = scmp.eq.s32.totalorder %s3238_s28, 0  ;;  %p338_p8 = scmp.eq.s32.totalorder %s3234_s27, 0 }
  0x10   : > { %s320_s12 = scalar_select %p319_p5, %s3238_s28, 1 }
  0x11   : > { %s322_s13 = scalar_select %p321_p6, %s3234_s27, 1 }
  0x12   : > { %s3168_s14 = smul.u32 60, %s320_s12  ;;  %s2619_s15 = sshll.u32 %s320_s12, 5 }
  0x13   : > { %s3167_s16 = smul.u32 30, %s322_s13  ;;  %s2618_s17 = sshll.u32 %s322_s13, 4 }
  0x14   : > { %s334_s18 = sadd.s32 %s2619_s15, %s2618_s17  ;;  %p339_p9 = pnand %p338_p8, %p337_p7 }
  0x15   : > { %s325_s19 = sadd.s32 %s3168_s14, %s3167_s16  ;;  %s2620_s20 = sshll.u32 %s334_s18, 3 }
  0x16   : > { %s2617_s21 = sshll.u32 %s325_s19, 3  ;;  %s3341_s24 = scalar_lea.vmem %s4468_s6, %s2620_s20 }
  0x17   : > { %s3346_s11 = scalar_lea.vmem %s4462_s0, %s2617_s21  ;;  %p341_p10 = scmp.eq.s32.totalorder %s3238_s28, 1 }
  0x18   : > { %p342_p11 = scmp.eq.s32.totalorder %s3234_s27, 1  ;;  %346 = sbr.rel (%p339_p9) target bundleno = 31 (0x1f), region = 48 }
  0x1a   : > { %p3350_p12 = pnand %p342_p11, %p341_p10 }
  0x1d   : > { %vm347_vm0 = vcmask 64512   ;;  %v3252_v0 = vmov 0.0  }
  0x1e   : > { %348 = vst.msk [vmem:[#allocation2] sm:$0xff] %vm347_vm0, %v3252_v0  ;;  %349 = vst.msk [vmem:[#allocation3] sm:$0xff] %vm347_vm0, %v3252_v0 }
  0x1f PF: > { %v2624_v1 = vld [vmem:[%s4463_s1 + $0x8] sm:$0xff]  ;;  %v350_v2 = vld [vmem:[%s3346_s11] sm:$0xff]  ;;  %v484_v4 = vlaneseq  ;;  %s2623_s28 = sshll.u32 %s3234_s27, 3  ;;  %vm710_vm1 = vcmask 1046528   ;;  %vm753_vm2 = vcmask 64512   ;;  %v3393_v18 = vld [vmem:[%s4463_s1 + $0x10] sm:$0xff] }
  0x20   : > { %v351_v3 = vld [vmem:[%s3346_s11 + $0x8] sm:$0xff]  ;;  %3165 = vmatprep.subr.mxu1 %v2624_v1  ;;  %2931 = vmatprep.subr.mxu0 %v2624_v1  ;;  %v3363_v5 = vld [vmem:[%s4464_s2] ss:$0 sm:$0xff]  ;;  %v3370_v7 = vstv %s2623_s28  ;;  %v352_v14 = vld [vmem:[%s3346_s11 + $0x10] sm:$0x3] }
  0x21   : > { %v3368_v6 = vld [vmem:[%s4465_s3] ss:$0 sm:$0xff]  ;;  %3166 = vmatpush3.msra.mxu1 %v2624_v1  ;;  %2932 = vmatpush3.msra.mxu0 %v2624_v1  ;;  %v387_v9 = vmul.f32 %v3363_v5, %v350_v2  ;;  %v388_v10 = vmul.f32 %v3363_v5, %v351_v3  ;;  %v3375_v11 = vshrl.u32 %v484_v4, 7  ;;  %vm499_vm3 = vcmp.ge.s32.totalorder %v3370_v7, 1  ;;  %v363_v12 = vld [vmem:[%s3346_s11 + $0x68] sm:$0xff]  ;;  %v353_v24 = vld [vmem:[%s3346_s11 + $0x18] sm:$0xff] }
  0x22   : > { %v362_v8 = vld [vmem:[%s3346_s11 + $0x60] sm:$0xff]  ;;  %vm509_vm4 = vcmp.lt.s32.totalorder %v3370_v7, 17  ;;  %v400_v16 = vmul.f32 %v3363_v5, %v363_v12  ;;  %v493_v17 = vadd.s32 4, %v3370_v7  ;;  %v389_v22 = vmul.f32 %v3363_v5, %v352_v14  ;;  %v364_v23 = vld [vmem:[%s3346_s11 + $0x70] sm:$0x3]  ;;  %2983 = vmatprep.subr.mxu0 %v3393_v18  ;;  %v365_v48 = vld [vmem:[%s3346_s11 + $0x78] sm:$0xff] }
  0x23   : > { %v3382_v13 = vld [vmem:[%s4463_s1] sm:$0xff]  ;;  %v399_v15 = vmul.f32 %v3363_v5, %v362_v8  ;;  %v424_v19 = vadd.f32 %v3368_v6, %v387_v9  ;;  %v425_v20 = vadd.f32 %v3368_v6, %v388_v10  ;;  %vm3397_vm5 = vmand %vm499_vm3, %vm509_vm4  ;;  %vm529_vm6 = vcmp.ge.s32.totalorder %v3375_v11, 1  ;;  %v355_v58 = vld [vmem:[%s3346_s11 + $0x28] sm:$0x3] }
  0x24   : > { %2957 = vmatprep.subr.mxu1 %v3382_v13  ;;  %vm532_vm7 = vmand %vm3397_vm5, %vm529_vm6  ;;  %v437_v26 = vadd.f32 %v3368_v6, %v400_v16  ;;  %vm503_vm8 = vcmp.ge.s32.totalorder %v493_v17, 1  ;;  %vm513_vm9 = vcmp.lt.s32.totalorder %v493_v17, 17  ;;  %v426_v30 = vadd.f32 %v3368_v6, %v389_v22  ;;  %v354_v39 = vld [vmem:[%s3346_s11 + $0x20] sm:$0xff]  ;;  %v367_v63 = vld [vmem:[%s3346_s11 + $0x88] sm:$0x3] }
  0x25   : > { %v436_v25 = vadd.f32 %v3368_v6, %v399_v15  ;;  %v454_v27 = vmax.f32 %v424_v19, 0.0  ;;  %v455_v28 = vmax.f32 %v425_v20, 0.0  ;;  %vm3412_vm10 = vmand %vm503_vm8, %vm513_vm9  ;;  %v3418_v31 = vadd.s32 16, %v3375_v11  ;;  %v366_v49 = vld [vmem:[%s3346_s11 + $0x80] sm:$0xff]  ;;  %v356_v0 = vld [vmem:[%s3346_s11 + $0x30] sm:$0xff] }
  0x26   : > { %v467_v33 = vmax.f32 %v437_v26, 0.0  ;;  %vm544_vm11 = vmand %vm3412_vm10, %vm529_vm6  ;;  %v401_v34 = vmul.f32 %v3363_v5, %v364_v23  ;;  %v390_v35 = vmul.f32 %v3363_v5, %v353_v24  ;;  %v456_v38 = vmax.f32 %v426_v30, 0.0  ;;  %v3482_v1 = vld [vmem:[%s4463_s1 + $0x20] sm:$0xff]  ;;  %v357_v17 = vld [vmem:[%s3346_s11 + $0x38] sm:$0xff] }
  0x27   : > { %v466_v32 = vmax.f32 %v436_v25, 0.0  ;;  %v3426_v36 = vsel %vm532_vm7, %v454_v27, 0.0  ;;  %v3430_v37 = vsel %vm3397_vm5, %v455_v28, 0.0  ;;  %vm564_vm12 = vcmp.lt.s32.totalorder %v3418_v31, 17  ;;  %v368_v23 = vld [vmem:[%s3346_s11 + $0x90] sm:$0xff]  ;;  %v3520_v24 = vld [vmem:[%s4463_s1 + $0x18] sm:$0xff] }
  0x28   : > { %v711_v40 = vrot.slane %v3426_v36, 1  ;;  %v712_v41 = vrot.slane %v3430_v37, 1  ;;  %v3440_v43 = vsel %vm3412_vm10, %v467_v33, 0.0  ;;  %vm567_vm13 = vmand %vm3397_vm5, %vm564_vm12  ;;  %v438_v47 = vadd.f32 %v3368_v6, %v401_v34  ;;  %v370_v9 = vld [vmem:[%s3346_s11 + $0xa0] sm:$0x3] }
  0x29   : > { %v3436_v42 = vsel %vm544_vm11, %v466_v32, 0.0  ;;  %v732_v45 = vrot.slane %v3440_v43, 1  ;;  %v3448_v46 = vsel %vm567_vm13, %v456_v38, 0.0  ;;  %vm3459_vm14 = vmand %vm3412_vm10, %vm564_vm12  ;;  %v391_v53 = vmul.f32 %v3363_v5, %v354_v39 }
  0x2a   : > { %v731_v44 = vrot.slane %v3436_v42, 1  ;;  %v713_v50 = vsel %vm710_vm1, %v711_v40, %v712_v41  ;;  %v714_v51 = vrot.slane %v3448_v46, 1  ;;  %v468_v55 = vmax.f32 %v438_v47, 0.0 }
  0x2b   : > { %2933 = vmatprep.mubr.msk.f32.mxu0 %vm753_vm2, %v713_v50  ;;  %v427_v56 = vadd.f32 %v3368_v6, %v390_v35  ;;  %v490_v57 = vadd.s32 1, %v3370_v7  ;;  %v428_v60 = vadd.f32 %v3368_v6, %v391_v53  ;;  %v402_v61 = vmul.f32 %v3363_v5, %v365_v48 }
  0x2c   : > { %v3466_v54 = vsel %vm710_vm1, %v731_v44, %v732_v45  ;;  %v715_v59 = vsel %vm710_vm1, %v712_v41, %v714_v51  ;;  %v403_v62 = vmul.f32 %v3363_v5, %v366_v49  ;;  %v3487_v2 = vsel %vm3459_vm14, %v468_v55, 0.0  ;;  %v369_v44 = vld [vmem:[%s3346_s11 + $0x98] sm:$0xff]  ;;  %v358_v49 = vld [vmem:[%s3346_s11 + $0x40] sm:$0x3] }
  0x2d   : > { %2945 = vmatprep.mubr.msk.f32.mxu1 %vm753_vm2, %v3466_v54  ;;  %2934 = vmatmul.mubr.msk.f32.vlgmr.msra.gmra.mxu0 %vm753_vm2, %v715_v59  ;;  %v457_v3 = vmax.f32 %v427_v56, 0.0  ;;  %vm500_vm15 = vcmp.ge.s32.totalorder %v490_v57, 1  ;;  %vm510_vm0 = vcmp.lt.s32.totalorder %v490_v57, 17  ;;  %v734_v4 = vrot.slane %v3487_v2, 1 }
  0x2e   : > { %2984 = vmatpush3.msra.mxu0 %v3393_v18  ;;  %v458_v8 = vmax.f32 %v428_v60, 0.0  ;;  %vm3491_vm3 = vmand %vm500_vm15, %vm510_vm0  ;;  %v439_v10 = vadd.f32 %v3368_v6, %v402_v61  ;;  %v440_v12 = vadd.f32 %v3368_v6, %v403_v62  ;;  %v494_v14 = vadd.s32 5, %v3370_v7 }
  0x2f   : > { %vm535_vm4 = vmand %vm3491_vm3, %vm529_vm6  ;;  %v392_v15 = vmul.f32 %v3363_v5, %v355_v58  ;;  %v404_v16 = vmul.f32 %v3363_v5, %v367_v63  ;;  %v393_v18 = vmul.f32 %v3363_v5, %v356_v0  ;;  %3035 = vmatprep.subr.mxu0 %v3482_v1  ;;  %v3508_v19 = vsel %vm710_vm1, %v732_v45, %v734_v4  ;;  %v359_v63 = vld [vmem:[%s3346_s11 + $0x48] sm:$0xff] }
  0x30   : > { %v3510_v20 = vsel %vm535_vm4, %v457_v3, 0.0  ;;  %v3514_v21 = vsel %vm3491_vm3, %v458_v8, 0.0  ;;  %v469_v22 = vmax.f32 %v439_v10, 0.0  ;;  %2946 = vmatmul.mubr.msk.f32.vlgmr.msra.gmra.mxu1 %vm753_vm2, %v3508_v19  ;;  %v470_v27 = vmax.f32 %v440_v12, 0.0  ;;  %vm3532_vm8 = vmand %vm3491_vm3, %vm564_vm12  ;;  %v360_v10 = vld [vmem:[%s3346_s11 + $0x50] sm:$0xff] }
  0x31   : > { %v716_v25 = vrot.slane %v3510_v20, 1  ;;  %v717_v26 = vrot.slane %v3514_v21, 1  ;;  %vm504_vm5 = vcmp.ge.s32.totalorder %v494_v14, 1  ;;  %2958 = vmatpush3.msra.mxu1 %v3382_v13  ;;  %vm514_vm7 = vcmp.lt.s32.totalorder %v494_v14, 17 }
  0x32   : > { %v429_v28 = vadd.f32 %v3368_v6, %v392_v15  ;;  %v441_v30 = vadd.f32 %v3368_v6, %v404_v16  ;;  %v394_v32 = vmul.f32 %v3363_v5, %v357_v17  ;;  %vm524_vm9 = vmand %vm504_vm5, %vm514_vm7  ;;  %v430_v13 = vadd.f32 %v3368_v6, %v393_v18  ;;  %3009 = vmatprep.subr.mxu1 %v3520_v24  ;;  %v371_v16 = vld [vmem:[%s3346_s11 + $0xa8] sm:$0xff] }
  0x33   : > { %v3539_v33 = vsel %vm710_vm1, %v716_v25, %v717_v26  ;;  %v491_v34 = vadd.s32 2, %v3370_v7  ;;  %v405_v35 = vmul.f32 %v3363_v5, %v368_v23  ;;  %vm547_vm10 = vmand %vm524_vm9, %vm529_vm6  ;;  %v3549_v38 = vsel %vm524_vm9, %v470_v27, 0.0 }
  0x34   : > { %2936 = vmatprep.mubr.msk.f32.mxu0 %vm753_vm2, %v3539_v33  ;;  %v459_v39 = vmax.f32 %v429_v28, 0.0  ;;  %v471_v40 = vmax.f32 %v441_v30, 0.0  ;;  %v431_v41 = vadd.f32 %v3368_v6, %v394_v32  ;;  %v3553_v45 = vsel %vm547_vm10, %v469_v22, 0.0  ;;  %vm582_vm11 = vmand %vm524_vm9, %vm564_vm12 }
  0x35   : > { %v737_v47 = vrot.slane %v3549_v38, 1  ;;  %v460_v48 = vmax.f32 %v430_v13, 0.0  ;;  %vm501_vm13 = vcmp.ge.s32.totalorder %v491_v34, 1  ;;  %v736_v50 = vrot.slane %v3553_v45, 1 }
  0x36   : > { %v3562_v51 = vsel %vm3532_vm8, %v459_v39, 0.0  ;;  %v3564_v52 = vsel %vm582_vm11, %v471_v40, 0.0  ;;  %v461_v53 = vmax.f32 %v431_v41, 0.0  ;;  %vm511_vm14 = vcmp.lt.s32.totalorder %v491_v34, 17 }
  0x37   : > { %v719_v55 = vrot.slane %v3562_v51, 1  ;;  %v739_v56 = vrot.slane %v3564_v52, 1  ;;  %v406_v57 = vmul.f32 %v3363_v5, %v369_v44  ;;  %v3570_v58 = vsel %vm710_vm1, %v736_v50, %v737_v47  ;;  %vm3572_vm15 = vmand %vm501_vm13, %vm511_vm14  ;;  %v372_v44 = vld [vmem:[%s3346_s11 + $0xb0] sm:$0xff]  ;;  %v361_v50 = vld [vmem:[%s3346_s11 + $0x58] sm:$0x3] }
  0x38   : > { %v442_v60 = vadd.f32 %v3368_v6, %v405_v35  ;;  %v495_v61 = vadd.s32 6, %v3370_v7  ;;  %v395_v62 = vmul.f32 %v3363_v5, %v358_v49  ;;  %2948 = vmatprep.mubr.msk.f32.mxu1 %vm753_vm2, %v3570_v58  ;;  %vm538_vm0 = vmand %vm3572_vm15, %vm529_vm6  ;;  %v3594_v4 = vsel %vm3572_vm15, %v461_v53, 0.0 }
  0x39   : > { %v3583_v0 = vsel %vm710_vm1, %v717_v26, %v719_v55  ;;  %v3586_v3 = vsel %vm710_vm1, %v737_v47, %v739_v56  ;;  %v443_v8 = vadd.f32 %v3368_v6, %v406_v57  ;;  %v3603_v12 = vsel %vm538_vm0, %v460_v48, 0.0  ;;  %vm3613_vm5 = vmand %vm3572_vm15, %vm564_vm12 }
  0x3a   : > { %2937 = vmatmul.mubr.msk.f32.gmra.mxu0 %vm753_vm2, %v3583_v0  ;;  %2949 = vmatmul.mubr.msk.f32.gmra.mxu1 %vm753_vm2, %v3586_v3  ;;  %v722_v14 = vrot.slane %v3594_v4, 1  ;;  %v472_v15 = vmax.f32 %v442_v60, 0.0  ;;  %vm505_vm3 = vcmp.ge.s32.totalorder %v495_v61, 1  ;;  %v721_v17 = vrot.slane %v3603_v12, 1 }
  0x3b   : > { %v473_v18 = vmax.f32 %v443_v8, 0.0  ;;  %vm515_vm4 = vcmp.lt.s32.totalorder %v495_v61, 17  ;;  %v432_v22 = vadd.f32 %v3368_v6, %v395_v62  ;;  %v407_v26 = vmul.f32 %v3363_v5, %v370_v9 }
  0x3c   : > { %vm3617_vm7 = vmand %vm505_vm3, %vm515_vm4  ;;  %v396_v27 = vmul.f32 %v3363_v5, %v359_v63  ;;  %v397_v28 = vmul.f32 %v3363_v5, %v360_v10  ;;  %v492_v29 = vadd.s32 3, %v3370_v7  ;;  %v3626_v30 = vsel %vm710_vm1, %v721_v17, %v722_v14 }
  0x3d   : > { %vm550_vm8 = vmand %vm3617_vm7, %vm529_vm6  ;;  %v3634_v32 = vsel %vm3617_vm7, %v473_v18, 0.0  ;;  %v462_v13 = vmax.f32 %v432_v22, 0.0  ;;  %v408_v34 = vmul.f32 %v3363_v5, %v371_v16  ;;  %2939 = vmatprep.mubr.msk.f32.mxu0 %vm753_vm2, %v3626_v30  ;;  %v444_v40 = vadd.f32 %v3368_v6, %v407_v26  ;;  %v373_v18 = vld [vmem:[%s3346_s11 + $0xb8] sm:$0x3] }
  0x3e   : > { %v3639_v35 = vsel %vm550_vm8, %v472_v15, 0.0  ;;  %v742_v39 = vrot.slane %v3634_v32, 1  ;;  %v433_v41 = vadd.f32 %v3368_v6, %v396_v27  ;;  %vm585_vm9 = vmand %vm3617_vm7, %vm564_vm12  ;;  %v434_v49 = vadd.f32 %v3368_v6, %v397_v28 }
  0x3f   : > { %v741_v47 = vrot.slane %v3639_v35, 1  ;;  %v3648_v48 = vsel %vm3613_vm5, %v462_v13, 0.0  ;;  %vm502_vm10 = vcmp.ge.s32.totalorder %v492_v29, 1  ;;  %v474_v55 = vmax.f32 %v444_v40, 0.0 }
  0x40   : > { %v724_v53 = vrot.slane %v3648_v48, 1  ;;  %v463_v56 = vmax.f32 %v433_v41, 0.0  ;;  %vm512_vm11 = vcmp.lt.s32.totalorder %v492_v29, 17  ;;  %v464_v59 = vmax.f32 %v434_v49, 0.0 }
  0x41   : > { %v3658_v57 = vsel %vm710_vm1, %v741_v47, %v742_v39  ;;  %vm3660_vm13 = vmand %vm502_vm10, %vm512_vm11  ;;  %v409_v61 = vmul.f32 %v3363_v5, %v372_v44  ;;  %v445_v62 = vadd.f32 %v3368_v6, %v408_v34  ;;  %v3671_v8 = vsel %vm585_vm9, %v474_v55, 0.0 }
  0x42   : > { %2951 = vmatprep.mubr.msk.f32.mxu1 %vm753_vm2, %v3658_v57  ;;  %v3669_v63 = vsel %vm710_vm1, %v722_v14, %v724_v53  ;;  %vm541_vm14 = vmand %vm3660_vm13, %vm529_vm6  ;;  %v496_v9 = vadd.s32 7, %v3370_v7  ;;  %v398_v10 = vmul.f32 %v3363_v5, %v361_v50  ;;  %v744_v15 = vrot.slane %v3671_v8, 1 }
  0x43   : > { %2940 = vmatmul.mubr.msk.f32.gmra.mxu0 %vm753_vm2, %v3669_v63  ;;  %v3682_v16 = vsel %vm541_vm14, %v463_v56, 0.0  ;;  %v3686_v14 = vsel %vm3660_vm13, %v464_v59, 0.0  ;;  %v446_v17 = vadd.f32 %v3368_v6, %v409_v61  ;;  %v475_v25 = vmax.f32 %v445_v62, 0.0  ;;  %vm3700_vm3 = vmand %vm3660_vm13, %vm564_vm12 }
  0x44   : > { %v726_v22 = vrot.slane %v3682_v16, 1  ;;  %v727_v23 = vrot.slane %v3686_v14, 1  ;;  %vm506_vm15 = vcmp.ge.s32.totalorder %v496_v9, 1  ;;  %v3693_v26 = vsel %vm710_vm1, %v742_v39, %v744_v15 }
  0x45   : > { %v476_v27 = vmax.f32 %v446_v17, 0.0  ;;  %vm516_vm0 = vcmp.lt.s32.totalorder %v496_v9, 17  ;;  %v435_v28 = vadd.f32 %v3368_v6, %v398_v10  ;;  %2952 = vmatmul.mubr.msk.f32.gmra.mxu1 %vm753_vm2, %v3693_v26  ;;  %v410_v34 = vmul.f32 %v3363_v5, %v373_v18 }
  0x46   : > { %v3707_v13 = vsel %vm710_vm1, %v726_v22, %v727_v23  ;;  %vm526_vm4 = vmand %vm506_vm15, %vm516_vm0  ;;  %v1109_v41 = vrot.slane %v3426_v36, 2  ;;  %v1110_v44 = vrot.slane %v3430_v37, 2  ;;  %vm1108_vm7 = vcmask 1045504  }
  0x47   : > { %2942 = vmatprep.mubr.msk.f32.mxu0 %vm753_vm2, %v3707_v13  ;;  %vm553_vm5 = vmand %vm526_vm4, %vm529_vm6  ;;  %v3714_v39 = vsel %vm526_vm4, %v476_v27, 0.0  ;;  %v465_v40 = vmax.f32 %v435_v28, 0.0  ;;  %v447_v50 = vadd.f32 %v3368_v6, %v410_v34  ;;  %v1112_v56 = vrot.slane %v3448_v46, 2 }
  0x48   : > { %v3718_v47 = vsel %vm553_vm5, %v475_v25, 0.0  ;;  %v747_v49 = vrot.slane %v3714_v39, 1  ;;  %vm588_vm8 = vmand %vm526_vm4, %vm564_vm12  ;;  %v1111_v62 = vsel %vm1108_vm7, %v1109_v41, %v1110_v44  ;;  %v1114_v9 = vrot.slane %v3510_v20, 2 }
  0x49   : > { %v746_v53 = vrot.slane %v3718_v47, 1  ;;  %v666_v55 = vsel %vm3700_vm3, %v465_v40, 0.0  ;;  %v477_v60 = vmax.f32 %v447_v50, 0.0  ;;  %v1115_v10 = vrot.slane %v3514_v21, 2  ;;  %v374_v40 = vld [vmem:[%s3346_s11 + $0xc0] sm:$0xff] }
  0x4a   : > { %v729_v59 = vrot.slane %v666_v55, 1  ;;  %v1117_v18 = vrot.slane %v3562_v51, 2  ;;  %v1119_v22 = vrot.slane %v3603_v12, 2  ;;  %v1120_v25 = vrot.slane %v3594_v4, 2 }
  0x4b   : > { %v3729_v61 = vsel %vm710_vm1, %v746_v53, %v747_v49  ;;  %v3739_v17 = vsel %vm588_vm8, %v477_v60, 0.0  ;;  %v1122_v27 = vrot.slane %v3648_v48, 2  ;;  %v1124_v28 = vrot.slane %v3682_v16, 2  ;;  %v3764_v48 = vld [vmem:[%s4463_s1 + $0x30] sm:$0xff]  ;;  %v377_v60 = vld [vmem:[%s3346_s11 + $0xd8] sm:$0xff] }
  0x4c   : > { %2954 = vmatprep.mubr.msk.f32.mxu1 %vm753_vm2, %v3729_v61  ;;  %v3737_v15 = vsel %vm710_vm1, %v727_v23, %v729_v59  ;;  %v749_v46 = vrot.slane %v3739_v17, 1  ;;  %v1113_v23 = vsel %vm1108_vm7, %v1110_v44, %v1112_v56  ;;  %v1125_v29 = vrot.slane %v3686_v14, 2  ;;  %v375_v44 = vld [vmem:[%s3346_s11 + $0xc8] sm:$0xff]  ;;  %v376_v53 = vld [vmem:[%s3346_s11 + $0xd0] sm:$0x3] }
  0x4d   : > { %2943 = vmatmul.mubr.msk.f32.gmra.mxu0 %vm753_vm2, %v3737_v15  ;;  %v3756_v51 = vsel %vm1108_vm7, %v1114_v9, %v1115_v10  ;;  %v1127_v41 = vrot.slane %v666_v55, 2  ;;  %v3774_v50 = vsel %vm1108_vm7, %v1119_v22, %v1120_v25  ;;  %v3781_v55 = vsel %vm1108_vm7, %v1120_v25, %v1122_v27  ;;  %v379_v27 = vld [vmem:[%s3346_s11 + $0xe8] sm:$0x3] }
  0x4e   : > { %2985 = vmatprep.mubr.msk.f32.mxu0 %vm753_vm2, %v1111_v62  ;;  %v3753_v34 = vsel %vm710_vm1, %v747_v49, %v749_v46  ;;  %v3771_v49 = vsel %vm1108_vm7, %v1115_v10, %v1117_v18  ;;  %v1129_v56 = vrot.slane %v3436_v42, 2  ;;  %v411_v59 = vmul.f32 %v3363_v5, %v374_v40  ;;  %v378_v18 = vld [vmem:[%s3346_s11 + $0xe0] sm:$0xff] }
  0x4f   : > { %2955 = vmatmul.mubr.msk.f32.gmra.mxu1 %vm753_vm2, %v3753_v34  ;;  %v1130_v62 = vrot.slane %v3440_v43, 2  ;;  %v1132_v9 = vrot.slane %v3487_v2, 2  ;;  %v412_v10 = vmul.f32 %v3363_v5, %v375_v44  ;;  %v497_v46 = vadd.s32 8, %v3370_v7 }
  0x50   : > { %2959 = vmatprep.mubr.msk.f32.mxu1 %vm753_vm2, %v3426_v36  ;;  %v3784_v36 = vsel %vm1108_vm7, %v1124_v28, %v1125_v29  ;;  %v3803_v22 = vsel %vm1108_vm7, %v1125_v29, %v1127_v41  ;;  %v448_v25 = vadd.f32 %v3368_v6, %v411_v59  ;;  %v498_v41 = vadd.s32 9, %v3370_v7 }
  0x51   : > { %2986 = vmatmul.mubr.msk.f32.vlgmr.msra.gmra.mxu0 %vm753_vm2, %v1113_v23  ;;  %v413_v23 = vmul.f32 %v3363_v5, %v376_v53  ;;  %v449_v28 = vadd.f32 %v3368_v6, %v412_v10  ;;  %vm507_vm9 = vcmp.ge.s32.totalorder %v497_v46, 1  ;;  %vm517_vm10 = vcmp.lt.s32.totalorder %v497_v46, 17 }
  0x52   : > { %3036 = vmatpush3.msra.mxu0 %v3482_v1  ;;  %2988 = vmatprep.mubr.msk.f32.mxu0 %vm753_vm2, %v3756_v51  ;;  %v3794_v1 = vld [vmem:[%s4463_s1 + $0x28] sm:$0xff]  ;;  %v478_v29 = vmax.f32 %v448_v25, 0.0  ;;  %vm3817_vm11 = vmand %vm507_vm9, %vm517_vm10  ;;  %v415_v44 = vmul.f32 %v3363_v5, %v378_v18  ;;  %v1135_v53 = vrot.slane %v3549_v38, 2  ;;  %v416_v10 = vmul.f32 %v3363_v5, %v379_v27 }
  0x53   : > { %3087 = vmatprep.subr.mxu0 %v3764_v48  ;;  %2960 = vmatmul.mubr.msk.f32.vlgmr.msra.gmra.mxu1 %vm753_vm2, %v3430_v37  ;;  %v414_v37 = vmul.f32 %v3363_v5, %v377_v60  ;;  %v479_v59 = vmax.f32 %v449_v28, 0.0  ;;  %vm556_vm13 = vmand %vm3817_vm11, %vm529_vm6  ;;  %vm508_vm15 = vcmp.ge.s32.totalorder %v498_v41, 1  ;;  %vm518_vm0 = vcmp.lt.s32.totalorder %v498_v41, 17 }
  0x54   : > { %3010 = vmatpush3.msra.mxu1 %v3520_v24  ;;  %2962 = vmatprep.mubr.msk.f32.mxu1 %vm753_vm2, %v3510_v20  ;;  %v450_v24 = vadd.f32 %v3368_v6, %v413_v23  ;;  %vm591_vm14 = vmand %vm3817_vm11, %vm564_vm12  ;;  %v3839_v7 = vsel %vm556_vm13, %v478_v29, 0.0  ;;  %v452_v40 = vadd.f32 %v3368_v6, %v415_v44  ;;  %v3878_v44 = vsel %vm1108_vm7, %v1129_v56, %v1130_v62 }
  0x55   : > { %2989 = vmatmul.mubr.msk.f32.gmra.mxu0 %vm753_vm2, %v3771_v49  ;;  %3061 = vmatprep.subr.mxu1 %v3794_v1  ;;  %v451_v60 = vadd.f32 %v3368_v6, %v414_v37  ;;  %v3845_v18 = vsel %vm3817_vm11, %v479_v59, 0.0  ;;  %v1514_v5 = vrot.slane %v3839_v7, 1  ;;  %v1686_v25 = vrot.slane %v3839_v7, 2  ;;  %vm3849_vm3 = vmand %vm508_vm15, %vm518_vm0 }
  0x56   : > { %2991 = vmatprep.mubr.msk.f32.mxu0 %vm753_vm2, %v3774_v50  ;;  %v480_v46 = vmax.f32 %v450_v24, 0.0  ;;  %v1515_v28 = vrot.slane %v3845_v18, 1  ;;  %v1687_v29 = vrot.slane %v3845_v18, 2  ;;  %vm559_vm4 = vmand %vm3849_vm3, %vm529_vm6  ;;  %v482_v56 = vmax.f32 %v452_v40, 0.0 }
  0x57   : > { %2963 = vmatmul.mubr.msk.f32.gmra.mxu1 %vm753_vm2, %v3514_v21  ;;  %v481_v23 = vmax.f32 %v451_v60, 0.0  ;;  %vm3868_vm5 = vmand %vm3849_vm3, %vm564_vm12  ;;  %v453_v60 = vadd.f32 %v3368_v6, %v416_v10 }
  0x58   : > { %2965 = vmatprep.mubr.msk.f32.mxu1 %vm753_vm2, %v3603_v12  ;;  %v681_v37 = vsel %vm591_vm14, %v480_v46, 0.0  ;;  %v3881_v46 = vsel %vm1108_vm7, %v1130_v62, %v1132_v9  ;;  %v3884_v31 = vsel %vm710_vm1, %v1514_v5, %v1515_v28  ;;  %v3887_v2 = vsel %vm1108_vm7, %v1686_v25, %v1687_v29 }
  0x59   : > { %2992 = vmatmul.mubr.msk.f32.gmra.mxu0 %vm753_vm2, %v3781_v55  ;;  %v1517_v24 = vrot.slane %v681_v37, 1  ;;  %v3872_v59 = vsel %vm559_vm4, %v481_v23, 0.0  ;;  %v1689_v11 = vrot.slane %v681_v37, 2  ;;  %v483_v23 = vmax.f32 %v453_v60, 0.0 }
  0x5a   : > { %2994 = vmatprep.mubr.msk.f32.mxu0 %vm753_vm2, %v3784_v36  ;;  %v1137_v62 = vrot.slane %v3564_v52, 2  ;;  %v1139_v9 = vrot.slane %v3639_v35, 2  ;;  %v2028_v5 = vrot.slane %v3872_v59, 1  ;;  %v2200_v25 = vrot.slane %v3872_v59, 2 }
  0x5b   : > { %2966 = vmatmul.mubr.msk.f32.gmra.mxu1 %vm753_vm2, %v3594_v4  ;;  %v3892_v6 = vsel %vm710_vm1, %v1515_v28, %v1517_v24  ;;  %v3895_v10 = vsel %vm1108_vm7, %v1687_v29, %v1689_v11  ;;  %v4501_v28 = vrot.slane %v3553_v45, 2  ;;  %v1140_v29 = vrot.slane %v3634_v32, 2 }
  0x5c   : > { %2968 = vmatprep.mubr.msk.f32.mxu1 %vm753_vm2, %v3682_v16  ;;  %4500 = vst [vmem:[#allocation5_spill] sm:$0xff] %v3895_v10  ;;  %v3913_v40 = vsel %vm3849_vm3, %v482_v56, 0.0  ;;  %v684_v52 = vsel %vm3868_vm5, %v483_v23, 0.0 }
  0x5d   : > { %2995 = vmatmul.mubr.msk.f32.gmra.mxu0 %vm753_vm2, %v3803_v22  ;;  %v3908_v37 = vsel %vm1108_vm7, %v4501_v28, %v1135_v53  ;;  %v2029_v24 = vrot.slane %v3913_v40, 1  ;;  %v2201_v11 = vrot.slane %v3913_v40, 2  ;;  %v2031_v60 = vrot.slane %v684_v52, 1 }
  0x5e   : > { %2997 = vmatprep.mubr.msk.f32.mxu0 %vm753_vm2, %v3878_v44  ;;  %v2203_v10 = vrot.slane %v684_v52, 2  ;;  %v3940_v28 = vsel %vm1108_vm7, %v1135_v53, %v1137_v62  ;;  %v1142_v52 = vrot.slane %v3671_v8, 2  ;;  %v1147_v53 = vrot.slane %v3739_v17, 2  ;;  %v2759_v17 = vld [vmem:[%s4463_s1 + $0x40] sm:$0xff] }
  0x5f   : > { %2969 = vmatmul.mubr.msk.f32.gmra.mxu1 %vm753_vm2, %v3686_v14  ;;  %v3926_v27 = vsel %vm710_vm1, %v2028_v5, %v2029_v24  ;;  %v3929_v41 = vsel %vm1108_vm7, %v2200_v25, %v2201_v11  ;;  %v3932_v56 = vsel %vm710_vm1, %v2029_v24, %v2031_v60  ;;  %v3946_v5 = vsel %vm1108_vm7, %v1139_v9, %v1140_v29 }
  0x60   : > { %2971 = vmatprep.mubr.msk.f32.mxu1 %vm753_vm2, %v3436_v42  ;;  %v3935_v23 = vsel %vm1108_vm7, %v2201_v11, %v2203_v10  ;;  %v1144_v25 = vrot.slane %v3718_v47, 2  ;;  %v1145_v24 = vrot.slane %v3714_v39, 2  ;;  %v3957_v8 = vsel %vm1108_vm7, %v1140_v29, %v1142_v52 }
  0x61   : > { %2998 = vmatmul.mubr.msk.f32.gmra.mxu0 %vm753_vm2, %v3881_v46 }
  0x62   : > { %3000 = vmatprep.mubr.msk.f32.mxu0 %vm753_vm2, %v3908_v37  ;;  %v3963_v10 = vsel %vm1108_vm7, %v1144_v25, %v1145_v24  ;;  %v3972_v62 = vsel %vm1108_vm7, %v1145_v24, %v1147_v53 }
  0x63   : > { %2972 = vmatmul.mubr.msk.f32.gmra.mxu1 %vm753_vm2, %v3440_v43 }
  0x64   : > { %2974 = vmatprep.mubr.msk.f32.mxu1 %vm753_vm2, %v3553_v45 }
  0x65   : > { %3001 = vmatmul.mubr.msk.f32.gmra.mxu0 %vm753_vm2, %v3940_v28 }
  0x66   : > { %3003 = vmatprep.mubr.msk.f32.mxu0 %vm753_vm2, %v3946_v5 }
  0x67   : > { %2975 = vmatmul.mubr.msk.f32.gmra.mxu1 %vm753_vm2, %v3549_v38 }
  0x68   : > { %2977 = vmatprep.mubr.msk.f32.mxu1 %vm753_vm2, %v3639_v35 }
  0x69   : > { %3004 = vmatmul.mubr.msk.f32.gmra.mxu0 %vm753_vm2, %v3957_v8 }
  0x6a   : > { %3006 = vmatprep.mubr.msk.f32.mxu0 %vm753_vm2, %v3963_v10 }
  0x6b   : > { %2978 = vmatmul.mubr.msk.f32.gmra.mxu1 %vm753_vm2, %v3634_v32 }
  0x6c   : > { %2980 = vmatprep.mubr.msk.f32.mxu1 %vm753_vm2, %v3718_v47 }
  0x6d   : > { %3007 = vmatmul.mubr.msk.f32.gmra.mxu0 %vm753_vm2, %v3972_v62 }
  0x6e   : > { %3037 = vmatprep.mubr.msk.f32.mxu0 %vm753_vm2, %v3539_v33  ;;  %v2742_v33 = vld [vmem:[%s4463_s1 + $0x38] sm:$0xff] }
  0x6f   : > { %2981 = vmatmul.mubr.msk.f32.gmra.mxu1 %vm753_vm2, %v3714_v39 }
  0x70   : > { %3011 = vmatprep.mubr.msk.f32.mxu1 %vm753_vm2, %v3510_v20 }
  0x71   : > { %3038 = vmatmul.mubr.msk.f32.vlgmr.msra.gmra.mxu0 %vm753_vm2, %v3583_v0 }
  0x72   : > { %3088 = vmatpush3.msra.mxu0 %v3764_v48  ;;  %3040 = vmatprep.mubr.msk.f32.mxu0 %vm753_vm2, %v3626_v30 }
  0x73   : > { %3012 = vmatmul.mubr.msk.f32.vlgmr.msra.gmra.mxu1 %vm753_vm2, %v3514_v21  ;;  %3139 = vmatprep.subr.mxu0 %v2759_v17 }
  0x74   : > { %3062 = vmatpush3.msra.mxu1 %v3794_v1  ;;  %3014 = vmatprep.mubr.msk.f32.mxu1 %vm753_vm2, %v3603_v12 }
  0x75   : > { %3041 = vmatmul.mubr.msk.f32.gmra.mxu0 %vm753_vm2, %v3669_v63  ;;  %3113 = vmatprep.subr.mxu1 %v2742_v33 }
  0x76   : > { %3043 = vmatprep.mubr.msk.f32.mxu0 %vm753_vm2, %v3707_v13 }
  0x77   : > { %3015 = vmatmul.mubr.msk.f32.gmra.mxu1 %vm753_vm2, %v3594_v4 }
  0x78   : > { %3017 = vmatprep.mubr.msk.f32.mxu1 %vm753_vm2, %v3682_v16 }
  0x79   : > { %3044 = vmatmul.mubr.msk.f32.gmra.mxu0 %vm753_vm2, %v3737_v15 }
  0x7a   : > { %3046 = vmatprep.mubr.msk.f32.mxu0 %vm753_vm2, %v3466_v54 }
  0x7b   : > { %3018 = vmatmul.mubr.msk.f32.gmra.mxu1 %vm753_vm2, %v3686_v14 }
  0x7c   : > { %3020 = vmatprep.mubr.msk.f32.mxu1 %vm753_vm2, %v3436_v42 }
  0x7d   : > { %3047 = vmatmul.mubr.msk.f32.gmra.mxu0 %vm753_vm2, %v3508_v19 }
  0x7e   : > { %3049 = vmatprep.mubr.msk.f32.mxu0 %vm753_vm2, %v3570_v58 }
  0x7f   : > { %3021 = vmatmul.mubr.msk.f32.gmra.mxu1 %vm753_vm2, %v3440_v43 }
  0x80   : > { %3023 = vmatprep.mubr.msk.f32.mxu1 %vm753_vm2, %v3553_v45 }
  0x81   : > { %3050 = vmatmul.mubr.msk.f32.gmra.mxu0 %vm753_vm2, %v3586_v3 }
  0x82   : > { %3052 = vmatprep.mubr.msk.f32.mxu0 %vm753_vm2, %v3658_v57 }
  0x83   : > { %3024 = vmatmul.mubr.msk.f32.gmra.mxu1 %vm753_vm2, %v3549_v38 }
  0x84   : > { %3026 = vmatprep.mubr.msk.f32.mxu1 %vm753_vm2, %v3639_v35 }
  0x85   : > { %3053 = vmatmul.mubr.msk.f32.gmra.mxu0 %vm753_vm2, %v3693_v26 }
  0x86   : > { %3055 = vmatprep.mubr.msk.f32.mxu0 %vm753_vm2, %v3729_v61 }
  0x87   : > { %3027 = vmatmul.mubr.msk.f32.gmra.mxu1 %vm753_vm2, %v3634_v32 }
  0x88   : > { %3029 = vmatprep.mubr.msk.f32.mxu1 %vm753_vm2, %v3718_v47 }
  0x89   : > { %3056 = vmatmul.mubr.msk.f32.gmra.mxu0 %vm753_vm2, %v3753_v34 }
  0x8a   : > { %3058 = vmatprep.mubr.msk.f32.mxu0 %vm753_vm2, %v3884_v31 }
  0x8b   : > { %3030 = vmatmul.mubr.msk.f32.gmra.mxu1 %vm753_vm2, %v3714_v39 }
  0x8c   : > { %3032 = vmatprep.mubr.msk.f32.mxu1 %vm753_vm2, %v3839_v7 }
  0x8d   : > { %3059 = vmatmul.mubr.msk.f32.gmra.mxu0 %vm753_vm2, %v3892_v6 }
  0x8e   : > { %3089 = vmatprep.mubr.msk.f32.mxu0 %vm753_vm2, %v3603_v12 }
  0x8f   : > { %3033 = vmatmul.mubr.msk.f32.gmra.mxu1 %vm753_vm2, %v3845_v18 }
  0x90   : > { %3063 = vmatprep.mubr.msk.f32.mxu1 %vm753_vm2, %v3756_v51 }
  0x91   : > { %3090 = vmatmul.mubr.msk.f32.vlgmr.msra.gmra.mxu0 %vm753_vm2, %v3594_v4 }
  0x92   : > { %3140 = vmatpush3.msra.mxu0 %v2759_v17  ;;  %3092 = vmatprep.mubr.msk.f32.mxu0 %vm753_vm2, %v3682_v16 }
  0x93   : > { %3064 = vmatmul.mubr.msk.f32.vlgmr.msra.gmra.mxu1 %vm753_vm2, %v3771_v49 }
  0x94   : > { %3114 = vmatpush3.msra.mxu1 %v2742_v33  ;;  %3066 = vmatprep.mubr.msk.f32.mxu1 %vm753_vm2, %v3774_v50 }
  0x95   : > { %3093 = vmatmul.mubr.msk.f32.gmra.mxu0 %vm753_vm2, %v3686_v14 }
  0x96   : > { %3095 = vmatprep.mubr.msk.f32.mxu0 %vm753_vm2, %v3436_v42  ;;  %v4502_v42 = vld [vmem:[#allocation5_spill] sm:$0xff] }
  0x97   : > { %3067 = vmatmul.mubr.msk.f32.gmra.mxu1 %vm753_vm2, %v3781_v55 }
  0x98   : > { %3069 = vmatprep.mubr.msk.f32.mxu1 %vm753_vm2, %v3784_v36 }
  0x99   : > { %3096 = vmatmul.mubr.msk.f32.gmra.mxu0 %vm753_vm2, %v3440_v43 }
  0x9a   : > { %3098 = vmatprep.mubr.msk.f32.mxu0 %vm753_vm2, %v3553_v45 }
  0x9b   : > { %3070 = vmatmul.mubr.msk.f32.gmra.mxu1 %vm753_vm2, %v3803_v22 }
  0x9c   : > { %3072 = vmatprep.mubr.msk.f32.mxu1 %vm753_vm2, %v3878_v44 }
  0x9d   : > { %3099 = vmatmul.mubr.msk.f32.gmra.mxu0 %vm753_vm2, %v3549_v38 }
  0x9e   : > { %3101 = vmatprep.mubr.msk.f32.mxu0 %vm753_vm2, %v3639_v35 }
  0x9f   : > { %3073 = vmatmul.mubr.msk.f32.gmra.mxu1 %vm753_vm2, %v3881_v46 }
  0xa0   : > { %3075 = vmatprep.mubr.msk.f32.mxu1 %vm753_vm2, %v3908_v37 }
  0xa1   : > { %3102 = vmatmul.mubr.msk.f32.gmra.mxu0 %vm753_vm2, %v3634_v32 }
  0xa2   : > { %3104 = vmatprep.mubr.msk.f32.mxu0 %vm753_vm2, %v3718_v47 }
  0xa3   : > { %3076 = vmatmul.mubr.msk.f32.gmra.mxu1 %vm753_vm2, %v3940_v28 }
  0xa4   : > { %3078 = vmatprep.mubr.msk.f32.mxu1 %vm753_vm2, %v3946_v5 }
  0xa5   : > { %3105 = vmatmul.mubr.msk.f32.gmra.mxu0 %vm753_vm2, %v3714_v39 }
  0xa6   : > { %3107 = vmatprep.mubr.msk.f32.mxu0 %vm753_vm2, %v3839_v7 }
  0xa7   : > { %3079 = vmatmul.mubr.msk.f32.gmra.mxu1 %vm753_vm2, %v3957_v8 }
  0xa8   : > { %3081 = vmatprep.mubr.msk.f32.mxu1 %vm753_vm2, %v3963_v10 }
  0xa9   : > { %3108 = vmatmul.mubr.msk.f32.gmra.mxu0 %vm753_vm2, %v3845_v18 }
  0xaa   : > { %3110 = vmatprep.mubr.msk.f32.mxu0 %vm753_vm2, %v3872_v59 }
  0xab   : > { %3082 = vmatmul.mubr.msk.f32.gmra.mxu1 %vm753_vm2, %v3972_v62 }
  0xac   : > { %3084 = vmatprep.mubr.msk.f32.mxu1 %vm753_vm2, %v3887_v2 }
  0xad   : > { %3111 = vmatmul.mubr.msk.f32.gmra.mxu0 %vm753_vm2, %v3913_v40 }
  0xae   : > { %3141 = vmatprep.mubr.msk.f32.mxu0 %vm753_vm2, %v3774_v50 }
  0xaf   : > { %3085 = vmatmul.mubr.msk.f32.gmra.mxu1 %vm753_vm2, %v4502_v42 }
  0xb0   : > { %3115 = vmatprep.mubr.msk.f32.mxu1 %vm753_vm2, %v3626_v30 }
  0xb1   : > { %3142 = vmatmul.mubr.msk.f32.vlgmr.msra.gmra.mxu0 %vm753_vm2, %v3781_v55 }
  0xb2   : > { %3144 = vmatprep.mubr.msk.f32.mxu0 %vm753_vm2, %v3784_v36 }
  0xb3   : > { %3116 = vmatmul.mubr.msk.f32.vlgmr.msra.gmra.mxu1 %vm753_vm2, %v3669_v63 }
  0xb4   : > { %3118 = vmatprep.mubr.msk.f32.mxu1 %vm753_vm2, %v3707_v13 }
  0xb5   : > { %3145 = vmatmul.mubr.msk.f32.gmra.mxu0 %vm753_vm2, %v3803_v22 }
  0xb6   : > { %3147 = vmatprep.mubr.msk.f32.mxu0 %vm753_vm2, %v3878_v44 }
  0xb7   : > { %3119 = vmatmul.mubr.msk.f32.gmra.mxu1 %vm753_vm2, %v3737_v15 }
  0xb8   : > { %3121 = vmatprep.mubr.msk.f32.mxu1 %vm753_vm2, %v3466_v54 }
  0xb9   : > { %3148 = vmatmul.mubr.msk.f32.gmra.mxu0 %vm753_vm2, %v3881_v46 }
  0xba   : > { %3150 = vmatprep.mubr.msk.f32.mxu0 %vm753_vm2, %v3908_v37 }
  0xbb   : > { %3122 = vmatmul.mubr.msk.f32.gmra.mxu1 %vm753_vm2, %v3508_v19 }
  0xbc   : > { %3124 = vmatprep.mubr.msk.f32.mxu1 %vm753_vm2, %v3570_v58 }
  0xbd   : > { %3151 = vmatmul.mubr.msk.f32.gmra.mxu0 %vm753_vm2, %v3940_v28 }
  0xbe   : > { %3153 = vmatprep.mubr.msk.f32.mxu0 %vm753_vm2, %v3946_v5 }
  0xbf   : > { %3125 = vmatmul.mubr.msk.f32.gmra.mxu1 %vm753_vm2, %v3586_v3 }
  0xc0   : > { %3127 = vmatprep.mubr.msk.f32.mxu1 %vm753_vm2, %v3658_v57 }
  0xc1   : > { %3154 = vmatmul.mubr.msk.f32.gmra.mxu0 %vm753_vm2, %v3957_v8 }
  0xc2   : > { %3156 = vmatprep.mubr.msk.f32.mxu0 %vm753_vm2, %v3963_v10 }
  0xc3   : > { %3128 = vmatmul.mubr.msk.f32.gmra.mxu1 %vm753_vm2, %v3693_v26 }
  0xc4   : > { %3130 = vmatprep.mubr.msk.f32.mxu1 %vm753_vm2, %v3729_v61 }
  0xc5   : > { %3157 = vmatmul.mubr.msk.f32.gmra.mxu0 %vm753_vm2, %v3972_v62 }
  0xc6   : > { %3159 = vmatprep.mubr.msk.f32.mxu0 %vm753_vm2, %v3887_v2 }
  0xc7   : > { %3131 = vmatmul.mubr.msk.f32.gmra.mxu1 %vm753_vm2, %v3753_v34 }
  0xc8   : > { %3133 = vmatprep.mubr.msk.f32.mxu1 %vm753_vm2, %v3884_v31 }
  0xc9   : > { %3160 = vmatmul.mubr.msk.f32.gmra.mxu0 %vm753_vm2, %v4502_v42 }
  0xca   : > { %3162 = vmatprep.mubr.msk.f32.mxu0 %vm753_vm2, %v3929_v41 }
  0xcb   : > { %3134 = vmatmul.mubr.msk.f32.gmra.mxu1 %vm753_vm2, %v3892_v6 }
  0xcc   : > { %3136 = vmatprep.mubr.msk.f32.mxu1 %vm753_vm2, %v3926_v27 }
  0xcd   : > { %3163 = vmatmul.mubr.msk.f32.gmra.mxu0 %vm753_vm2, %v3935_v23 }
  0xcf   : > { %3137 = vmatmul.mubr.msk.f32.gmra.mxu1 %vm753_vm2, %v3932_v56 }
  0xed   : > { %v2935_v43 = vpop.f32.mrf.mxu0 }
  0xef   : > { %v852_v19 = vpop.f32.mrf.mxu0 }
  0xf0   : > { %v2947_v54 = vpop.f32.mrf.mxu1 }
  0xf2   : > { %v892_v20 = vpop.f32.mrf.mxu1 }
  0xfa   : > { %v2938_v21 = vpop.f32.mrf.mxu0  ;;  %v2950_v38 = vpop.f32.mrf.mxu1 }
  0xfc   : > { %v862_v45 = vpop.f32.mrf.mxu0  ;;  %v902_v58 = vpop.f32.mrf.mxu1 }
 0x103   : > { %v2941_v0 = vpop.f32.mrf.mxu0 }
 0x105   : > { %v2953_v3 = vpop.f32.mrf.mxu1  ;;  %v872_v4 = vpop.f32.mrf.mxu0 }
 0x107   : > { %v912_v12 = vpop.f32.mrf.mxu1 }
 0x10d   : > { %v2944_v30 = vpop.f32.mrf.mxu0 }
 0x10f   : > { %v882_v32 = vpop.f32.mrf.mxu0  ;;  %v2956_v35 = vpop.f32.mrf.mxu1 }
 0x111   : > { %v2987_v57 = vpop.f32.mrf.mxu0  ;;  %v4182_v63 = vpop.f32.mrf.mxu1 }
 0x113   : > { %v1249_v16 = vpop.f32.mrf.mxu0  ;;  %v2961_v14 = vpop.f32.mrf.mxu1 }
 0x114   : > { %v1035_v26 = vadd.f32 %v2961_v14, %v2935_v43 }
 0x115   : > { %v1029_v13 = vpop.f32.mrf.mxu1  ;;  %v2990_v39 = vpop.f32.mrf.mxu0 }
 0x116   : > { %v4184_v47 = vadd.f32 %v2987_v57, %v1035_v26  ;;  %v1030_v61 = vadd.f32 %v1029_v13, %v852_v19 }
 0x117   : > { %v2964_v15 = vpop.f32.mrf.mxu1  ;;  %v1259_v34 = vpop.f32.mrf.mxu0 }
 0x118   : > { %v4186_v51 = vadd.f32 %v1249_v16, %v1030_v61  ;;  %v1045_v48 = vadd.f32 %v2964_v15, %v2938_v21 }
 0x119   : > { %v1039_v49 = vpop.f32.mrf.mxu1  ;;  %v2993_v50 = vpop.f32.mrf.mxu0 }
 0x11a   : > { %v4188_v55 = vadd.f32 %v2990_v39, %v1045_v48  ;;  %v1040_v36 = vadd.f32 %v1039_v49, %v862_v45 }
 0x11b   : > { %v2967_v1 = vpop.f32.mrf.mxu1  ;;  %v1269_v22 = vpop.f32.mrf.mxu0 }
 0x11c   : > { %v4190_v2 = vadd.f32 %v1259_v34, %v1040_v36  ;;  %v1055_v7 = vadd.f32 %v2967_v1, %v2941_v0 }
 0x11d   : > { %v1049_v18 = vpop.f32.mrf.mxu1  ;;  %v2996_v59 = vpop.f32.mrf.mxu0 }
 0x11e   : > { %v4192_v44 = vadd.f32 %v2993_v50, %v1055_v7  ;;  %v1050_v46 = vadd.f32 %v1049_v18, %v872_v4 }
 0x11f   : > { %v2970_v31 = vpop.f32.mrf.mxu1  ;;  %v1279_v6 = vpop.f32.mrf.mxu0 }
 0x120   : > { %v4194_v9 = vadd.f32 %v1269_v22, %v1050_v46  ;;  %v1065_v37 = vadd.f32 %v2970_v31, %v2944_v30 }
 0x121   : > { %v1059_v29 = vpop.f32.mrf.mxu1  ;;  %v2999_v40 = vpop.f32.mrf.mxu0 }
 0x122   : > { %v4196_v11 = vadd.f32 %v2996_v59, %v1065_v37  ;;  %v1060_v60 = vadd.f32 %v1059_v29, %v882_v32 }
 0x123   : > { %v2973_v27 = vpop.f32.mrf.mxu1  ;;  %v1289_v41 = vpop.f32.mrf.mxu0 }
 0x124   : > { %v4198_v56 = vadd.f32 %v1279_v6, %v1060_v60  ;;  %v1075_v23 = vadd.f32 %v2973_v27, %v2947_v54 }
 0x125   : > { %v1069_v28 = vpop.f32.mrf.mxu1  ;;  %v3002_v52 = vpop.f32.mrf.mxu0 }
 0x126   : > { %v4200_v5 = vadd.f32 %v2999_v40, %v1075_v23  ;;  %v1070_v25 = vadd.f32 %v1069_v28, %v892_v20 }
 0x127   : > { %v2976_v24 = vpop.f32.mrf.mxu1  ;;  %v1299_v8 = vpop.f32.mrf.mxu0 }
 0x128   : > { %v4202_v53 = vadd.f32 %v1289_v41, %v1070_v25  ;;  %v1085_v10 = vadd.f32 %v2976_v24, %v2950_v38 }
 0x129   : > { %v1079_v62 = vpop.f32.mrf.mxu1  ;;  %v3005_v17 = vpop.f32.mrf.mxu0 }
 0x12a   : > { %v4204_v33 = vadd.f32 %v3002_v52, %v1085_v10  ;;  %v1080_v42 = vadd.f32 %v1079_v62, %v902_v58 }
 0x12b   : > { %v2979_v43 = vpop.f32.mrf.mxu1  ;;  %v1309_v19 = vpop.f32.mrf.mxu0 }
 0x12c   : > { %v4206_v21 = vadd.f32 %v1299_v8, %v1080_v42  ;;  %v1095_v54 = vadd.f32 %v2979_v43, %v2953_v3 }
 0x12d   : > { %v1089_v45 = vpop.f32.mrf.mxu1  ;;  %v3008_v0 = vpop.f32.mrf.mxu0 }
 0x12e   : > { %v4208_v4 = vadd.f32 %v3005_v17, %v1095_v54  ;;  %v1090_v20 = vadd.f32 %v1089_v45, %v912_v12 }
 0x12f   : > { %v2982_v30 = vpop.f32.mrf.mxu1  ;;  %v1319_v32 = vpop.f32.mrf.mxu0 }
 0x130   : > { %v4210_v57 = vadd.f32 %v1309_v19, %v1090_v20  ;;  %v1105_v38 = vadd.f32 %v2982_v30, %v2956_v35 }
 0x131   : > { %v1099_v16 = vpop.f32.mrf.mxu1  ;;  %v4212_v14 = vpop.f32.mrf.mxu0 }
 0x132   : > { %v4214_v26 = vadd.f32 %v3008_v0, %v1105_v38  ;;  %v1100_v58 = vadd.f32 %v1099_v16, %v4182_v63 }
 0x133   : > { %v3013_v13 = vpop.f32.mrf.mxu1  ;;  %v4217_v39 = vpop.f32.mrf.mxu0 }
 0x134   : > { %v4219_v3 = vadd.f32 %v1319_v32, %v1100_v58 }
 0x135   : > { %v1418_v61 = vpop.f32.mrf.mxu1  ;;  %v4221_v15 = vpop.f32.mrf.mxu0 }
 0x137   : > { %v3016_v12 = vpop.f32.mrf.mxu1  ;;  %v4223_v34 = vpop.f32.mrf.mxu0 }
 0x139   : > { %v1428_v48 = vpop.f32.mrf.mxu1  ;;  %v4225_v35 = vpop.f32.mrf.mxu0 }
 0x13b   : > { %v3019_v49 = vpop.f32.mrf.mxu1  ;;  %v4227_v50 = vpop.f32.mrf.mxu0 }
 0x13d   : > { %v1438_v36 = vpop.f32.mrf.mxu1  ;;  %v4229_v1 = vpop.f32.mrf.mxu0 }
 0x13f   : > { %v3022_v63 = vpop.f32.mrf.mxu1  ;;  %v4231_v22 = vpop.f32.mrf.mxu0 }
 0x141   : > { %v1448_v7 = vpop.f32.mrf.mxu1  ;;  %v4233_v18 = vpop.f32.mrf.mxu0 }
 0x143   : > { %v3025_v59 = vpop.f32.mrf.mxu1  ;;  %v4235_v46 = vpop.f32.mrf.mxu0 }
 0x145   : > { %v1458_v31 = vpop.f32.mrf.mxu1  ;;  %v4237_v6 = vpop.f32.mrf.mxu0 }
 0x147   : > { %v3028_v37 = vpop.f32.mrf.mxu1  ;;  %v4239_v29 = vpop.f32.mrf.mxu0 }
 0x149   : > { %v1468_v40 = vpop.f32.mrf.mxu1  ;;  %v4241_v60 = vpop.f32.mrf.mxu0 }
 0x14b   : > { %v3031_v27 = vpop.f32.mrf.mxu1  ;;  %v4243_v41 = vpop.f32.mrf.mxu0 }
 0x14c   : > { %4503 = vst [vmem:[#allocation5_spill] sm:$0xff] %v4243_v41 }
 0x14d   : > { %v4245_v23 = vpop.f32.mrf.mxu1  ;;  %v4247_v28 = vpop.f32.mrf.mxu0 }
 0x14e   : > { %4504 = vst [vmem:[#allocation6_spill] sm:$0xff] %v4247_v28 }
 0x14f   : > { %v3034_v52 = vpop.f32.mrf.mxu1  ;;  %v4249_v25 = vpop.f32.mrf.mxu0 }
 0x150   : > { %4505 = vst [vmem:[#allocation7_spill] sm:$0xff] %v4249_v25 }
 0x151   : > { %v1488_v24 = vpop.f32.mrf.mxu1  ;;  %v3091_v8 = vpop.f32.mrf.mxu0 }
 0x153   : > { %v3065_v10 = vpop.f32.mrf.mxu1  ;;  %v4251_v62 = vpop.f32.mrf.mxu0 }
 0x155   : > { %v1763_v17 = vpop.f32.mrf.mxu1  ;;  %v4253_v42 = vpop.f32.mrf.mxu0 }
 0x156   : > { %4506 = vst [vmem:[#allocation8_spill] sm:$0xff] %v4253_v42 }
 0x157   : > { %v3068_v43 = vpop.f32.mrf.mxu1  ;;  %v4255_v19 = vpop.f32.mrf.mxu0 }
 0x158   : > { %4507 = vst [vmem:[#allocation9_spill] sm:$0xff] %v4255_v19 }
 0x159   : > { %v1773_v54 = vpop.f32.mrf.mxu1  ;;  %v4257_v45 = vpop.f32.mrf.mxu0 }
 0x15a   : > { %4508 = vst [vmem:[#allocation10_spill] sm:$0xff] %v4257_v45 }
 0x15b   : > { %v3071_v0 = vpop.f32.mrf.mxu1  ;;  %v4259_v20 = vpop.f32.mrf.mxu0 }
 0x15c   : > { %4509 = vst [vmem:[#allocation11_spill] sm:$0xff] %v4259_v20 }
 0x15d   : > { %v1783_v30 = vpop.f32.mrf.mxu1  ;;  %v4261_v32 = vpop.f32.mrf.mxu0 }
 0x15e   : > { %4510 = vst [vmem:[#allocation12_spill] sm:$0xff] %v4261_v32  ;;  %v1498_v32 = vadd.f32 %v3013_v13, %v4184_v47  ;;  %v1501_v47 = vadd.f32 %v1438_v36, %v4194_v9  ;;  %v1504_v13 = vadd.f32 %v3022_v63, %v4196_v11  ;;  %v1508_v36 = vadd.f32 %v3028_v37, %v4204_v33 }
 0x15f   : > { %v4263_v38 = vpop.f32.mrf.mxu1  ;;  %v4265_v16 = vpop.f32.mrf.mxu0 }
 0x160   : > { %4511 = vst [vmem:[#allocation13_spill] sm:$0xff] %v4263_v38  ;;  %4512 = vst [vmem:[#allocation14_spill] sm:$0xff] %v4265_v16  ;;  %v1674_v11 = vadd.f32 %v4227_v50, %v1501_v47 }
 0x161   : > { %v4267_v58 = vpop.f32.mrf.mxu1  ;;  %v4269_v25 = vpop.f32.mrf.mxu0 }
 0x162   : > { %4513 = vst [vmem:[#allocation15_spill] sm:$0xff] %v4267_v58  ;;  %4514 = vst [vmem:[#allocation16_spill] sm:$0xff] %v4269_v25  ;;  %v1497_v25 = vadd.f32 %v1418_v61, %v4186_v51 }
 0x163   : > { %v4271_v28 = vpop.f32.mrf.mxu1  ;;  %v4273_v19 = vpop.f32.mrf.mxu0  ;;  %v4528_v47 = vld [vmem:[#allocation11_spill] sm:$0xff] }
 0x164   : > { %4515 = vst [vmem:[#allocation17_spill] sm:$0xff] %v4271_v28  ;;  %4516 = vst [vmem:[#allocation18_spill] sm:$0xff] %v4273_v19  ;;  %v1500_v28 = vadd.f32 %v3016_v12, %v4188_v55  ;;  %v1499_v19 = vadd.f32 %v1428_v48, %v4190_v2  ;;  %v1670_v51 = vadd.f32 %v4217_v39, %v1497_v25  ;;  %v4522_v25 = vld [vmem:[#allocation8_spill] sm:$0xff] }
 0x165   : > { %v4275_v41 = vpop.f32.mrf.mxu1  ;;  %v4277_v45 = vpop.f32.mrf.mxu0  ;;  %v1503_v55 = vadd.f32 %v1448_v7, %v4198_v56  ;;  %v1506_v48 = vadd.f32 %v3025_v59, %v4200_v5  ;;  %v1677_v39 = vadd.f32 %v4229_v1, %v1504_v13  ;;  %v1505_v56 = vadd.f32 %v1458_v31, %v4202_v53 }
 0x166   : > { %4517 = vst [vmem:[#allocation19_spill] sm:$0xff] %v4275_v41  ;;  %4518 = vst [vmem:[#allocation20_spill] sm:$0xff] %v4277_v45  ;;  %v1671_v45 = vadd.f32 %v4212_v14, %v1498_v32  ;;  %v1673_v61 = vadd.f32 %v4221_v15, %v1500_v28  ;;  %v1672_v12 = vadd.f32 %v4223_v34, %v1499_v19 }
 0x167   : > { %v4279_v20 = vpop.f32.mrf.mxu1  ;;  %v4281_v42 = vpop.f32.mrf.mxu0  ;;  %v1507_v15 = vadd.f32 %v1468_v40, %v4206_v21  ;;  %v1676_v7 = vadd.f32 %v4231_v22, %v1503_v55  ;;  %v1509_v5 = vadd.f32 %v4245_v23, %v4210_v57  ;;  %v1512_v1 = vadd.f32 %v3034_v52, %v4214_v26 }
 0x168   : > { %4519 = vst [vmem:[#allocation21_spill] sm:$0xff] %v4281_v42  ;;  %v1502_v42 = vadd.f32 %v3019_v49, %v4192_v44  ;;  %v1843_v2 = vadd.f32 %v3065_v10, %v1671_v45  ;;  %v1842_v49 = vadd.f32 %v1763_v17, %v1670_v51  ;;  %v1845_v50 = vadd.f32 %v3068_v43, %v1673_v61  ;;  %v4523_v10 = vld [vmem:[#allocation5_spill] sm:$0xff]  ;;  %v4524_v17 = vld [vmem:[#allocation6_spill] sm:$0xff] }
 0x169   : > { %v4284_v38 = vpop.f32.mrf.mxu1  ;;  %v4286_v16 = vpop.f32.mrf.mxu0  ;;  %v1511_v53 = vadd.f32 %v1488_v24, %v4219_v3  ;;  %v1844_v59 = vadd.f32 %v1773_v54, %v1672_v12  ;;  %v1679_v21 = vadd.f32 %v4233_v18, %v1506_v48  ;;  %v1680_v57 = vadd.f32 %v4239_v29, %v1507_v15  ;;  %v4527_v45 = vld [vmem:[#allocation10_spill] sm:$0xff]  ;;  %v4529_v51 = vld [vmem:[#allocation13_spill] sm:$0xff] }
 0x16a   : > { %4520 = vst [vmem:[#allocation22_spill] sm:$0xff] %v4284_v38  ;;  %4521 = vst [vmem:[#allocation23_spill] sm:$0xff] %v4286_v16  ;;  %v1675_v9 = vadd.f32 %v4225_v35, %v1502_v42  ;;  %v1510_v35 = vadd.f32 %v3031_v27, %v4208_v4  ;;  %v2012_v28 = vadd.f32 %v3091_v8, %v1843_v2  ;;  %v4530_v2 = vld [vmem:[#allocation15_spill] sm:$0xff] }
 0x16b   : > { %v4291_v58 = vpop.f32.mrf.mxu1  ;;  %v4293_v41 = vpop.f32.mrf.mxu0  ;;  %v2011_v37 = vadd.f32 %v4251_v62, %v1842_v49  ;;  %v1678_v4 = vadd.f32 %v4235_v46, %v1505_v56  ;;  %v1681_v27 = vadd.f32 %v4237_v6, %v1508_v36  ;;  %v1846_v23 = vadd.f32 %v1783_v30, %v1674_v11  ;;  %v4525_v46 = vld [vmem:[#allocation7_spill] sm:$0xff]  ;;  %v4526_v6 = vld [vmem:[#allocation9_spill] sm:$0xff] }
 0x16c   : > { %v1847_v40 = vadd.f32 %v3071_v0, %v1675_v9  ;;  %v1683_v3 = vadd.f32 %v4241_v60, %v1510_v35  ;;  %v2014_v24 = vadd.f32 %v4522_v25, %v1845_v50  ;;  %v1682_v62 = vadd.f32 %v4523_v10, %v1509_v5  ;;  %v4531_v12 = vld [vmem:[#allocation17_spill] sm:$0xff] }
 0x16d   : > { %v4299_v38 = vpop.f32.mrf.mxu1  ;;  %v4301_v16 = vpop.f32.mrf.mxu0  ;;  %v4335_v42 = vadd.f32 %v4524_v17, %v1512_v1  ;;  %v4338_v43 = vadd.f32 %v4525_v46, %v1511_v53  ;;  %v2013_v29 = vadd.f32 %v4526_v6, %v1844_v59  ;;  %v2015_v13 = vadd.f32 %v4528_v47, %v1846_v23  ;;  %v4538_v10 = vld [vmem:[#allocation20_spill] sm:$0xff] }
 0x16e   : > { %v2016_v0 = vadd.f32 %v4527_v45, %v1847_v40  ;;  %v1849_v55 = vadd.f32 %v4529_v51, %v1677_v39  ;;  %v1848_v61 = vadd.f32 %v4530_v2, %v1676_v7  ;;  %v1851_v9 = vadd.f32 %v4531_v12, %v1679_v21  ;;  %v4534_v21 = vld [vmem:[#allocation12_spill] sm:$0xff]  ;;  %v4535_v40 = vld [vmem:[#allocation14_spill] sm:$0xff] }
 0x16f   : > { %v4307_v14 = vpop.f32.mrf.mxu1  ;;  %v4309_v44 = vpop.f32.mrf.mxu0 }
 0x171   : > { %v4318_v34 = vpop.f32.mrf.mxu1  ;;  %v3143_v63 = vpop.f32.mrf.mxu0  ;;  %v4533_v1 = vld [vmem:[#allocation22_spill] sm:$0xff] }
 0x172   : > { %v1852_v53 = vadd.f32 %v4533_v1, %v1680_v57 }
 0x173   : > { %v3117_v33 = vpop.f32.mrf.mxu1  ;;  %v2277_v31 = vpop.f32.mrf.mxu0 }
 0x174   : > { %v2185_v22 = vadd.f32 %v3117_v33, %v2012_v28  ;;  %v1853_v28 = vadd.f32 %v4279_v20, %v1681_v27 }
 0x175   : > { %v2105_v26 = vpop.f32.mrf.mxu1  ;;  %v3146_v52 = vpop.f32.mrf.mxu0 }
 0x176   : > { %v2357_v8 = vadd.f32 %v3143_v63, %v2185_v22  ;;  %v2184_v18 = vadd.f32 %v2105_v26, %v2011_v37  ;;  %v4532_v63 = vld [vmem:[#allocation19_spill] sm:$0xff]  ;;  %v2018_v37 = vadd.f32 %v4534_v21, %v1849_v55  ;;  %v2017_v22 = vadd.f32 %v4535_v40, %v1848_v61  ;;  %v4536_v26 = vld [vmem:[#allocation16_spill] sm:$0xff] }
 0x177   : > { %v3120_v19 = vpop.f32.mrf.mxu1  ;;  %v2287_v54 = vpop.f32.mrf.mxu0  ;;  %v1850_v35 = vadd.f32 %v4532_v63, %v1678_v4  ;;  %v2022_v17 = vadd.f32 %v4538_v10, %v1853_v28 }
 0x178   : > { %2373 = vst.msk [vmem:[%s3341_s24 + $0x8] sm:$0xff] %vm753_vm2, %v2357_v8  ;;  %v2424_v60 = vmul.f32 %v2357_v8, %v2357_v8  ;;  %v2356_v30 = vadd.f32 %v2277_v31, %v2184_v18  ;;  %v2187_v32 = vadd.f32 %v3120_v19, %v2014_v24  ;;  %v2390_v49 = vsel %vm753_vm2, %v2357_v8, 0.0  ;;  %v4537_v8 = vld [vmem:[#allocation18_spill] sm:$0xff] }
 0x179   : > { %v2115_v11 = vpop.f32.mrf.mxu1  ;;  %v3149_v48 = vpop.f32.mrf.mxu0  ;;  %v2019_v18 = vadd.f32 %v4537_v8, %v1850_v35 }
 0x17a   : > { %2372 = vst.msk [vmem:[%s3341_s24] sm:$0xff] %vm753_vm2, %v2356_v30  ;;  %v2389_v56 = vsel %vm753_vm2, %v2356_v30, 0.0  ;;  %v2423_v36 = vmul.f32 %v2356_v30, %v2356_v30  ;;  %v2359_v15 = vadd.f32 %v3146_v52, %v2187_v32  ;;  %v2186_v50 = vadd.f32 %v2115_v11, %v2013_v29 }
 0x17b   : > { %v2391_v39 = vadd.f32 %v2390_v49, %v2389_v56  ;;  %v3123_v7 = vpop.f32.mrf.mxu1  ;;  %v2297_v5 = vpop.f32.mrf.mxu0  ;;  %v2440_v59 = vsel %vm753_vm2, %v2424_v60, 0.0  ;;  %v2020_v52 = vadd.f32 %v4536_v26, %v1851_v9  ;;  %v1854_v32 = vadd.f32 %v4299_v38, %v1682_v62  ;;  %v4540_v56 = vld [vmem:[#allocation23_spill] sm:$0xff] }
 0x17c   : > { %v2439_v33 = vsel %vm753_vm2, %v2423_v36, 0.0  ;;  %2375 = vst.msk [vmem:[%s3341_s24 + $0x18] sm:$0xff] %vm753_vm2, %v2359_v15  ;;  %v2189_v31 = vadd.f32 %v3123_v7, %v2016_v0  ;;  %v2358_v20 = vadd.f32 %v2287_v54, %v2186_v50  ;;  %v2426_v57 = vmul.f32 %v2359_v15, %v2359_v15  ;;  %v4539_v54 = vld [vmem:[#allocation21_spill] sm:$0xff] }
 0x17d   : > { %v2441_v4 = vadd.f32 %v2440_v59, %v2439_v33  ;;  %v2125_v27 = vpop.f32.mrf.mxu1  ;;  %v3152_v23 = vpop.f32.mrf.mxu0  ;;  %v2021_v45 = vadd.f32 %v4539_v54, %v1852_v53  ;;  %v1855_v0 = vadd.f32 %v4291_v58, %v1683_v3  ;;  %v2394_v47 = vsel %vm753_vm2, %v2359_v15, 0.0 }
 0x17e   : > { %v2361_v25 = vadd.f32 %v3149_v48, %v2189_v31  ;;  %v2188_v24 = vadd.f32 %v2125_v27, %v2015_v13  ;;  %2374 = vst.msk [vmem:[%s3341_s24 + $0x10] sm:$0xff] %vm753_vm2, %v2358_v20  ;;  %v2392_v46 = vsel %vm753_vm2, %v2358_v20, 0.0  ;;  %v2425_v6 = vmul.f32 %v2358_v20, %v2358_v20 }
 0x17f   : > { %v3126_v29 = vpop.f32.mrf.mxu1  ;;  %v2307_v19 = vpop.f32.mrf.mxu0  ;;  %v2393_v60 = vadd.f32 %v2392_v46, %v2391_v39  ;;  %v2444_v61 = vsel %vm753_vm2, %v2426_v57, 0.0  ;;  %v2024_v36 = vadd.f32 %v4540_v56, %v1855_v0  ;;  %v2023_v21 = vadd.f32 %v4293_v41, %v1854_v32 }
 0x180   : > { %2377 = vst.msk [vmem:[%s3341_s24 + $0x28] sm:$0xff] %vm753_vm2, %v2361_v25  ;;  %v2360_v30 = vadd.f32 %v2297_v5, %v2188_v24  ;;  %v2442_v13 = vsel %vm753_vm2, %v2425_v6, 0.0  ;;  %v2191_v51 = vadd.f32 %v3126_v29, %v2018_v37  ;;  %v2428_v9 = vmul.f32 %v2361_v25, %v2361_v25 }
 0x181   : > { %v2135_v55 = vpop.f32.mrf.mxu1  ;;  %v3155_v2 = vpop.f32.mrf.mxu0  ;;  %v2443_v12 = vadd.f32 %v2442_v13, %v2441_v4  ;;  %v2395_v58 = vadd.f32 %v2394_v47, %v2393_v60  ;;  %v2398_v28 = vsel %vm753_vm2, %v2361_v25, 0.0  ;;  %v1857_v27 = vadd.f32 %v4307_v14, %v4335_v42 }
 0x182   : > { %2376 = vst.msk [vmem:[%s3341_s24 + $0x20] sm:$0xff] %vm753_vm2, %v2360_v30  ;;  %v2396_v3 = vsel %vm753_vm2, %v2360_v30, 0.0  ;;  %v2427_v11 = vmul.f32 %v2360_v30, %v2360_v30  ;;  %v2363_v48 = vadd.f32 %v3152_v23, %v2191_v51  ;;  %v2190_v38 = vadd.f32 %v2135_v55, %v2017_v22 }
 0x183   : > { %v3129_v62 = vpop.f32.mrf.mxu1  ;;  %v2317_v49 = vpop.f32.mrf.mxu0  ;;  %v2397_v15 = vadd.f32 %v2396_v3, %v2395_v58  ;;  %v2445_v63 = vadd.f32 %v2444_v61, %v2443_v12  ;;  %v2448_v37 = vsel %vm753_vm2, %v2428_v9, 0.0  ;;  %v1856_v23 = vadd.f32 %v4318_v34, %v4338_v43 }
 0x184   : > { %v2193_v35 = vadd.f32 %v3129_v62, %v2020_v52  ;;  %v2446_v39 = vsel %vm753_vm2, %v2427_v11, 0.0  ;;  %2379 = vst.msk [vmem:[%s3341_s24 + $0x38] sm:$0xff] %vm753_vm2, %v2363_v48  ;;  %v2430_v50 = vmul.f32 %v2363_v48, %v2363_v48  ;;  %v2362_v7 = vadd.f32 %v2307_v19, %v2190_v38 }
 0x185   : > { %v2145_v5 = vpop.f32.mrf.mxu1  ;;  %v3158_v1 = vpop.f32.mrf.mxu0  ;;  %v2447_v53 = vadd.f32 %v2446_v39, %v2445_v63  ;;  %v2399_v59 = vadd.f32 %v2398_v28, %v2397_v15  ;;  %v2402_v41 = vsel %vm753_vm2, %v2363_v48, 0.0  ;;  %v2026_v32 = vadd.f32 %v4301_v16, %v1857_v27 }
 0x186   : > { %v2365_v33 = vadd.f32 %v3155_v2, %v2193_v35  ;;  %v2192_v31 = vadd.f32 %v2145_v5, %v2019_v18  ;;  %2378 = vst.msk [vmem:[%s3341_s24 + $0x30] sm:$0xff] %vm753_vm2, %v2362_v7  ;;  %v2400_v40 = vsel %vm753_vm2, %v2362_v7, 0.0  ;;  %v2429_v22 = vmul.f32 %v2362_v7, %v2362_v7 }
 0x187   : > { %v3132_v4 = vpop.f32.mrf.mxu1  ;;  %v2327_v20 = vpop.f32.mrf.mxu0  ;;  %v2401_v26 = vadd.f32 %v2400_v40, %v2399_v59  ;;  %v2449_v52 = vadd.f32 %v2448_v37, %v2447_v53  ;;  %v2452_v10 = vsel %vm753_vm2, %v2430_v50, 0.0  ;;  %v2025_v47 = vadd.f32 %v4309_v44, %v1856_v23 }
 0x188   : > { %2381 = vst.msk [vmem:[%s3341_s24 + $0x48] sm:$0xff] %vm753_vm2, %v2365_v33  ;;  %v2450_v57 = vsel %vm753_vm2, %v2429_v22, 0.0  ;;  %v2364_v25 = vadd.f32 %v2317_v49, %v2192_v31  ;;  %v2195_v24 = vadd.f32 %v3132_v4, %v2022_v17  ;;  %v2432_v6 = vmul.f32 %v2365_v33, %v2365_v33 }
 0x189   : > { %v2155_v8 = vpop.f32.mrf.mxu1  ;;  %v3161_v18 = vpop.f32.mrf.mxu0  ;;  %v2451_v46 = vadd.f32 %v2450_v57, %v2449_v52  ;;  %v2403_v14 = vadd.f32 %v2402_v41, %v2401_v26  ;;  %v2388_v57 = vld [vmem:[#allocation2] sm:$0xff] }
 0x18a   : > { %v2194_v42 = vadd.f32 %v2155_v8, %v2021_v45  ;;  %2380 = vst.msk [vmem:[%s3341_s24 + $0x40] sm:$0xff] %vm753_vm2, %v2364_v25  ;;  %v2404_v34 = vsel %vm753_vm2, %v2364_v25, 0.0  ;;  %v2431_v43 = vmul.f32 %v2364_v25, %v2364_v25  ;;  %v2367_v29 = vadd.f32 %v3158_v1, %v2195_v24 }
 0x18b   : > { %v3135_v19 = vpop.f32.mrf.mxu1  ;;  %v2405_v54 = vadd.f32 %v2404_v34, %v2403_v14  ;;  %v2453_v0 = vadd.f32 %v2452_v10, %v2451_v46  ;;  %v2337_v30 = vpop.f32.mrf.mxu0  ;;  %v2406_v45 = vsel %vm753_vm2, %v2365_v33, 0.0  ;;  %v2456_v58 = vsel %vm753_vm2, %v2432_v6, 0.0  ;;  %v2422_v10 = vld [vmem:[#allocation3] sm:$0xff] }
 0x18c   : > { %v2366_v17 = vadd.f32 %v2327_v20, %v2194_v42  ;;  %v2197_v60 = vadd.f32 %v3135_v19, %v2024_v36  ;;  %v2454_v13 = vsel %vm753_vm2, %v2431_v43, 0.0  ;;  %2383 = vst.msk [vmem:[%s3341_s24 + $0x58] sm:$0xff] %vm753_vm2, %v2367_v29  ;;  %v2434_v16 = vmul.f32 %v2367_v29, %v2367_v29 }
 0x18d   : > { %v2165_v51 = vpop.f32.mrf.mxu1  ;;  %v2455_v55 = vadd.f32 %v2454_v13, %v2453_v0  ;;  %v2407_v2 = vadd.f32 %v2406_v45, %v2405_v54  ;;  %v3164_v49 = vpop.f32.mrf.mxu0  ;;  %v2410_v56 = vsel %vm753_vm2, %v2367_v29, 0.0 }
 0x18e   : > { %2382 = vst.msk [vmem:[%s3341_s24 + $0x50] sm:$0xff] %vm753_vm2, %v2366_v17  ;;  %v2408_v61 = vsel %vm753_vm2, %v2366_v17, 0.0  ;;  %v2433_v12 = vmul.f32 %v2366_v17, %v2366_v17  ;;  %v2369_v3 = vadd.f32 %v3161_v18, %v2197_v60  ;;  %v2196_v44 = vadd.f32 %v2165_v51, %v2023_v21 }
 0x18f   : > { %v3138_v9 = vpop.f32.mrf.mxu1  ;;  %v2409_v11 = vadd.f32 %v2408_v61, %v2407_v2  ;;  %v2457_v48 = vadd.f32 %v2456_v58, %v2455_v55  ;;  %v2460_v50 = vsel %vm753_vm2, %v2434_v16, 0.0  ;;  %v2347_v33 = vpop.f32.mrf.mxu0 }
 0x190   : > { %v2458_v38 = vsel %vm753_vm2, %v2433_v12, 0.0  ;;  %v2199_v62 = vadd.f32 %v3138_v9, %v2026_v32  ;;  %2385 = vst.msk [vmem:[%s3341_s24 + $0x68] sm:$0xff] %vm753_vm2, %v2369_v3  ;;  %v2368_v36 = vadd.f32 %v2337_v30, %v2196_v44  ;;  %v2436_v7 = vmul.f32 %v2369_v3, %v2369_v3 }
 0x191   : > { %v2175_v15 = vpop.f32.mrf.mxu1  ;;  %v2459_v63 = vadd.f32 %v2458_v38, %v2457_v48  ;;  %v2411_v35 = vadd.f32 %v2410_v56, %v2409_v11  ;;  %v2414_v31 = vsel %vm753_vm2, %v2369_v3, 0.0 }
 0x192   : > { %v2371_v28 = vadd.f32 %v3164_v49, %v2199_v62  ;;  %v2198_v39 = vadd.f32 %v2175_v15, %v2025_v47  ;;  %2384 = vst.msk [vmem:[%s3341_s24 + $0x60] sm:$0xff] %vm753_vm2, %v2368_v36  ;;  %v2412_v5 = vsel %vm753_vm2, %v2368_v36, 0.0  ;;  %v2435_v1 = vmul.f32 %v2368_v36, %v2368_v36 }
 0x193   : > { %v2413_v53 = vadd.f32 %v2412_v5, %v2411_v35  ;;  %v2461_v59 = vadd.f32 %v2460_v50, %v2459_v63  ;;  %v2464_v4 = vsel %vm753_vm2, %v2436_v7, 0.0 }
 0x194   : > { %2387 = vst.msk [vmem:[%s3341_s24 + $0x78] sm:$0xff] %vm753_vm2, %v2371_v28  ;;  %v2462_v21 = vsel %vm753_vm2, %v2435_v1, 0.0  ;;  %v2370_v37 = vadd.f32 %v2347_v33, %v2198_v39  ;;  %v2438_v20 = vmul.f32 %v2371_v28, %v2371_v28  ;;  %v2418_v41 = vsel %vm753_vm2, %v2371_v28, 0.0 }
 0x195   : > { %v2463_v40 = vadd.f32 %v2462_v21, %v2461_v59  ;;  %v2415_v22 = vadd.f32 %v2414_v31, %v2413_v53 }
 0x196   : > { %2386 = vst.msk [vmem:[%s3341_s24 + $0x70] sm:$0xff] %vm753_vm2, %v2370_v37  ;;  %v2416_v27 = vsel %vm753_vm2, %v2370_v37, 0.0  ;;  %v2437_v23 = vmul.f32 %v2370_v37, %v2370_v37  ;;  %v2468_v18 = vsel %vm753_vm2, %v2438_v20, 0.0 }
 0x197   : > { %v2417_v26 = vadd.f32 %v2416_v27, %v2415_v22  ;;  %v2465_v52 = vadd.f32 %v2464_v4, %v2463_v40 }
 0x198   : > { %v2466_v25 = vsel %vm753_vm2, %v2437_v23, 0.0 }
 0x199   : > { %v2419_v24 = vadd.f32 %v2418_v41, %v2417_v26  ;;  %v2467_v8 = vadd.f32 %v2466_v25, %v2465_v52 }
 0x19b   : > { %v2420_v46 = vadd.f32 %v2419_v24, %v2388_v57  ;;  %v2469_v14 = vadd.f32 %v2468_v18, %v2467_v8  ;;  %2473 = sbr.rel (%p3350_p12) target bundleno = 465 (0x1d1), region = 52 }
 0x19d   : > { %2421 = vst.msk [vmem:[#allocation2] sm:$0xff] %vm753_vm2, %v2420_v46  ;;  %v2470_v42 = vadd.f32 %v2469_v14, %v2422_v10 }
 0x19f   : > { %2471 = vst.msk [vmem:[#allocation3] sm:$0xff] %vm753_vm2, %v2470_v42 }
 0x1a0   : > { %v2495_v44 = vld [vmem:[%s4466_s4] sm:$0x1]  ;;  %vm2499_vm1 = vcmask 57344  }
 0x1a1   : > { %v2501_v48 = vld [vmem:[%s4467_s5] sm:$0x1] }
 0x1a4   : > { %v2474_v6 = vld [vmem:[#allocation2] sm:$0xff] }
 0x1a5   : > { %v2475_v43 = vsel %vm753_vm2, %v2474_v6, 0.0 }
 0x1a6   : > { %v2482_v34 = vld [vmem:[#allocation3] sm:$0xff]  ;;  %v2476_v19 = vrot.slane %v2475_v43, 4 }
 0x1a7   : > { %v2483_v29 = vsel %vm753_vm2, %v2482_v34, 0.0 }
 0x1a8   : > { %v2484_v54 = vrot.slane %v2483_v29, 4  ;;  %v2477_v0 = vadd.f32 %v2476_v19, %v2475_v43 }
 0x1aa   : > { %v2485_v17 = vadd.f32 %v2484_v54, %v2483_v29  ;;  %v2478_v60 = vrot.slane %v2477_v0, 2 }
 0x1ac   : > { %v2486_v30 = vrot.slane %v2485_v17, 2  ;;  %v2479_v32 = vadd.f32 %v2478_v60, %v2477_v0 }
 0x1ae   : > { %v2487_v47 = vadd.f32 %v2486_v30, %v2485_v17  ;;  %v2480_v45 = vrot.slane %v2479_v32, 1 }
 0x1b0   : > { %v2488_v13 = vrot.slane %v2487_v47, 1  ;;  %v2481_v51 = vadd.f32 %v2480_v45, %v2479_v32 }
 0x1b2   : > { %v2489_v55 = vadd.f32 %v2488_v13, %v2487_v47  ;;  %v2490_v2 = vmul.f32 0.001953125, %v2481_v51 }
 0x1b4   : > { %v2491_v61 = vmul.f32 0.001953125, %v2489_v55  ;;  %v2492_v12 = vmul.f32 %v2490_v2, %v2490_v2 }
 0x1b6   : > { %v2493_v58 = vsub.f32 %v2491_v61, %v2492_v12 }
 0x1b8   : > { %v2494_v16 = vmax.f32 %v2493_v58, 0.0 }
 0x1ba   : > { %v2496_v3 = vadd.f32 1e-05, %v2494_v16 }
 0x1bc   : > { %3210 = vrsqrt.f32 %v2496_v3 }
 0x1c9   : > { %v3211_v9 = vpop.eup %3210 }
 0x1ca   : > { %v2498_v11 = vmul.f32 %v3211_v9, %v2495_v44 }
 0x1cc   : > { %2500 = vst.msk [vmem:[%s4469_s7] sm:$0x1] %vm2499_vm1, %v2498_v11  ;;  %v2502_v38 = vmul.f32 %v2498_v11, %v2490_v2 }
 0x1ce   : > { %v2503_v62 = vsub.f32 %v2501_v48, %v2502_v38 }
 0x1d0   : > { %2504 = vst.msk [vmem:[%s4470_s8] sm:$0x1] %vm2499_vm1, %v2503_v62 }
 0x1d1 PF: > { %s19_s9 = sadd.s32 1, %s3250_s9   ;;  %s4541_s25 = sld [smem:[#allocation4_spill]] }
 0x1d2   : > { %p16_p13 = scmp.ge.s32.totalorder %s19_s9, 6   ;;  %s4542_s27 = smov %s3242_s29 }
 0x1d3   : > { %s4543_s28 = smov %s3246_s30  ;;  %s4544_s29 = smov %s4547_s10 }
 0x1d4   :  { %18 = sbr.rel (!%p16_p13) target bundleno = 3 (0x3), region = 106 }
 0x1d7   : > { %s4545_s30 = smov %s4541_s25 }

</bundles_post_ra>
